<compile_context>
chip_gen: v5e
topology: v5e:2x2
jax: 0.10.0
libtpu: 0.0.40
codegen_flags: <defaults>
</compile_context>

<pallas_src>
import functools

import jax
import jax.numpy as jnp
import numpy as np
from jax.experimental import pallas as pl
from jax.experimental.pallas import tpu as pltpu


# ------------------------------ fused kernel --------------------------------

def _shift_up(v, k):
    """result[r] = v[r + k] for r < n - k; zero rows at the tail (never read)."""
    if k == 0:
        return v
    pad = jnp.zeros((k, v.shape[1]), v.dtype)
    return jnp.concatenate([v[k:, :], pad], axis=0)


def _lenet_kernel(x_ref, a1_ref, b1_ref, a2_ref, b2_ref,
                  w1_ref, c1_ref, w2_ref, c2_ref, w3_ref, c3_ref,
                  o_ref, *, tb):
    """Fused LeNet forward for a tile of `tb` images.

    x_ref : [tb*32, 96] bf16, row = b*32 + h, lane = w*3 + c (NHWC row-major).
    a1/a2 : banded conv matrices [5*96, 168] / [5*84, 160] bf16.
    b1/b2 : lane-replicated conv biases [1, 168] / [1, 160] f32.
    w1/w2/w3, c1/c2/c3 : FC weights (in-major) bf16 and biases [1, N] f32.
    o_ref : [1, tb, 10] f32 logits (one row per image of the tile).
    """
    x = x_ref[...]

    # --- conv1 (5x5, 3->6) + bias + ReLU + 2x2 max-pool ---------------------
    lhs = jnp.concatenate([_shift_up(x, ki) for ki in range(5)], axis=1)
    y = jnp.dot(lhs, a1_ref[...], preferred_element_type=jnp.float32)
    y = jnp.maximum(y + b1_ref[...], 0.0)           # [n,168], lane = dw*84 + wp*6 + co
    p = jnp.maximum(y[:, :84], y[:, 84:])           # max over dw   (W pool)
    m1 = jnp.maximum(p, _shift_up(p, 1))            # max over dh   (H pool)
    m1 = m1.astype(jnp.bfloat16)                    # valid at rows b*32 + 2*hp

    # --- conv2 (5x5, 6->16) + bias + ReLU + 2x2 max-pool --------------------
    lhs = jnp.concatenate([_shift_up(m1, 2 * ki) for ki in range(5)], axis=1)
    y = jnp.dot(lhs, a2_ref[...], preferred_element_type=jnp.float32)
    y = jnp.maximum(y + b2_ref[...], 0.0)           # valid at rows b*32 + 2*h2
    p = jnp.maximum(y[:, :80], y[:, 80:])
    q = jnp.maximum(p, _shift_up(p, 2))             # valid at rows b*32 + 4*hp2
    q = q.astype(jnp.bfloat16)

    # --- fc1 (400->120): absorbs the 5-row gather via row-shifted matmul ----
    lhs = jnp.concatenate([_shift_up(q, 4 * hp) for hp in range(5)], axis=1)
    h = jnp.dot(lhs, w1_ref[...], preferred_element_type=jnp.float32)
    h = jnp.maximum(h + c1_ref[...], 0.0).astype(jnp.bfloat16)

    # --- fc2 (120->84) + ReLU, fc3 (84->10) ----------------------------------
    h = jnp.dot(h, w2_ref[...], preferred_element_type=jnp.float32)
    h = jnp.maximum(h + c2_ref[...], 0.0).astype(jnp.bfloat16)
    logits = jnp.dot(h, w3_ref[...], preferred_element_type=jnp.float32) + c3_ref[...]

    # Valid logits live at rows b*32 -- one row per image of the tile.
    out = jnp.concatenate([logits[b * 32:b * 32 + 1, :] for b in range(tb)], axis=0)
    o_ref[0] = out


# ------------------------------ wrapper --------------------------------------

def forward(params, x_nchw, tb=8):
    """x_nchw: [B, 3, 32, 32] f32 (PyTorch interface) -> logits [B, 10] f32."""
    B = x_nchw.shape[0]
    tb = max(1, min(tb, B))
    grid = -(-B // tb)                      # cdiv
    bp = grid * tb

    # One-time layout change: NCHW -> rows (b*32 + h) x lanes (w*3 + c), bf16.
    x = jnp.transpose(x_nchw, (0, 2, 3, 1)).reshape(B * 32, 96).astype(jnp.bfloat16)
    if bp != B:
        x = jnp.pad(x, ((0, (bp - B) * 32), (0, 0)))

    def full2d(a):
        return pl.BlockSpec(a.shape, lambda i: (0, 0))

    w_args = (params["a1"], params["b1"], params["a2"], params["b2"],
              params["w1"], params["c1"], params["w2"], params["c2"],
              params["w3"], params["c3"])

    out = pl.pallas_call(
        functools.partial(_lenet_kernel, tb=tb),
        out_shape=jax.ShapeDtypeStruct((grid, tb, 10), jnp.float32),
        grid=(grid,),
        in_specs=[pl.BlockSpec((tb * 32, 96), lambda i: (i, 0))]
                 + [full2d(w) for w in w_args],
        out_specs=pl.BlockSpec((1, tb, 10), lambda i: (i, 0, 0)),
        compiler_params=pltpu.CompilerParams(
            dimension_semantics=("parallel",),
            vmem_limit_bytes=32 * 1024 * 1024),
    )(x, *w_args)
    return out.reshape(bp, 10)[:B]


# ------------------------------ parameters -----------------------------------

def init_torch_params(key):
    """PyTorch-layout parameters (uniform +/- 1/sqrt(fan_in), like nn defaults)."""
    def uni(k_, shape, fan_in):
        bound = 1.0 / float(np.sqrt(fan_in))
        return jax.random.uniform(k_, shape, jnp.float32, -bound, bound)

    ks = jax.random.split(key, 10)
    return {
        "conv1_w": uni(ks[0], (6, 3, 5, 5), 3 * 5 * 5),
        "conv1_b": uni(ks[1], (6,), 3 * 5 * 5),
        "conv2_w": uni(ks[2], (16, 6, 5, 5), 6 * 5 * 5),
        "conv2_b": uni(ks[3], (16,), 6 * 5 * 5),
        "fc1_w": uni(ks[4], (120, 400), 400),     # PyTorch Linear: [out, in]
        "fc1_b": uni(ks[5], (120,), 400),
        "fc2_w": uni(ks[6], (84, 120), 120),
        "fc2_b": uni(ks[7], (84,), 120),
        "fc3_w": uni(ks[8], (10, 84), 84),
        "fc3_b": uni(ks[9], (10,), 84),
    }


def _banded_conv_matrix(w, width, wp_out):
    """[Cout, Cin, 5, 5] conv weight -> [5*width*Cin, 2*wp_out*Cout] banded matrix.

    Row index    = ki * (width*Cin) + w_in * Cin + c.
    Column index = dw * (wp_out*Cout) + wp * Cout + co   (conv column wo = 2*wp + dw;
                   non-zero entry iff 0 <= w_in - wo <= 4, value W[co, c, ki, w_in - wo]).
    """
    co_n, ci_n, kh, kw = w.shape
    wt = np.transpose(np.asarray(w, np.float32), (2, 3, 1, 0))     # [ki, kj, c, co]
    a = np.zeros((kh, width * ci_n, 2 * wp_out * co_n), np.float32)
    for ki in range(kh):
        for kj in range(kw):
            for dw in range(2):
                for wp in range(wp_out):
                    w_in = 2 * wp + dw + kj
                    col = dw * wp_out * co_n + wp * co_n
                    a[ki, w_in * ci_n:(w_in + 1) * ci_n, col:col + co_n] = wt[ki, kj]
    return a.reshape(kh * width * ci_n, 2 * wp_out * co_n)


def prepare_params(tp):
    """One-time conversion of PyTorch-layout params to kernel-ready layout."""
    f1 = np.asarray(tp["fc1_w"], np.float32)                        # [120, 400]
    # Kernel flatten order is (hp2, wp2, co); torch's .view order is (co, hp2, wp2).
    hp2, wp2, co = np.meshgrid(np.arange(5), np.arange(5), np.arange(16), indexing="ij")
    flat_idx = (co * 25 + hp2 * 5 + wp2).reshape(400)
    w1k = f1.T[flat_idx, :]                                         # [400, 120]

    bf = lambda a: jnp.asarray(a, jnp.bfloat16)
    f32row = lambda a: jnp.asarray(np.asarray(a, np.float32).reshape(1, -1))
    return {
        "a1": bf(_banded_conv_matrix(np.asarray(tp["conv1_w"]), 32, 14)),   # [480, 168]
        "b1": f32row(np.tile(np.asarray(tp["conv1_b"], np.float32), 28)),   # [1, 168]
        "a2": bf(_banded_conv_matrix(np.asarray(tp["conv2_w"]), 14, 5)),    # [420, 160]
        "b2": f32row(np.tile(np.asarray(tp["conv2_b"], np.float32), 10)),   # [1, 160]
        "w1": bf(w1k),
        "c1": f32row(tp["fc1_b"]),
        "w2": bf(np.asarray(tp["fc2_w"], np.float32).T),                    # [120, 84]
        "c2": f32row(tp["fc2_b"]),
        "w3": bf(np.asarray(tp["fc3_w"], np.float32).T),                    # [84, 10]
        "c3": f32row(tp["fc3_b"]),
    }


# ------------------------------ demo ------------------------------------------

if __name__ == "__main__":
    key = jax.random.PRNGKey(0)
    pkey, xkey = jax.random.split(key)
    params = prepare_params(init_torch_params(pkey))     # layout conversion: once
    # Spatial 32x32 / 3 channels are dictated by the 16*5*5 flatten; batch 8
    # tiled 4 images/step -> grid of 2 so both v7x TensorCores get work.
    x = jax.random.normal(xkey, (8, 3, 32, 32), jnp.float32)

    fwd = jax.jit(functools.partial(forward, tb=4))
    logits = jax.block_until_ready(fwd(params, x))
    assert logits.shape == (8, 10) and logits.dtype == jnp.float32
    print("KERNEL_OK")
</pallas_src>

<mosaic_0001>
module attributes {stable_mosaic.version = 11 : i64} {
  func.func @_lenet_kernel(%arg0: i32, %arg1: memref<128x96xbf16, #tpu.memory_space<vmem>>, %arg2: memref<480x168xbf16, #tpu.memory_space<vmem>>, %arg3: memref<1x168xf32, #tpu.memory_space<vmem>>, %arg4: memref<420x160xbf16, #tpu.memory_space<vmem>>, %arg5: memref<1x160xf32, #tpu.memory_space<vmem>>, %arg6: memref<400x120xbf16, #tpu.memory_space<vmem>>, %arg7: memref<1x120xf32, #tpu.memory_space<vmem>>, %arg8: memref<120x84xbf16, #tpu.memory_space<vmem>>, %arg9: memref<1x84xf32, #tpu.memory_space<vmem>>, %arg10: memref<84x10xbf16, #tpu.memory_space<vmem>>, %arg11: memref<1x10xf32, #tpu.memory_space<vmem>>, %arg12: memref<1x4x10xf32, #tpu.memory_space<vmem>>) attributes {dimension_semantics = [#tpu.dimension_semantics<parallel>], iteration_bounds = array<i64: 2>, scalar_prefetch = 0 : i64, scratch_operands = 0 : i64, tpu.core_type = #tpu.core_type<tc>, window_params = [{transform_indices = @transform_0, window_bounds = array<i64: 128, 96>}, {pipeline_mode = #tpu.pipeline_mode<synchronous>, transform_indices = @transform_1, window_bounds = array<i64: 480, 168>}, {pipeline_mode = #tpu.pipeline_mode<synchronous>, transform_indices = @transform_2, window_bounds = array<i64: 1, 168>}, {pipeline_mode = #tpu.pipeline_mode<synchronous>, transform_indices = @transform_3, window_bounds = array<i64: 420, 160>}, {pipeline_mode = #tpu.pipeline_mode<synchronous>, transform_indices = @transform_4, window_bounds = array<i64: 1, 160>}, {pipeline_mode = #tpu.pipeline_mode<synchronous>, transform_indices = @transform_5, window_bounds = array<i64: 400, 120>}, {pipeline_mode = #tpu.pipeline_mode<synchronous>, transform_indices = @transform_6, window_bounds = array<i64: 1, 120>}, {pipeline_mode = #tpu.pipeline_mode<synchronous>, transform_indices = @transform_7, window_bounds = array<i64: 120, 84>}, {pipeline_mode = #tpu.pipeline_mode<synchronous>, transform_indices = @transform_8, window_bounds = array<i64: 1, 84>}, {pipeline_mode = #tpu.pipeline_mode<synchronous>, transform_indices = @transform_9, window_bounds = array<i64: 84, 10>}, {pipeline_mode = #tpu.pipeline_mode<synchronous>, transform_indices = @transform_10, window_bounds = array<i64: 1, 10>}, {transform_indices = @transform_11, window_bounds = array<i64: 1, 4, 10>}]} {
    %c0 = arith.constant 0 : index
    %c0_0 = arith.constant 0 : index
    %0 = vector.load %arg1[%c0, %c0_0] : memref<128x96xbf16, #tpu.memory_space<vmem>>, vector<128x96xbf16>
    %cst = arith.constant 0.000000e+00 : bf16
    %1 = vector.broadcast %cst : bf16 to vector<1x96xbf16>
    %2 = vector.extract_strided_slice %0 {offsets = [1, 0], sizes = [127, 96], strides = [1, 1]} : vector<128x96xbf16> to vector<127x96xbf16>
    %3 = tpu.concatenate %2, %1 in 0 : vector<127x96xbf16>, vector<1x96xbf16> -> vector<128x96xbf16>
    %cst_1 = arith.constant 0.000000e+00 : bf16
    %4 = vector.broadcast %cst_1 : bf16 to vector<2x96xbf16>
    %5 = vector.extract_strided_slice %0 {offsets = [2, 0], sizes = [126, 96], strides = [1, 1]} : vector<128x96xbf16> to vector<126x96xbf16>
    %6 = tpu.concatenate %5, %4 in 0 : vector<126x96xbf16>, vector<2x96xbf16> -> vector<128x96xbf16>
    %cst_2 = arith.constant 0.000000e+00 : bf16
    %7 = vector.broadcast %cst_2 : bf16 to vector<3x96xbf16>
    %8 = vector.extract_strided_slice %0 {offsets = [3, 0], sizes = [125, 96], strides = [1, 1]} : vector<128x96xbf16> to vector<125x96xbf16>
    %9 = tpu.concatenate %8, %7 in 0 : vector<125x96xbf16>, vector<3x96xbf16> -> vector<128x96xbf16>
    %cst_3 = arith.constant 0.000000e+00 : bf16
    %10 = vector.broadcast %cst_3 : bf16 to vector<4x96xbf16>
    %11 = vector.extract_strided_slice %0 {offsets = [4, 0], sizes = [124, 96], strides = [1, 1]} : vector<128x96xbf16> to vector<124x96xbf16>
    %12 = tpu.concatenate %11, %10 in 0 : vector<124x96xbf16>, vector<4x96xbf16> -> vector<128x96xbf16>
    %13 = tpu.concatenate %0, %3, %6, %9, %12 in 1 : vector<128x96xbf16>, vector<128x96xbf16>, vector<128x96xbf16>, vector<128x96xbf16>, vector<128x96xbf16> -> vector<128x480xbf16>
    %c0_4 = arith.constant 0 : index
    %c0_5 = arith.constant 0 : index
    %14 = vector.load %arg2[%c0_4, %c0_5] : memref<480x168xbf16, #tpu.memory_space<vmem>>, vector<480x168xbf16>
    %cst_6 = arith.constant dense<0.000000e+00> : vector<128x168xf32>
    %15 = tpu.matmul %13, %14, %cst_6 {dimension_numbers = #tpu.dot_dimension_numbers<[1], [0], [0], [1], [0, 0, 1, 1], [], []>} : vector<128x480xbf16>, vector<480x168xbf16>, vector<128x168xf32> -> vector<128x168xf32>
    %c0_7 = arith.constant 0 : index
    %c0_8 = arith.constant 0 : index
    %16 = vector.load %arg3[%c0_7, %c0_8] : memref<1x168xf32, #tpu.memory_space<vmem>>, vector<1x168xf32>
    %17 = vector.broadcast %16 : vector<1x168xf32> to vector<128x168xf32>
    %18 = arith.addf %15, %17 : vector<128x168xf32>
    %cst_9 = arith.constant 0.000000e+00 : f32
    %19 = vector.broadcast %cst_9 : f32 to vector<128x168xf32>
    %20 = arith.maximumf %18, %19 : vector<128x168xf32>
    %21 = vector.extract_strided_slice %20 {offsets = [0, 0], sizes = [128, 84], strides = [1, 1]} : vector<128x168xf32> to vector<128x84xf32>
    %22 = vector.extract_strided_slice %20 {offsets = [0, 84], sizes = [128, 84], strides = [1, 1]} : vector<128x168xf32> to vector<128x84xf32>
    %23 = arith.maximumf %21, %22 : vector<128x84xf32>
    %cst_10 = arith.constant 0.000000e+00 : f32
    %24 = vector.broadcast %cst_10 : f32 to vector<1x84xf32>
    %25 = vector.extract_strided_slice %23 {offsets = [1, 0], sizes = [127, 84], strides = [1, 1]} : vector<128x84xf32> to vector<127x84xf32>
    %26 = tpu.concatenate %25, %24 in 0 : vector<127x84xf32>, vector<1x84xf32> -> vector<128x84xf32>
    %27 = arith.maximumf %23, %26 : vector<128x84xf32>
    %28 = arith.truncf %27 : vector<128x84xf32> to vector<128x84xbf16>
    %cst_11 = arith.constant 0.000000e+00 : bf16
    %29 = vector.broadcast %cst_11 : bf16 to vector<2x84xbf16>
    %30 = vector.extract_strided_slice %28 {offsets = [2, 0], sizes = [126, 84], strides = [1, 1]} : vector<128x84xbf16> to vector<126x84xbf16>
    %31 = tpu.concatenate %30, %29 in 0 : vector<126x84xbf16>, vector<2x84xbf16> -> vector<128x84xbf16>
    %cst_12 = arith.constant 0.000000e+00 : bf16
    %32 = vector.broadcast %cst_12 : bf16 to vector<4x84xbf16>
    %33 = vector.extract_strided_slice %28 {offsets = [4, 0], sizes = [124, 84], strides = [1, 1]} : vector<128x84xbf16> to vector<124x84xbf16>
    %34 = tpu.concatenate %33, %32 in 0 : vector<124x84xbf16>, vector<4x84xbf16> -> vector<128x84xbf16>
    %cst_13 = arith.constant 0.000000e+00 : bf16
    %35 = vector.broadcast %cst_13 : bf16 to vector<6x84xbf16>
    %36 = vector.extract_strided_slice %28 {offsets = [6, 0], sizes = [122, 84], strides = [1, 1]} : vector<128x84xbf16> to vector<122x84xbf16>
    %37 = tpu.concatenate %36, %35 in 0 : vector<122x84xbf16>, vector<6x84xbf16> -> vector<128x84xbf16>
    %cst_14 = arith.constant 0.000000e+00 : bf16
    %38 = vector.broadcast %cst_14 : bf16 to vector<8x84xbf16>
    %39 = vector.extract_strided_slice %28 {offsets = [8, 0], sizes = [120, 84], strides = [1, 1]} : vector<128x84xbf16> to vector<120x84xbf16>
    %40 = tpu.concatenate %39, %38 in 0 : vector<120x84xbf16>, vector<8x84xbf16> -> vector<128x84xbf16>
    %41 = tpu.concatenate %28, %31, %34, %37, %40 in 1 : vector<128x84xbf16>, vector<128x84xbf16>, vector<128x84xbf16>, vector<128x84xbf16>, vector<128x84xbf16> -> vector<128x420xbf16>
    %c0_15 = arith.constant 0 : index
    %c0_16 = arith.constant 0 : index
    %42 = vector.load %arg4[%c0_15, %c0_16] : memref<420x160xbf16, #tpu.memory_space<vmem>>, vector<420x160xbf16>
    %cst_17 = arith.constant dense<0.000000e+00> : vector<128x160xf32>
    %43 = tpu.matmul %41, %42, %cst_17 {dimension_numbers = #tpu.dot_dimension_numbers<[1], [0], [0], [1], [0, 0, 1, 1], [], []>} : vector<128x420xbf16>, vector<420x160xbf16>, vector<128x160xf32> -> vector<128x160xf32>
    %c0_18 = arith.constant 0 : index
    %c0_19 = arith.constant 0 : index
    %44 = vector.load %arg5[%c0_18, %c0_19] : memref<1x160xf32, #tpu.memory_space<vmem>>, vector<1x160xf32>
    %45 = vector.broadcast %44 : vector<1x160xf32> to vector<128x160xf32>
    %46 = arith.addf %43, %45 : vector<128x160xf32>
    %cst_20 = arith.constant 0.000000e+00 : f32
    %47 = vector.broadcast %cst_20 : f32 to vector<128x160xf32>
    %48 = arith.maximumf %46, %47 : vector<128x160xf32>
    %49 = vector.extract_strided_slice %48 {offsets = [0, 0], sizes = [128, 80], strides = [1, 1]} : vector<128x160xf32> to vector<128x80xf32>
    %50 = vector.extract_strided_slice %48 {offsets = [0, 80], sizes = [128, 80], strides = [1, 1]} : vector<128x160xf32> to vector<128x80xf32>
    %51 = arith.maximumf %49, %50 : vector<128x80xf32>
    %cst_21 = arith.constant 0.000000e+00 : f32
    %52 = vector.broadcast %cst_21 : f32 to vector<2x80xf32>
    %53 = vector.extract_strided_slice %51 {offsets = [2, 0], sizes = [126, 80], strides = [1, 1]} : vector<128x80xf32> to vector<126x80xf32>
    %54 = tpu.concatenate %53, %52 in 0 : vector<126x80xf32>, vector<2x80xf32> -> vector<128x80xf32>
    %55 = arith.maximumf %51, %54 : vector<128x80xf32>
    %56 = arith.truncf %55 : vector<128x80xf32> to vector<128x80xbf16>
    %cst_22 = arith.constant 0.000000e+00 : bf16
    %57 = vector.broadcast %cst_22 : bf16 to vector<4x80xbf16>
    %58 = vector.extract_strided_slice %56 {offsets = [4, 0], sizes = [124, 80], strides = [1, 1]} : vector<128x80xbf16> to vector<124x80xbf16>
    %59 = tpu.concatenate %58, %57 in 0 : vector<124x80xbf16>, vector<4x80xbf16> -> vector<128x80xbf16>
    %cst_23 = arith.constant 0.000000e+00 : bf16
    %60 = vector.broadcast %cst_23 : bf16 to vector<8x80xbf16>
    %61 = vector.extract_strided_slice %56 {offsets = [8, 0], sizes = [120, 80], strides = [1, 1]} : vector<128x80xbf16> to vector<120x80xbf16>
    %62 = tpu.concatenate %61, %60 in 0 : vector<120x80xbf16>, vector<8x80xbf16> -> vector<128x80xbf16>
    %cst_24 = arith.constant 0.000000e+00 : bf16
    %63 = vector.broadcast %cst_24 : bf16 to vector<12x80xbf16>
    %64 = vector.extract_strided_slice %56 {offsets = [12, 0], sizes = [116, 80], strides = [1, 1]} : vector<128x80xbf16> to vector<116x80xbf16>
    %65 = tpu.concatenate %64, %63 in 0 : vector<116x80xbf16>, vector<12x80xbf16> -> vector<128x80xbf16>
    %cst_25 = arith.constant 0.000000e+00 : bf16
    %66 = vector.broadcast %cst_25 : bf16 to vector<16x80xbf16>
    %67 = vector.extract_strided_slice %56 {offsets = [16, 0], sizes = [112, 80], strides = [1, 1]} : vector<128x80xbf16> to vector<112x80xbf16>
    %68 = tpu.concatenate %67, %66 in 0 : vector<112x80xbf16>, vector<16x80xbf16> -> vector<128x80xbf16>
    %69 = tpu.concatenate %56, %59, %62, %65, %68 in 1 : vector<128x80xbf16>, vector<128x80xbf16>, vector<128x80xbf16>, vector<128x80xbf16>, vector<128x80xbf16> -> vector<128x400xbf16>
    %c0_26 = arith.constant 0 : index
    %c0_27 = arith.constant 0 : index
    %70 = vector.load %arg6[%c0_26, %c0_27] : memref<400x120xbf16, #tpu.memory_space<vmem>>, vector<400x120xbf16>
    %cst_28 = arith.constant dense<0.000000e+00> : vector<128x120xf32>
    %71 = tpu.matmul %69, %70, %cst_28 {dimension_numbers = #tpu.dot_dimension_numbers<[1], [0], [0], [1], [0, 0, 1, 1], [], []>} : vector<128x400xbf16>, vector<400x120xbf16>, vector<128x120xf32> -> vector<128x120xf32>
    %c0_29 = arith.constant 0 : index
    %c0_30 = arith.constant 0 : index
    %72 = vector.load %arg7[%c0_29, %c0_30] : memref<1x120xf32, #tpu.memory_space<vmem>>, vector<1x120xf32>
    %73 = vector.broadcast %72 : vector<1x120xf32> to vector<128x120xf32>
    %74 = arith.addf %71, %73 : vector<128x120xf32>
    %cst_31 = arith.constant 0.000000e+00 : f32
    %75 = vector.broadcast %cst_31 : f32 to vector<128x120xf32>
    %76 = arith.maximumf %74, %75 : vector<128x120xf32>
    %77 = arith.truncf %76 : vector<128x120xf32> to vector<128x120xbf16>
    %c0_32 = arith.constant 0 : index
    %c0_33 = arith.constant 0 : index
    %78 = vector.load %arg8[%c0_32, %c0_33] : memref<120x84xbf16, #tpu.memory_space<vmem>>, vector<120x84xbf16>
    %cst_34 = arith.constant dense<0.000000e+00> : vector<128x84xf32>
    %79 = tpu.matmul %77, %78, %cst_34 {dimension_numbers = #tpu.dot_dimension_numbers<[1], [0], [0], [1], [0, 0, 1, 1], [], []>} : vector<128x120xbf16>, vector<120x84xbf16>, vector<128x84xf32> -> vector<128x84xf32>
    %c0_35 = arith.constant 0 : index
    %c0_36 = arith.constant 0 : index
    %80 = vector.load %arg9[%c0_35, %c0_36] : memref<1x84xf32, #tpu.memory_space<vmem>>, vector<1x84xf32>
    %81 = vector.broadcast %80 : vector<1x84xf32> to vector<128x84xf32>
    %82 = arith.addf %79, %81 : vector<128x84xf32>
    %cst_37 = arith.constant 0.000000e+00 : f32
    %83 = vector.broadcast %cst_37 : f32 to vector<128x84xf32>
    %84 = arith.maximumf %82, %83 : vector<128x84xf32>
    %85 = arith.truncf %84 : vector<128x84xf32> to vector<128x84xbf16>
    %c0_38 = arith.constant 0 : index
    %c0_39 = arith.constant 0 : index
    %86 = vector.load %arg10[%c0_38, %c0_39] : memref<84x10xbf16, #tpu.memory_space<vmem>>, vector<84x10xbf16>
    %cst_40 = arith.constant dense<0.000000e+00> : vector<128x10xf32>
    %87 = tpu.matmul %85, %86, %cst_40 {dimension_numbers = #tpu.dot_dimension_numbers<[1], [0], [0], [1], [0, 0, 1, 1], [], []>} : vector<128x84xbf16>, vector<84x10xbf16>, vector<128x10xf32> -> vector<128x10xf32>
    %c0_41 = arith.constant 0 : index
    %c0_42 = arith.constant 0 : index
    %88 = vector.load %arg11[%c0_41, %c0_42] : memref<1x10xf32, #tpu.memory_space<vmem>>, vector<1x10xf32>
    %89 = vector.broadcast %88 : vector<1x10xf32> to vector<128x10xf32>
    %90 = arith.addf %87, %89 : vector<128x10xf32>
    %91 = vector.extract_strided_slice %90 {offsets = [0, 0], sizes = [1, 10], strides = [1, 1]} : vector<128x10xf32> to vector<1x10xf32>
    %92 = vector.extract_strided_slice %90 {offsets = [32, 0], sizes = [1, 10], strides = [1, 1]} : vector<128x10xf32> to vector<1x10xf32>
    %93 = vector.extract_strided_slice %90 {offsets = [64, 0], sizes = [1, 10], strides = [1, 1]} : vector<128x10xf32> to vector<1x10xf32>
    %94 = vector.extract_strided_slice %90 {offsets = [96, 0], sizes = [1, 10], strides = [1, 1]} : vector<128x10xf32> to vector<1x10xf32>
    %95 = tpu.concatenate %91, %92, %93, %94 in 0 : vector<1x10xf32>, vector<1x10xf32>, vector<1x10xf32>, vector<1x10xf32> -> vector<4x10xf32>
    %c0_43 = arith.constant 0 : index
    %c0_44 = arith.constant 0 : index
    %c0_45 = arith.constant 0 : index
    %96 = vector.load %arg12[%c0_43, %c0_44, %c0_45] : memref<1x4x10xf32, #tpu.memory_space<vmem>>, vector<1x4x10xf32>
    %97 = vector.shape_cast %96 : vector<1x4x10xf32> to vector<4x10xf32>
    %98 = vector.shape_cast %95 : vector<4x10xf32> to vector<1x4x10xf32>
    tpu.vector_store %arg12[%c0_43, %c0_44, %c0_45], %98 {strides = array<i32>} : memref<1x4x10xf32, #tpu.memory_space<vmem>>, vector<1x4x10xf32>,
    return
  }
  func.func @transform_0(%arg0: i32) -> (i32, i32) {
    %c0_i32 = arith.constant 0 : i32
    %c0_i32_0 = arith.constant 0 : i32
    return %arg0, %c0_i32 : i32, i32
  }
  func.func @transform_1(%arg0: i32) -> (i32, i32) {
    %c0_i32 = arith.constant 0 : i32
    %c0_i32_0 = arith.constant 0 : i32
    %c0_i32_1 = arith.constant 0 : i32
    return %c0_i32, %c0_i32_0 : i32, i32
  }
  func.func @transform_2(%arg0: i32) -> (i32, i32) {
    %c0_i32 = arith.constant 0 : i32
    %c0_i32_0 = arith.constant 0 : i32
    %c0_i32_1 = arith.constant 0 : i32
    return %c0_i32, %c0_i32_0 : i32, i32
  }
  func.func @transform_3(%arg0: i32) -> (i32, i32) {
    %c0_i32 = arith.constant 0 : i32
    %c0_i32_0 = arith.constant 0 : i32
    %c0_i32_1 = arith.constant 0 : i32
    return %c0_i32, %c0_i32_0 : i32, i32
  }
  func.func @transform_4(%arg0: i32) -> (i32, i32) {
    %c0_i32 = arith.constant 0 : i32
    %c0_i32_0 = arith.constant 0 : i32
    %c0_i32_1 = arith.constant 0 : i32
    return %c0_i32, %c0_i32_0 : i32, i32
  }
  func.func @transform_5(%arg0: i32) -> (i32, i32) {
    %c0_i32 = arith.constant 0 : i32
    %c0_i32_0 = arith.constant 0 : i32
    %c0_i32_1 = arith.constant 0 : i32
    return %c0_i32, %c0_i32_0 : i32, i32
  }
  func.func @transform_6(%arg0: i32) -> (i32, i32) {
    %c0_i32 = arith.constant 0 : i32
    %c0_i32_0 = arith.constant 0 : i32
    %c0_i32_1 = arith.constant 0 : i32
    return %c0_i32, %c0_i32_0 : i32, i32
  }
  func.func @transform_7(%arg0: i32) -> (i32, i32) {
    %c0_i32 = arith.constant 0 : i32
    %c0_i32_0 = arith.constant 0 : i32
    %c0_i32_1 = arith.constant 0 : i32
    return %c0_i32, %c0_i32_0 : i32, i32
  }
  func.func @transform_8(%arg0: i32) -> (i32, i32) {
    %c0_i32 = arith.constant 0 : i32
    %c0_i32_0 = arith.constant 0 : i32
    %c0_i32_1 = arith.constant 0 : i32
    return %c0_i32, %c0_i32_0 : i32, i32
  }
  func.func @transform_9(%arg0: i32) -> (i32, i32) {
    %c0_i32 = arith.constant 0 : i32
    %c0_i32_0 = arith.constant 0 : i32
    %c0_i32_1 = arith.constant 0 : i32
    return %c0_i32, %c0_i32_0 : i32, i32
  }
  func.func @transform_10(%arg0: i32) -> (i32, i32) {
    %c0_i32 = arith.constant 0 : i32
    %c0_i32_0 = arith.constant 0 : i32
    %c0_i32_1 = arith.constant 0 : i32
    return %c0_i32, %c0_i32_0 : i32, i32
  }
  func.func @transform_11(%arg0: i32) -> (i32, i32, i32) {
    %c0_i32 = arith.constant 0 : i32
    %c0_i32_0 = arith.constant 0 : i32
    %c0_i32_1 = arith.constant 0 : i32
    return %arg0, %c0_i32, %c0_i32_0 : i32, i32, i32
  }
}

</mosaic_0001>

<bundles_post_ra>
// kernel: forward.1
= control target key start
LH: loop header
LB: loop body
LE: loop exit
PB: predicated region body
PF: predicated region fallthrough
CT: control target
= control target key end

     0   :  { %s7817_s0 = inlined_call_operand.vmem [shape: bf16[256,96], index: 0, kind: input, shape index: {}]   ;;  %s7818_s1 = inlined_call_operand.vmem [shape: bf16[480,168], index: 1, kind: input, shape index: {}]   ;;  %s7819_s2 = inlined_call_operand.vmem [shape: f32[1,168], index: 2, kind: input, shape index: {}]   ;;  %s7820_s3 = inlined_call_operand.vmem [shape: bf16[420,160], index: 3, kind: input, shape index: {}]   ;;  %s7821_s4 = inlined_call_operand.vmem [shape: f32[1,160], index: 4, kind: input, shape index: {}]   ;;  %s7822_s5 = inlined_call_operand.vmem [shape: bf16[400,120], index: 5, kind: input, shape index: {}]   ;;  %s7823_s6 = inlined_call_operand.vmem [shape: f32[1,120], index: 6, kind: input, shape index: {}]   ;;  %s7824_s7 = inlined_call_operand.vmem [shape: bf16[120,84], index: 7, kind: input, shape index: {}]   ;;  %s7825_s8 = inlined_call_operand.vmem [shape: f32[1,84], index: 8, kind: input, shape index: {}]   ;;  %s7826_s9 = inlined_call_operand.vmem [shape: bf16[84,10], index: 9, kind: input, shape index: {}]   ;;  %s7827_s10 = inlined_call_operand.vmem [shape: f32[1,10], index: 10, kind: input, shape index: {}]   ;;  %s7828_s11 = inlined_call_operand.hbm [shape: f32[2,4,10], index: 11, kind: output, shape index: {}]  }
   0x1   :  { %7845 = sst [smem:[#allocation8_spill]] %s7817_s0 }
   0x2   :  { %7846 = sst [smem:[#allocation9_spill]] %s7818_s1 }
   0x3   :  { %7847 = sst [smem:[#allocation10_spill]] %s7819_s2 }
   0x4   :  { %16 = vsyncpa [#allocation3], 0 }
   0x5   :  { %18 = vsyncpa [#allocation3 + $0x1], 0  ;;  %s5323_s17 = smov 0   ;;  %s5325_s18 = smov 0  }
   0x6   :  { %s5327_s19 = smov 0   ;;  %s5329_s20 = smov 0  }
   0x7 LB: > { %7848 = sst [smem:[#allocation5_spill]] %s5246_s19  ;;  %s5344_s21 = sadd.s32 4294967295, %s5250_s20   ;;  %s5250_s20 = sphi %s5329_s20, %s7863_s20   ;;  %s5246_s19 = sphi %s5327_s19, %s7865_s19   ;;  %s5242_s18 = sphi %s5325_s18, %s7867_s18   ;;  %s5238_s17 = sphi %s5323_s17, %s7866_s17  }
   0x8   : > { %s4109_s22 = sadd.s32 4294967294, %s5250_s20   ;;  %s5348_s23 = sadd.s32 1, %s5250_s20  }
   0x9   : > { %7849 = sst [smem:[#allocation6_spill]] %s5348_s23  ;;  %s267_s24 = sadd.s32 1, %s5246_s19 }
   0xa   : > { %s264_s25 = ssub.s32 %s5250_s20, %s5348_s23  ;;  %p277_p0 = scmp.ne.s32.totalorder %s5246_s19, %s5242_s18 }
   0xb   : > { %p265_p1 = scmp.eq.s32.totalorder %s264_s25, 0  ;;  %p278_p2 = scmp.eq.s32.totalorder %s5344_s21, 1 }
   0xc   : > { %p283_p3 = scmp.ne.s32.totalorder %s5242_s18, %s5238_s17  ;;  %p284_p4 = scmp.eq.s32.totalorder %s4109_s22, 1 }
   0xd   : > { %s5359_s26 = scalar_select %p265_p1, %s5246_s19, %s267_s24  }
   0xe   : > { %p5361_p5 = por %p278_p2, %p277_p0  ;;  %p5365_p6 = por %p284_p4, %p283_p3 }
   0xf   : > { %7850 = sst [smem:[#allocation7_spill]] %s5359_s26  ;;  %p4112_p7 = scmp.ge.s32.totalorder %s5250_s20, 1 }
  0x10   : > { %p341_p8 = scmp.lt.s32.totalorder %s5250_s20, 3 }
  0x12   : > { %p342_p9 = pnand %p4112_p7, %p341_p8 }
  0x13   : > { %s4114_s29 = sshll.u32 (!%p342_p9), %s5344_s21, 4  ;;  %s7853_s0 = sld [smem:[#allocation8_spill]] (!%p342_p9) }
  0x14   : > { %345 = sbr.rel (%p342_p9) target bundleno = 2016 (0x7e0), region = 64  ;;  %p382_p10 = scmp.lt.s32.totalorder (!%p342_p9), %s4114_s29, 31 }
  0x15   : > { %s5252_s15 = smov (!%p342_p9), 96   ;;  %s7831_s16 = smov (!%p342_p9), 32  }
  0x16   : > { %s7829_s22 = smov (!%p342_p9), 64   ;;  %s7854_s1 = sld [smem:[#allocation9_spill]] (!%p342_p9) }
  0x17   : > { %s7857_s2 = sld [smem:[#allocation10_spill]] (!%p342_p9)  ;;  %s7837_s12 = smov (!%p342_p9), 80  }
  0x18   : > { %s7840_s13 = smov (!%p342_p9), 84   ;;  %s7833_s26 = smov (!%p342_p9), 124  }
  0x19   : > { %s7869_s29 = smov (!%p382_p10, %s4114_s29), 31  ;;  %vm444_vm0 = vsmask.f32 7424  ;;  %vm532_vm1 = vsmask.f32 6400  ;;  %vm512_vm2 = vcmask 1046528  }
  0x1a   : > { %s4115_s30 = sshll.u32 %s7869_s29, 2  ;;  %vm509_vm3 = vcmask 1047552   ;;  %vm567_vm5 = vcmask 1045504   ;;  %vm637_vm6 = vcmask 785408   ;;  %vm565_vm7 = vmand %vm512_vm2, %vm532_vm1  ;;  %vm687_vm8 = vcmask 261120   ;;  %s7835_s24 = smov 40  }
  0x1b   : > { %s5375_s14 = scalar_lea.vmem %s7853_s0, %s4115_s30  ;;  %vm510_vm4 = vmand %vm509_vm3, %vm444_vm0  ;;  %vm662_vm9 = vcmask 523264   ;;  %vm1621_vm10 = vcmask 359424   ;;  %vm1840_vm11 = vcmask 1044480   ;;  %vm2379_vm12 = vcmask 1041408   ;;  %s7860_s25 = smov 124  }
  0x1c   : > { %v5378_v0 = vld [vmem:[%s5375_s14 + $0x20] sm:$0xff]  ;;  %v5381_v1 = vld [vmem:[%s5375_s14 + $0x28] sm:$0xff]  ;;  %v5397_v11 = vld [vmem:[%s5375_s14 + $0x30] sm:$0xff]  ;;  %s7861_s29 = smov 80   ;;  %vm1938_vm13 = vcmask 687104   ;;  %vm2362_vm14 = vcmask 293888  }
  0x1d   : > { %v5384_v2 = vld [vmem:[%s5375_s14] sm:$0xff]  ;;  %v5387_v3 = vld [vmem:[%s5375_s14 + $0x8] sm:$0xff]  ;;  %v477_v4 = vshll.u32 %v5378_v0, 16  ;;  %v481_v5 = vshrl.u32 %v5378_v0, 16  ;;  %v485_v6 = vshll.u32 %v5381_v1, 16  ;;  %v5417_v19 = vld [vmem:[%s5375_s14 + $0x10] sm:$0xff] }
  0x1e   : > { %v446_v7 = vshrl.u32 %v5384_v2, 16  ;;  %v448_v8 = vshll.u32 %v5384_v2, 16  ;;  %v453_v9 = vshll.u32 %v5387_v3, 16  ;;  %v457_v10 = vshrl.u32 %v5387_v3, 16  ;;  %v5428_v28 = vld [vmem:[%s5375_s14 + $0x38] sm:$0xff]  ;;  %s5260_s23 = smov 48  }
  0x1f   : > { %v5401_v12 = vrot.slane %v477_v4, 1  ;;  %v487_v13 = vrot.slane %v485_v6, 1  ;;  %v489_v22 = vshrl.u32 %v5381_v1, 16  ;;  %v493_v23 = vshll.u32 %v5397_v11, 16  ;;  %v5442_v37 = vld [vmem:[%s5375_s14 + $0x18] sm:$0xff]  ;;  %s7856_s14 = smov 32  }
  0x20   : > { %v533_v14 = vrot.slane %v446_v7, 1  ;;  %v534_v15 = vrot.slane %v448_v8, 2  ;;  %v536_v16 = vrot.slane %v457_v10, 1  ;;  %v537_v17 = vrot.slane %v453_v9, 2  ;;  %v4382_v44 = vld [vmem:[%s7854_s1 + $0x1d0] sm:$0xf] }
  0x21   : > { %v483_v18 = vor.u32 %v481_v5, %v5401_v12  ;;  %v513_v26 = vrot.slane %v5384_v2, 1  ;;  %v514_v27 = vrot.slane %v5387_v3, 1  ;;  %v516_v29 = vrot.slane %v5417_v19, 1  ;;  %v4871_v45 = vld [vmem:[%s7854_s1 + $0x1d4] sm:$0xf0]  ;;  %s378_s30 = sand.u32 1, %s5242_s18  }
  0x22   : > { %v535_v20 = vor.u32 %v534_v15, %v533_v14  ;;  %v538_v21 = vor.u32 %v537_v17, %v536_v16  ;;  %v491_v30 = vor.u32 %v489_v22, %v487_v13  ;;  %v495_v31 = vrot.slane %v493_v23, 1  ;;  %v4374_v53 = vld [vmem:[%s7854_s1 + $0x1c0] sm:$0xf]  ;;  %v4869_v54 = vld [vmem:[%s7854_s1 + $0x1c4] sm:$0xf0]  ;;  %s4801_s0 = sshll.u32 %s5344_s21, 2 }
  0x23   : > { %v488_v24 = vsel %vm444_vm0, %v483_v18, %v487_v13  ;;  %v517_v32 = vsel %vm512_vm2, %v514_v27, %v516_v29  ;;  %v515_v33 = vsel %vm512_vm2, %v513_v26, %v514_v27  ;;  %v497_v34 = vshrl.u32 %v5397_v11, 16  ;;  %v4366_v57 = vld [vmem:[%s7854_s1 + $0x1b0] sm:$0xf]  ;;  %v4867_v58 = vld [vmem:[%s7854_s1 + $0x1b4] sm:$0xf0]  ;;  %s4035_s21 = scalar_lea.sflag [#allocation3], %s378_s30 }
  0x24   : > { %595 = vrot.lane.b32.xlu0 %v488_v24, %s5252_s15  ;;  %v539_v25 = vsel %vm532_vm1, %v535_v20, %v538_v21  ;;  %606 = vrot.lane.b32.xlu2 %v517_v32, %s7829_s22  ;;  %v501_v35 = vshll.u32 %v5428_v28, 16  ;;  %v496_v36 = vsel %vm444_vm0, %v491_v30, %v495_v31  ;;  %v461_v38 = vshll.u32 %v5417_v19, 16  ;;  %v4358_v14 = vld [vmem:[%s7854_s1 + $0x1a0] sm:$0xf]  ;;  %v4865_v15 = vld [vmem:[%s7854_s1 + $0x1a4] sm:$0xf0] }
  0x25   : > { %621 = vrot.lane.b32.xlu1 %v539_v25, %s7831_s16  ;;  %v465_v39 = vshrl.u32 %v5417_v19, 16  ;;  %v499_v41 = vor.u32 %v497_v34, %v495_v31  ;;  %v518_v46 = vrot.slane %v5442_v37, 1  ;;  %v5463_v47 = vor.u32 %v4871_v45, %v4382_v44  ;;  %v4863_v24 = vld [vmem:[%s7854_s1 + $0x194] sm:$0xf0]  ;;  %v4861_v27 = vld [vmem:[%s7854_s1 + $0x184] sm:$0xf0] }
  0x26   : > { %v541_v40 = vrot.slane %v461_v38, 2  ;;  %v503_v42 = vrot.slane %v501_v35, 1  ;;  %v505_v50 = vshrl.u32 %v5428_v28, 16  ;;  %v5478_v55 = vor.u32 %v4869_v54, %v4374_v53  ;;  %v4190_v54 = vld [vmem:[%s7854_s1 + $0x50] sm:$0xf] }
  0x27   : > { %v540_v43 = vrot.slane %v465_v39, 1  ;;  %4969 = vmatpush.bf16.msra.mxu3 %v5463_v47  ;;  %v519_v52 = vsel %vm512_vm2, %v516_v29, %v518_v46  ;;  %v520_v59 = vrot.slane %v5378_v0, 1  ;;  %v5492_v60 = vor.u32 %v4867_v58, %v4366_v57  ;;  %v4206_v29 = vld [vmem:[%s7854_s1 + $0x70] sm:$0xf]  ;;  %v4857_v57 = vld [vmem:[%s7854_s1 + $0x164] sm:$0xf0] }
  0x28   : > { %v504_v49 = vsel %vm444_vm0, %v499_v41, %v503_v42  ;;  %v507_v56 = vor.u32 %v505_v50, %v503_v42  ;;  %v450_v62 = vrot.slane %v448_v8, 1  ;;  %v469_v13 = vshll.u32 %v5442_v37, 16 }
  0x29   : > { %v542_v48 = vor.u32 %v541_v40, %v540_v43  ;;  %v521_v63 = vsel %vm512_vm2, %v518_v46, %v520_v59  ;;  %v522_v16 = vrot.slane %v5381_v1, 1  ;;  %v5507_v17 = vor.u32 %v4865_v15, %v4358_v14  ;;  %v4334_v46 = vld [vmem:[%s7854_s1 + $0x170] sm:$0xf] }
  0x2a   : > { %v511_v61 = vsel %vm510_vm4, %v507_v56, 0  ;;  %v473_v8 = vshrl.u32 %v5442_v37, 16  ;;  %v451_v18 = vor.u32 %v450_v62, %v446_v7  ;;  %v455_v20 = vrot.slane %v453_v9, 1  ;;  %v4342_v9 = vld [vmem:[%s7854_s1 + $0x180] sm:$0xf] }
  0x2b   : > { %v543_v51 = vsel %vm532_vm1, %v538_v21, %v542_v48  ;;  %4970 = vmatpush.bf16.msra.mxu3 %v5478_v55  ;;  %v4350_v21 = vld [vmem:[%s7854_s1 + $0x190] sm:$0xf]  ;;  %v545_v25 = vrot.slane %v469_v13, 2  ;;  %v548_v31 = vrot.slane %v481_v5, 1  ;;  %v549_v32 = vrot.slane %v477_v4, 2 }
  0x2c   : > { %604 = vrot.lane.b32.xlu0 %v515_v33, %s7829_s22  ;;  %623 = vrot.lane.b32.xlu2 %v543_v51, %s7831_s16  ;;  %v5524_v26 = vor.u32 %v4863_v24, %v4350_v21  ;;  %v544_v7 = vrot.slane %v473_v8, 1  ;;  %v4827_v33 = vld [vmem:[%s7854_s1 + $0x74] sm:$0xf0]  ;;  %v523_v40 = vsel %vm512_vm2, %v520_v59, %v522_v16  ;;  %v456_v41 = vsel %vm444_vm0, %v451_v18, %v455_v20  ;;  %v4825_v5 = vld [vmem:[%s7854_s1 + $0x64] sm:$0xf0] }
  0x2d   : > { %597 = vrot.lane.b32.xlu1 %v496_v36, %s5252_s15  ;;  %v4198_v36 = vld [vmem:[%s7854_s1 + $0x60] sm:$0xf]  ;;  %v4207_v42 = vor.u32 %v4827_v33, %v4206_v29  ;;  %v5556_v43 = vor.u32 %v4861_v27, %v4342_v9  ;;  %v573_v44 = vrot.slane %v5442_v37, 2  ;;  %v575_v45 = vrot.slane %v5378_v0, 2  ;;  %v4823_v56 = vld [vmem:[%s7854_s1 + $0x54] sm:$0xf0] }
  0x2e   : > { %v546_v30 = vor.u32 %v545_v25, %v544_v7  ;;  %v4199_v51 = vor.u32 %v4825_v5, %v4198_v36  ;;  %v550_v53 = vor.u32 %v549_v32, %v548_v31  ;;  %v459_v58 = vor.u32 %v457_v10, %v455_v20  ;;  %v4182_v18 = vld [vmem:[%s7854_s1 + $0x40] sm:$0xf]  ;;  %v4821_v20 = vld [vmem:[%s7854_s1 + $0x44] sm:$0xf0]  ;;  %v4855_v24 = vld [vmem:[%s7854_s1 + $0x154] sm:$0xf0] }
  0x2f   : > { %4971 = vmatpush.bf16.msra.mxu3 %v5492_v60  ;;  %4961 = vmatpush.bf16.msra.mxu1 %v4207_v42  ;;  %v463_v59 = vrot.slane %v461_v38, 1  ;;  %v524_v62 = vrot.slane %v5397_v11, 1  ;;  %v4191_v14 = vor.u32 %v4823_v56, %v4190_v54  ;;  %v552_v38 = vrot.slane %v489_v22, 1  ;;  %v4318_v22 = vld [vmem:[%s7854_s1 + $0x150] sm:$0xf] }
  0x30   : > { %v547_v4 = vsel %vm532_vm1, %v542_v48, %v546_v30  ;;  %1101 = vmatpush.bf16.msra.mxu0 %v4207_v42  ;;  %v551_v10 = vsel %vm532_vm1, %v546_v30, %v550_v53  ;;  %v553_v15 = vrot.slane %v485_v6, 2  ;;  %v4183_v25 = vor.u32 %v4821_v20, %v4182_v18  ;;  %v4310_v9 = vld [vmem:[%s7854_s1 + $0x140] sm:$0xf]  ;;  %v4853_v27 = vld [vmem:[%s7854_s1 + $0x144] sm:$0xf0] }
  0x31   : > { %v464_v21 = vsel %vm444_vm0, %v459_v58, %v463_v59  ;;  %v525_v6 = vsel %vm512_vm2, %v522_v16, %v524_v62  ;;  %v4319_v7 = vor.u32 %v4855_v24, %v4318_v22  ;;  %v4174_v29 = vld [vmem:[%s7854_s1 + $0x30] sm:$0xf]  ;;  %v4819_v30 = vld [vmem:[%s7854_s1 + $0x34] sm:$0xf0]  ;;  %v467_v31 = vor.u32 %v465_v39, %v463_v59  ;;  %v4166_v39 = vld [vmem:[%s7854_s1 + $0x20] sm:$0xf] }
  0x32   : > { %v554_v16 = vor.u32 %v553_v15, %v552_v38  ;;  %v471_v32 = vrot.slane %v469_v13, 1  ;;  %v4311_v33 = vor.u32 %v4853_v27, %v4310_v9  ;;  %v526_v36 = vrot.slane %v5428_v28, 1  ;;  %v4817_v13 = vld [vmem:[%s7854_s1 + $0x24] sm:$0xf0]  ;;  %v4158_v54 = vld [vmem:[%s7854_s1 + $0x10] sm:$0xf] }
  0x33   : > { %4972 = vmatpush.bf16.msra.mxu3 %v5507_v17  ;;  %4962 = vmatpush.bf16.msra.mxu1 %v4199_v51  ;;  %v4175_v42 = vor.u32 %v4819_v30, %v4174_v29  ;;  %v4815_v56 = vld [vmem:[%s7854_s1 + $0x14] sm:$0xf0]  ;;  %v579_v18 = vrot.slane %v5397_v11, 2  ;;  %v581_v20 = vrot.slane %v5428_v28, 2  ;;  %v4270_v24 = vld [vmem:[%s7854_s1 + $0xf0] sm:$0xf] }
  0x34   : > { %599 = vrot.lane.b32.xlu0 %v504_v49, %s5252_s15  ;;  %v4859_v49 = vld [vmem:[%s7854_s1 + $0x174] sm:$0xf0]  ;;  %625 = vrot.lane.b32.xlu2 %v547_v4, %s7831_s16  ;;  %s7855_s16 = smov 64   ;;  %v555_v5 = vsel %vm532_vm1, %v550_v53, %v554_v16  ;;  %v556_v4 = vrot.slane %v497_v34, 1  ;;  %v4294_v53 = vld [vmem:[%s7854_s1 + $0x120] sm:$0xf]  ;;  %v475_v58 = vor.u32 %v473_v8, %v471_v32 }
  0x35   : > { %608 = vrot.lane.b32.xlu1 %v519_v52, %s7829_s22  ;;  %v4335_v48 = vor.u32 %v4859_v49, %v4334_v46  ;;  %v4326_v52 = vld [vmem:[%s7854_s1 + $0x160] sm:$0xf]  ;;  %1102 = vmatpush.bf16.msra.mxu0 %v4199_v51  ;;  %v557_v46 = vrot.slane %v493_v23, 2  ;;  %v472_v49 = vsel %vm444_vm0, %v467_v31, %v471_v32  ;;  %v4849_v34 = vld [vmem:[%s7854_s1 + $0x124] sm:$0xf0]  ;;  %v4167_v23 = vor.u32 %v4817_v13, %v4166_v39 }
  0x36   : > { %v4295_v59 = vor.u32 %v4849_v34, %v4294_v53  ;;  %v4813_v8 = vld [vmem:[%s7854_s1 + $0x4] sm:$0xf0]  ;;  %v480_v38 = vsel %vm444_vm0, %v475_v58, %v5401_v12  ;;  %v4847_v22 = vld [vmem:[%s7854_s1 + $0x114] sm:$0xf0]  ;;  %v4208_v27 = vld [vmem:[%s7854_s1 + $0x78] sm:$0xf0] }
  0x37   : > { %4973 = vmatpush.bf16.msra.mxu3 %v5524_v26  ;;  %1199 = vmatpush.bf16.msra.mxu2 %v4335_v48  ;;  %v527_v48 = vsel %vm512_vm2, %v524_v62, %v526_v36  ;;  %v4159_v62 = vor.u32 %v4815_v56, %v4158_v54  ;;  %v4278_v30 = vld [vmem:[%s7854_s1 + $0x100] sm:$0xf]  ;;  %v4845_v31 = vld [vmem:[%s7854_s1 + $0x104] sm:$0xf0]  ;;  %v4824_v32 = vld [vmem:[%s7854_s1 + $0x64] sm:$0xf] }
  0x38   : > { %4963 = vmatpush.bf16.msra.mxu1 %v4191_v14  ;;  %v4822_v13 = vld [vmem:[%s7854_s1 + $0x54] sm:$0xf]  ;;  %v4176_v53 = vld [vmem:[%s7854_s1 + $0x38] sm:$0xf0]  ;;  %v4839_v34 = vld [vmem:[%s7854_s1 + $0xd4] sm:$0xf0] }
  0x39   : > { %1103 = vmatpush.bf16.msra.mxu0 %v4191_v14  ;;  %vm2013_vm15 = vcmask 654336   ;;  %vm1971_vm0 = vcmask 326656   ;;  %vm1867_vm3 = vcmask 1043456   ;;  %vm3504_vm4 = vcmask 130048  }
  0x3b   : > { %4974 = vmatpush.bf16.msra.mxu3 %v5556_v43 }
  0x3c   : > { %601 = vrot.lane.b32.xlu0 %v511_v61, %s5252_s15  ;;  %v4327_v61 = vor.u32 %v4857_v57, %v4326_v52  ;;  %627 = vrot.lane.b32.xlu2 %v551_v10, %s7856_s14  ;;  %v577_v52 = vrot.slane %v5381_v1, 2  ;;  %v5671_v57 = vor.u32 %v557_v46, %v556_v4  ;;  %v4150_v10 = vld [vmem:[%s7854_s1] sm:$0xf]  ;;  %v561_v4 = vrot.slane %v501_v35, 2  ;;  %v4818_v35 = vld [vmem:[%s7854_s1 + $0x34] sm:$0xf] }
  0x3d   : > { %610 = vrot.lane.b32.xlu1 %v521_v63, %s7829_s22  ;;  %v5592_v63 = vsel %vm567_vm5, %v573_v44, %v575_v45  ;;  %4964 = vmatpush.bf16.msra.mxu1 %v4183_v25  ;;  %v4151_v15 = vor.u32 %v4813_v8, %v4150_v10  ;;  %v4179_v54 = vor.u32 %v4818_v35, %v4176_v53  ;;  %v4160_v8 = vld [vmem:[%s7854_s1 + $0x18] sm:$0xf0]  ;;  %v4264_v53 = vld [vmem:[%s7854_s1 + $0xe8] sm:$0xf0] }
  0x3e   : > { %4391 = vmatmul.msk.bf16.vlgmr.msra.gmra.mxu3 %vm637_vm6, %v5592_v63  ;;  %1200 = vmatpush.bf16.msra.mxu2 %v4327_v61  ;;  %v5679_v61 = vsel %vm567_vm5, %v575_v45, %v577_v52  ;;  %v559_v14 = vsel %vm532_vm1, %v554_v16, %v5671_v57  ;;  %v531_v45 = vsel %vm512_vm2, %v526_v36, 0  ;;  %v5699_v12 = vsel %vm567_vm5, %v577_v52, %v579_v18  ;;  %v4200_v36 = vld [vmem:[%s7854_s1 + $0x68] sm:$0xf0] }
  0x3f   : > { %1104 = vmatpush.bf16.msra.mxu0 %v4183_v25  ;;  %v4843_v25 = vld [vmem:[%s7854_s1 + $0xf4] sm:$0xf0] }
  0x40   : > { %v4271_v16 = vor.u32 %v4843_v25, %v4270_v24  ;;  %v4230_v25 = vld [vmem:[%s7854_s1 + $0xa0] sm:$0xf] }
  0x41   : > { %4965 = vmatpush.bf16.msra.mxu1 %v4175_v42 }
  0x42   : > { %1201 = vmatpush.bf16.msra.mxu2 %v4319_v7  ;;  %v5720_v7 = vsel %vm567_vm5, %v579_v18, %v581_v20 }
  0x43   : > { %1105 = vmatpush.bf16.msra.mxu0 %v4175_v42  ;;  %v4262_v42 = vld [vmem:[%s7854_s1 + $0xe0] sm:$0xf] }
  0x44   : > { %587 = vrot.lane.b32.xlu0 %v456_v41, %s5252_s15  ;;  %v4851_v41 = vld [vmem:[%s7854_s1 + $0x134] sm:$0xf0]  ;;  %629 = vrot.lane.b32.xlu2 %v555_v5, %s7856_s14  ;;  %v4841_v5 = vld [vmem:[%s7854_s1 + $0xe4] sm:$0xf0] }
  0x45   : > { %612 = vrot.lane.b32.xlu1 %v523_v40, %s7855_s16  ;;  %v4302_v40 = vld [vmem:[%s7854_s1 + $0x130] sm:$0xf]  ;;  %4966 = vmatpush.bf16.msra.mxu1 %v4167_v23  ;;  %v4263_v39 = vor.u32 %v4841_v5, %v4262_v42  ;;  %v4214_v42 = vld [vmem:[%s7854_s1 + $0x80] sm:$0xf]  ;;  %v4829_v5 = vld [vmem:[%s7854_s1 + $0x84] sm:$0xf0] }
  0x46   : > { %1202 = vmatpush.bf16.msra.mxu2 %v4311_v33  ;;  %v4303_v51 = vor.u32 %v4851_v41, %v4302_v40  ;;  %v4279_v33 = vor.u32 %v4845_v31, %v4278_v30  ;;  %v4203_v40 = vor.u32 %v4824_v32, %v4200_v36  ;;  %v560_v41 = vrot.slane %v505_v50, 1  ;;  %v4192_v50 = vld [vmem:[%s7854_s1 + $0x58] sm:$0xf0]  ;;  %v4222_v32 = vld [vmem:[%s7854_s1 + $0x90] sm:$0xf] }
  0x47   : > { %1106 = vmatpush.bf16.msra.mxu0 %v4167_v23  ;;  %v4195_v46 = vor.u32 %v4822_v13, %v4192_v50  ;;  %v5780_v23 = vsel %vm567_vm5, %v581_v20, 0 }
  0x49   : > { %4967 = vmatpush.bf16.msra.mxu1 %v4159_v62 }
  0x4a   : > { %1203 = vmatpush.bf16.msra.mxu2 %v4303_v51  ;;  %v562_v51 = vor.u32 %v561_v4, %v560_v41 }
  0x4b   : > { %1107 = vmatpush.bf16.msra.mxu0 %v4159_v62  ;;  %v4837_v62 = vld [vmem:[%s7854_s1 + $0xc4] sm:$0xf0] }
  0x4c   : > { %589 = vrot.lane.b32.xlu0 %v464_v21, %s5252_s15  ;;  %631 = vrot.lane.b32.xlu2 %v559_v14, %s7856_s14  ;;  %v4286_v21 = vld [vmem:[%s7854_s1 + $0x110] sm:$0xf]  ;;  %v563_v52 = vsel %vm532_vm1, %v5671_v57, %v562_v51  ;;  %v4168_v57 = vld [vmem:[%s7854_s1 + $0x28] sm:$0xf0]  ;;  %vm1988_vm1 = vcmask 1014784  }
  0x4d   : > { %614 = vrot.lane.b32.xlu1 %v525_v6, %s7855_s16  ;;  %4968 = vmatpush.bf16.msra.mxu1 %v4151_v15  ;;  %v4826_v6 = vld [vmem:[%s7854_s1 + $0x74] sm:$0xf]  ;;  %v4287_v9 = vor.u32 %v4847_v22, %v4286_v21  ;;  %v4835_v22 = vld [vmem:[%s7854_s1 + $0xb4] sm:$0xf0] }
  0x4e   : > { %4392 = vmatmul.msk.bf16.gmra.mxu3 %vm637_vm6, %v5679_v61  ;;  %1204 = vmatpush.bf16.msra.mxu2 %v4295_v59  ;;  %v4211_v29 = vor.u32 %v4826_v6, %v4208_v27  ;;  %v4246_v59 = vld [vmem:[%s7854_s1 + $0xc0] sm:$0xf]  ;;  %v4814_v14 = vld [vmem:[%s7854_s1 + $0x14] sm:$0xf] }
  0x4f   : > { %1108 = vmatpush.bf16.msra.mxu0 %v4151_v15  ;;  %v4247_v10 = vor.u32 %v4837_v62, %v4246_v59  ;;  %v4152_v15 = vld [vmem:[%s7854_s1 + $0x8] sm:$0xf0] }
  0x50   : > { %1297 = vmatpush.bf16.msrb.mxu3 %v4211_v29  ;;  %v4248_v59 = vld [vmem:[%s7854_s1 + $0xc8] sm:$0xf0] }
  0x51   : > { %1150 = vmatpush.bf16.msrb.mxu1 %v4271_v16 }
  0x52   : > { %1205 = vmatpush.bf16.msra.mxu2 %v4287_v9  ;;  %v4833_v9 = vld [vmem:[%s7854_s1 + $0xa4] sm:$0xf0] }
  0x53   : > { %v4231_v27 = vor.u32 %v4833_v9, %v4230_v25 }
  0x54   : > { %591 = vrot.lane.b32.xlu0 %v472_v49, %s5252_s15  ;;  %1298 = vmatpush.bf16.msrb.mxu3 %v4203_v40  ;;  %v4820_v49 = vld [vmem:[%s7854_s1 + $0x44] sm:$0xf] }
  0x55   : > { %616 = vrot.lane.b32.xlu1 %v527_v48, %s7855_s16  ;;  %1151 = vmatpush.bf16.msrb.mxu1 %v4263_v39  ;;  %v4215_v39 = vor.u32 %v4829_v5, %v4214_v42 }
  0x56   : > { %1206 = vmatpush.bf16.msra.mxu2 %v4279_v33  ;;  %633 = vrot.lane.b32.xlu2 %v563_v52, %s7856_s14  ;;  %v4831_v33 = vld [vmem:[%s7854_s1 + $0x94] sm:$0xf0] }
  0x57   : > { %v4223_v36 = vor.u32 %v4831_v33, %v4222_v32  ;;  %v4224_v32 = vld [vmem:[%s7854_s1 + $0x98] sm:$0xf0] }
  0x58   : > { %1299 = vmatpush.bf16.msrb.mxu3 %v4195_v46  ;;  %v4842_v46 = vld [vmem:[%s7854_s1 + $0xf4] sm:$0xf] }
  0x5a   : > { %1250 = vmatpush.bf16.msrb.mxu2 %v5463_v47  ;;  %v4184_v47 = vld [vmem:[%s7854_s1 + $0x48] sm:$0xf0] }
  0x5b   : > { %v4187_v48 = vor.u32 %v4820_v49, %v4184_v47  ;;  %v4272_v49 = vld [vmem:[%s7854_s1 + $0xf8] sm:$0xf0] }
  0x5c   : > { %593 = vrot.lane.b32.xlu0 %v480_v38, %s5252_s15  ;;  %v4163_v38 = vor.u32 %v4814_v14, %v4160_v8  ;;  %v4275_v47 = vor.u32 %v4842_v46, %v4272_v49  ;;  %v4854_v46 = vld [vmem:[%s7854_s1 + $0x154] sm:$0xf]  ;;  %v4320_v49 = vld [vmem:[%s7854_s1 + $0x158] sm:$0xf0]  ;;  %s7839_s15 = smov 44  }
  0x5d   : > { %618 = vrot.lane.b32.xlu1 %v531_v45, %s7855_s16  ;;  %1300 = vmatpush.bf16.msrb.mxu3 %v4187_v48  ;;  %v566_v45 = vsel %vm565_vm7, %v562_v51, 0  ;;  %v4336_v51 = vld [vmem:[%s7854_s1 + $0x178] sm:$0xf0]  ;;  %v4840_v48 = vld [vmem:[%s7854_s1 + $0xe4] sm:$0xf]  ;;  %vm4027_vm7 = vcmask 1040384  }
  0x5e   : > { %4393 = vmatmul.msk.bf16.gmra.mxu3 %vm637_vm6, %v5699_v12  ;;  %1251 = vmatpush.bf16.msrb.mxu2 %v5478_v55  ;;  %v4254_v55 = vld [vmem:[%s7854_s1 + $0xd0] sm:$0xf] }
  0x5f   : > { %v4255_v56 = vor.u32 %v4839_v34, %v4254_v55  ;;  %635 = vrot.lane.b32.xlu2 %v566_v45, %s7856_s14  ;;  %1346 = vmatpush.bf16.msrb.mxu0 %v4275_v47  ;;  %v4267_v55 = vor.u32 %v4840_v48, %v4264_v53  ;;  %v4312_v53 = vld [vmem:[%s7854_s1 + $0x148] sm:$0xf0] }
  0x61   : > { %1152 = vmatpush.bf16.msrb.mxu1 %v4255_v56  ;;  %1301 = vmatpush.bf16.msrb.mxu3 %v4179_v54  ;;  %v4838_v56 = vld [vmem:[%s7854_s1 + $0xd4] sm:$0xf] }
  0x62   : > { %1252 = vmatpush.bf16.msrb.mxu2 %v5492_v60  ;;  %v4816_v60 = vld [vmem:[%s7854_s1 + $0x24] sm:$0xf] }
  0x63   : > { %v4171_v58 = vor.u32 %v4816_v60, %v4168_v57  ;;  %1347 = vmatpush.bf16.msrb.mxu0 %v4267_v55  ;;  %v4256_v60 = vld [vmem:[%s7854_s1 + $0xd8] sm:$0xf0] }
  0x64   : > { %v4259_v57 = vor.u32 %v4838_v56, %v4256_v60 }
  0x65   : > { %1302 = vmatpush.bf16.msrb.mxu3 %v4171_v58  ;;  %1153 = vmatpush.bf16.msrb.mxu1 %v4247_v10  ;;  %v4836_v58 = vld [vmem:[%s7854_s1 + $0xc4] sm:$0xf] }
  0x66   : > { %1253 = vmatpush.bf16.msrb.mxu2 %v5507_v17  ;;  %v4812_v17 = vld [vmem:[%s7854_s1 + $0x4] sm:$0xf]  ;;  %v4251_v62 = vor.u32 %v4836_v58, %v4248_v59  ;;  %v4850_v58 = vld [vmem:[%s7854_s1 + $0x134] sm:$0xf]  ;;  %v4304_v59 = vld [vmem:[%s7854_s1 + $0x138] sm:$0xf0] }
  0x67   : > { %v4155_v18 = vor.u32 %v4812_v17, %v4152_v15  ;;  %1348 = vmatpush.bf16.msrb.mxu0 %v4259_v57  ;;  %v4834_v17 = vld [vmem:[%s7854_s1 + $0xb4] sm:$0xf]  ;;  %v4856_v15 = vld [vmem:[%s7854_s1 + $0x164] sm:$0xf] }
  0x69   : > { %1303 = vmatpush.bf16.msrb.mxu3 %v4163_v38  ;;  %v4240_v38 = vld [vmem:[%s7854_s1 + $0xb8] sm:$0xf0] }
  0x6a   : > { %1254 = vmatpush.bf16.msrb.mxu2 %v5524_v26  ;;  %v4238_v26 = vld [vmem:[%s7854_s1 + $0xb0] sm:$0xf]  ;;  %v4243_v45 = vor.u32 %v4834_v17, %v4240_v38  ;;  %v4384_v17 = vld [vmem:[%s7854_s1 + $0x1d8] sm:$0xf0] }
  0x6b   : > { %v4239_v6 = vor.u32 %v4835_v22, %v4238_v26  ;;  %1349 = vmatpush.bf16.msrb.mxu0 %v4251_v62 }
  0x6d   : > { %1304 = vmatpush.bf16.msrb.mxu3 %v4155_v18  ;;  %1154 = vmatpush.bf16.msrb.mxu1 %v4239_v6  ;;  %v4832_v18 = vld [vmem:[%s7854_s1 + $0xa4] sm:$0xf]  ;;  %v4232_v6 = vld [vmem:[%s7854_s1 + $0xa8] sm:$0xf0] }
  0x6e   : > { %4394 = vmatmul.msk.bf16.gmra.mxu3 %vm637_vm6, %v5720_v7  ;;  %1255 = vmatpush.bf16.msrb.mxu2 %v5556_v43 }
  0x6f   : > { %1350 = vmatpush.bf16.msrb.mxu0 %v4243_v45 }
  0x71   : > { %1155 = vmatpush.bf16.msrb.mxu1 %v4231_v27  ;;  %v4830_v27 = vld [vmem:[%s7854_s1 + $0x94] sm:$0xf] }
  0x72   : > { %v4227_v33 = vor.u32 %v4830_v27, %v4224_v32  ;;  %v4866_v27 = vld [vmem:[%s7854_s1 + $0x1b4] sm:$0xf]  ;;  %v4368_v32 = vld [vmem:[%s7854_s1 + $0x1b8] sm:$0xf0] }
  0x75   : > { %1156 = vmatpush.bf16.msrb.mxu1 %v4223_v36  ;;  %v4828_v36 = vld [vmem:[%s7854_s1 + $0x84] sm:$0xf] }
  0x79   : > { %1157 = vmatpush.bf16.msrb.mxu1 %v4215_v39 }
  0x7e   : > { %4395 = vmatmul.msk.bf16.gmra.mxu3 %vm637_vm6, %v5780_v23  ;;  %v5841_v16 = vpop.permute.xlu2 %606 }
  0x86   : > { %v624_v40 = vpop.permute.xlu2 %623 }
  0x8e   : > { %v626_v52 = vpop.permute.xlu2 %625 }
  0x96   : > { %v5814_v20 = vpop.permute.xlu0 %595  ;;  %v628_v26 = vpop.permute.xlu2 %627 }
  0x97   : > { %v5819_v21 = vsel %vm637_vm6, %v5378_v0, %v5814_v20  ;;  %v622_v43 = vpop.permute.xlu1 %621 }
  0x98   : > { %1129 = vmatmul.bf16.vlgmr.msra.gmra.mxu1 %v5819_v21 }
  0x9e   : > { %v5828_v24 = vpop.permute.xlu0 %604  ;;  %v630_v47 = vpop.permute.xlu2 %629 }
  0x9f   : > { %v5832_v0 = vsel %vm687_vm8, %v5828_v24, %v622_v43  ;;  %v5843_v29 = vpop.permute.xlu1 %597  ;;  %v4235_v43 = vor.u32 %v4832_v18, %v4232_v6  ;;  %v4376_v6 = vld [vmem:[%s7854_s1 + $0x1c8] sm:$0xf0] }
  0xa0   : > { %1207 = vmatmul.bf16.vlgmr.msra.gmra.mxu2 %v5832_v0  ;;  %v5848_v30 = vsel %vm637_vm6, %v5381_v1, %v5843_v29  ;;  %v5863_v1 = vsel %vm687_vm8, %v5841_v16, %v624_v40  ;;  %v4216_v40 = vld [vmem:[%s7854_s1 + $0x88] sm:$0xf0] }
  0xa1   : > { %1351 = vmatpush.bf16.msrb.mxu0 %v4235_v43  ;;  %v4219_v42 = vor.u32 %v4828_v36, %v4216_v40 }
  0xa5   : > { %1352 = vmatpush.bf16.msrb.mxu0 %v4227_v33  ;;  %v4371_v33 = vor.u32 %v4866_v27, %v4368_v32 }
  0xa6   : > { %v5850_v31 = vpop.permute.xlu0 %599  ;;  %v632_v55 = vpop.permute.xlu2 %631 }
  0xa7   : > { %v5875_v13 = vsel %vm637_vm6, %v5397_v11, %v5850_v31  ;;  %v4858_v11 = vld [vmem:[%s7854_s1 + $0x174] sm:$0xf]  ;;  %v5901_v34 = vpop.permute.xlu1 %608 }
  0xa8   : > { %1134 = vmatmul.bf16.gmra.mxu1 %v5848_v30  ;;  %v4339_v35 = vor.u32 %v4858_v11, %v4336_v51  ;;  %v5905_v54 = vsel %vm687_vm8, %v5901_v34, %v626_v52  ;;  %v4323_v11 = vor.u32 %v4854_v46, %v4320_v49 }
  0xa9   : > { %1353 = vmatpush.bf16.msrb.mxu0 %v4219_v42  ;;  %v4846_v42 = vld [vmem:[%s7854_s1 + $0x114] sm:$0xf] }
  0xaa   : > { %1395 = vmatpush.bf16.msra.mxu1 %v4339_v35  ;;  %v4852_v35 = vld [vmem:[%s7854_s1 + $0x144] sm:$0xf] }
  0xab   : > { %v4315_v56 = vor.u32 %v4852_v35, %v4312_v53  ;;  %v4844_v53 = vld [vmem:[%s7854_s1 + $0x104] sm:$0xf] }
  0xae   : > { %v5859_v41 = vpop.permute.xlu0 %601 }
  0xaf   : > { %v5925_v8 = vsel %vm637_vm6, %v5428_v28, %v5859_v41  ;;  %v4328_v28 = vld [vmem:[%s7854_s1 + $0x168] sm:$0xf0]  ;;  %v611_v25 = vpop.permute.xlu1 %610 }
  0xb0   : > { %1212 = vmatmul.bf16.gmra.mxu2 %v5863_v1  ;;  %v4331_v22 = vor.u32 %v4856_v15, %v4328_v28  ;;  %v5947_v9 = vsel %vm687_vm8, %v611_v25, %v628_v26  ;;  %v634_v62 = vpop.permute.xlu2 %633  ;;  %v4848_v15 = vld [vmem:[%s7854_s1 + $0x124] sm:$0xf]  ;;  %v4296_v28 = vld [vmem:[%s7854_s1 + $0x128] sm:$0xf0] }
  0xb1   : > { %v4299_v26 = vor.u32 %v4848_v15, %v4296_v28 }
  0xb2   : > { %1396 = vmatpush.bf16.msra.mxu1 %v4331_v22  ;;  %v4868_v22 = vld [vmem:[%s7854_s1 + $0x1c4] sm:$0xf] }
  0xb6   : > { %v5877_v50 = vpop.permute.xlu0 %587  ;;  %1397 = vmatpush.bf16.msra.mxu1 %v4323_v11  ;;  %v4360_v11 = vld [vmem:[%s7854_s1 + $0x1a8] sm:$0xf0] }
  0xb7   : > { %v639_v4 = vsel %vm637_vm6, %v5384_v2, %v5877_v50  ;;  %v613_v51 = vpop.permute.xlu1 %612 }
  0xb8   : > { %1109 = vmatmul.bf16.vlgmr.msra.gmra.mxu0 %v639_v4  ;;  %1139 = vmatmul.bf16.gmra.mxu1 %v5875_v13  ;;  %v5974_v48 = vsel %vm687_vm8, %v613_v51, %v630_v47  ;;  %v676_v40 = vsel %vm662_vm9, %v5814_v20, %v613_v51  ;;  %v4864_v47 = vld [vmem:[%s7854_s1 + $0x1a4] sm:$0xf] }
  0xb9   : > { %1305 = vmatmul.bf16.vlgmr.msrb.gmra.mxu3 %v639_v4  ;;  %v664_v4 = vsel %vm662_vm9, %v5877_v50, %v5828_v24  ;;  %v636_v18 = vpop.permute.xlu2 %635  ;;  %v4363_v51 = vor.u32 %v4864_v47, %v4360_v11 }
  0xba   : > { %1398 = vmatpush.bf16.msra.mxu1 %v4315_v56 }
  0xbe   : > { %v590_v14 = vpop.permute.xlu0 %589 }
  0xbf   : > { %v642_v10 = vsel %vm637_vm6, %v5387_v3, %v590_v14  ;;  %v667_v52 = vsel %vm662_vm9, %v590_v14, %v5841_v16  ;;  %v5987_v60 = vpop.permute.xlu1 %614  ;;  %v4307_v14 = vor.u32 %v4850_v58, %v4304_v59 }
  0xc0   : > { %1217 = vmatmul.bf16.gmra.mxu2 %v5905_v54  ;;  %v5991_v57 = vsel %vm687_vm8, %v5987_v60, %v632_v55  ;;  %v679_v35 = vsel %vm662_vm9, %v5843_v29, %v5987_v60  ;;  %v4280_v55 = vld [vmem:[%s7854_s1 + $0x108] sm:$0xf0]  ;;  %v4860_v29 = vld [vmem:[%s7854_s1 + $0x184] sm:$0xf] }
  0xc1   : > { %1399 = vmatpush.bf16.msra.mxu1 %v4307_v14  ;;  %v4283_v58 = vor.u32 %v4844_v53, %v4280_v55  ;;  %v4344_v60 = vld [vmem:[%s7854_s1 + $0x188] sm:$0xf0] }
  0xc5   : > { %1400 = vmatpush.bf16.msra.mxu1 %v4299_v26 }
  0xc6   : > { %v592_v5 = vpop.permute.xlu0 %591 }
  0xc7   : > { %v645_v39 = vsel %vm637_vm6, %v5417_v19, %v592_v5  ;;  %v670_v16 = vsel %vm662_vm9, %v592_v5, %v5901_v34  ;;  %v4288_v5 = vld [vmem:[%s7854_s1 + $0x118] sm:$0xf0] }
  0xc8   : > { %1114 = vmatmul.bf16.gmra.mxu0 %v642_v10  ;;  %1144 = vmatmul.bf16.gmra.mxu1 %v5925_v8  ;;  %v4291_v46 = vor.u32 %v4846_v42, %v4288_v5 }
  0xc9   : > { %1310 = vmatmul.bf16.gmra.mxu3 %v642_v10  ;;  %v6003_v10 = vpop.permute.xlu1 %616 }
  0xca   : > { %v6007_v34 = vsel %vm687_vm8, %v6003_v10, %v634_v62  ;;  %1401 = vmatpush.bf16.msra.mxu1 %v4291_v46  ;;  %v4347_v62 = vor.u32 %v4860_v29, %v4344_v60 }
  0xce   : > { %v594_v24 = vpop.permute.xlu0 %593  ;;  %1402 = vmatpush.bf16.msra.mxu1 %v4283_v58 }
  0xcf   : > { %v648_v50 = vsel %vm637_vm6, %v5442_v37, %v594_v24  ;;  %v673_v45 = vsel %vm662_vm9, %v594_v24, %v611_v25  ;;  %v4862_v24 = vld [vmem:[%s7854_s1 + $0x194] sm:$0xf] }
  0xd0   : > { %1222 = vmatmul.bf16.gmra.mxu2 %v5947_v9 }
  0xd1   : > { %v6030_v43 = vpop.permute.xlu1 %618 }
  0xd2   : > { %v6034_v25 = vsel %vm687_vm8, %v6030_v43, %v636_v18 }
  0xd8   : > { %1119 = vmatmul.bf16.gmra.mxu0 %v645_v39  ;;  %1158 = vmatmul.bf16.vlgmr.msrb.gmra.mxu1 %v664_v4 }
  0xd9   : > { %1315 = vmatmul.bf16.gmra.mxu3 %v645_v39  ;;  %v568_v39 = vrot.slane %v5384_v2, 2 }
  0xe0   : > { %1227 = vmatmul.bf16.gmra.mxu2 %v5974_v48 }
  0xe8   : > { %1124 = vmatmul.bf16.gmra.mxu0 %v648_v50  ;;  %1163 = vmatmul.bf16.gmra.mxu1 %v667_v52 }
  0xe9   : > { %1320 = vmatmul.bf16.gmra.mxu3 %v648_v50  ;;  %v4352_v50 = vld [vmem:[%s7854_s1 + $0x198] sm:$0xf0] }
  0xf0   : > { %1232 = vmatmul.bf16.gmra.mxu2 %v5991_v57 }
  0xf8   : > { %1168 = vmatmul.bf16.gmra.mxu1 %v670_v16  ;;  %1354 = vmatmul.bf16.vlgmr.msrb.gmra.mxu0 %v664_v4  ;;  %v569_v4 = vrot.slane %v5387_v3, 2 }
  0xf9   : > { %1325 = vmatmul.bf16.gmra.mxu3 %v5819_v21  ;;  %v4870_v21 = vld [vmem:[%s7854_s1 + $0x1d4] sm:$0xf] }
  0xfa   : > { %v4387_v38 = vor.u32 %v4870_v21, %v4384_v17  ;;  %v570_v20 = vsel %vm567_vm5, %v568_v39, %v569_v4  ;;  %v682_v17 = vsel %vm662_vm9, %v5850_v31, %v6003_v10  ;;  %v6118_v10 = vld [vmem:[%s7857_s2] sm:$0x3] }
  0xfc   : > { %1446 = vmatpush.bf16.msra.mxu2 %v4387_v38 }
 0x100   : > { %1237 = vmatmul.bf16.gmra.mxu2 %v6007_v34 }
 0x108   : > { %1173 = vmatmul.bf16.gmra.mxu1 %v673_v45  ;;  %1359 = vmatmul.bf16.gmra.mxu0 %v667_v52  ;;  %v4355_v52 = vor.u32 %v4862_v24, %v4352_v50 }
 0x109   : > { %1330 = vmatmul.bf16.gmra.mxu3 %v5848_v30  ;;  %v4379_v30 = vor.u32 %v4868_v22, %v4376_v6  ;;  %v685_v22 = vsel %vm662_vm9, %v5859_v41, %v6030_v43  ;;  %v6123_v6 = vperm.slane %v6118_v10, 0 }
 0x10b   : > { %1447 = vmatpush.bf16.msra.mxu2 %v4379_v30 }
 0x10f   : > { %1448 = vmatpush.bf16.msra.mxu2 %v4371_v33 }
 0x110   : > { %1242 = vmatmul.bf16.gmra.mxu2 %v6034_v25 }
 0x113   : > { %1449 = vmatpush.bf16.msra.mxu2 %v4363_v51 }
 0x115   : > { %v6043_v36 = vpop.f32.mrf.mxu1 }
 0x117   : > { %1450 = vmatpush.bf16.msra.mxu2 %v4355_v52 }
 0x118   : > { %1178 = vmatmul.bf16.gmra.mxu1 %v676_v40  ;;  %1364 = vmatmul.bf16.gmra.mxu0 %v670_v16  ;;  %v571_v16 = vrot.slane %v5417_v19, 2 }
 0x119   : > { %1335 = vmatmul.bf16.gmra.mxu3 %v5875_v13  ;;  %v6065_v13 = vpop.f32.mrf.mxu3 }
 0x11a   : > { %v572_v21 = vsel %vm567_vm5, %v569_v4, %v571_v16  ;;  %v574_v15 = vsel %vm567_vm5, %v571_v16, %v573_v44 }
 0x11b   : > { %1451 = vmatpush.bf16.msra.mxu2 %v4347_v62 }
 0x11d   : > { %v6056_v49 = vpop.f32.mrf.mxu1 }
 0x120   : > { %4388 = vmatmul.msk.bf16.vlgmr.msrb.gmra.mxu2 %vm637_vm6, %v570_v20 }
 0x121   : > { %v6085_v56 = vpop.f32.mrf.mxu3 }
 0x123   : > { %v1208_v2 = vpop.f32.mrf.mxu2 }
 0x125   : > { %v6068_v3 = vpop.f32.mrf.mxu1 }
 0x128   : > { %1183 = vmatmul.bf16.gmra.mxu1 %v679_v35  ;;  %1369 = vmatmul.bf16.gmra.mxu0 %v673_v45 }
 0x129   : > { %1340 = vmatmul.bf16.gmra.mxu3 %v5925_v8 }
 0x12b   : > { %v1210_v59 = vpop.f32.mrf.mxu2 }
 0x12d   : > { %v6095_v14 = vpop.f32.mrf.mxu1 }
 0x130   : > { %4389 = vmatmul.msk.bf16.gmra.mxu2 %vm637_vm6, %v572_v21 }
 0x133   : > { %v1213_v19 = vpop.f32.mrf.mxu2 }
 0x135   : > { %v6099_v8 = vpop.f32.mrf.mxu1  ;;  %v1110_v18 = vpop.f32.mrf.mxu0 }
 0x136   : > { %v1111_v30 = vadd.f32 %v1110_v18, %v6123_v6 }
 0x138   : > { %1188 = vmatmul.bf16.gmra.mxu1 %v682_v17  ;;  %1374 = vmatmul.bf16.gmra.mxu0 %v676_v40 }
 0x13b   : > { %v1215_v38 = vpop.f32.mrf.mxu2 }
 0x13d   : > { %v6104_v45 = vpop.f32.mrf.mxu1  ;;  %v1112_v44 = vpop.f32.mrf.mxu0 }
 0x13e   : > { %v1113_v42 = vadd.f32 %v1112_v44, %v6123_v6 }
 0x140   : > { %4390 = vmatmul.msk.bf16.gmra.mxu2 %vm637_vm6, %v574_v15 }
 0x143   : > { %v1218_v28 = vpop.f32.mrf.mxu2 }
 0x145   : > { %v6110_v26 = vpop.f32.mrf.mxu1  ;;  %v1115_v33 = vpop.f32.mrf.mxu0 }
 0x146   : > { %v1116_v46 = vadd.f32 %v1115_v33, %v6123_v6 }
 0x148   : > { %1193 = vmatmul.bf16.gmra.mxu1 %v685_v22  ;;  %1379 = vmatmul.bf16.gmra.mxu0 %v679_v35 }
 0x14b   : > { %v1220_v31 = vpop.f32.mrf.mxu2 }
 0x14d   : > { %v6120_v37 = vpop.f32.mrf.mxu1 }
 0x150   : > { %4396 = vmatmul.msk.bf16.vlgmr.msra.gmra.mxu2 %vm637_vm6, %v570_v20  ;;  %v1117_v20 = vpop.f32.mrf.mxu0 }
 0x151   : > { %v1118_v50 = vadd.f32 %v1117_v20, %v6123_v6 }
 0x153   : > { %v1223_v27 = vpop.f32.mrf.mxu2 }
 0x155   : > { %v1159_v41 = vpop.f32.mrf.mxu1 }
 0x156   : > { %v1160_v43 = vadd.f32 %v1159_v41, %v1111_v30 }
 0x158   : > { %1384 = vmatmul.bf16.gmra.mxu0 %v682_v17  ;;  %1403 = vmatmul.bf16.vlgmr.msra.gmra.mxu1 %v5832_v0  ;;  %v6128_v32 = vadd.f32 %v1208_v2, %v1160_v43  ;;  %v6138_v2 = vpop.f32.mrf.mxu3  ;;  %v1120_v52 = vpop.f32.mrf.mxu0 }
 0x159   : > { %v1121_v16 = vadd.f32 %v1120_v52, %v6123_v6 }
 0x15b   : > { %v1225_v40 = vpop.f32.mrf.mxu2 }
 0x15d   : > { %v1161_v5 = vpop.f32.mrf.mxu1 }
 0x15e   : > { %v1162_v39 = vadd.f32 %v1161_v5, %v1113_v42 }
 0x160   : > { %4397 = vmatmul.msk.bf16.gmra.mxu2 %vm637_vm6, %v572_v21  ;;  %v6132_v4 = vadd.f32 %v1210_v59, %v1162_v39  ;;  %v6145_v59 = vpop.f32.mrf.mxu3  ;;  %v1122_v60 = vpop.f32.mrf.mxu0 }
 0x163   : > { %v1228_v47 = vpop.f32.mrf.mxu2 }
 0x165   : > { %v1164_v11 = vpop.f32.mrf.mxu1 }
 0x166   : > { %v1165_v51 = vadd.f32 %v1164_v11, %v1116_v46 }
 0x168   : > { %1389 = vmatmul.bf16.gmra.mxu0 %v685_v22  ;;  %1408 = vmatmul.bf16.gmra.mxu1 %v5863_v1  ;;  %v6136_v0 = vadd.f32 %v1213_v19, %v1165_v51  ;;  %v1123_v19 = vadd.f32 %v1122_v60, %v6123_v6  ;;  %v1125_v22 = vpop.f32.mrf.mxu0 }
 0x169   : > { %v1126_v44 = vadd.f32 %v1125_v22, %v6123_v6 }
 0x16b   : > { %v1230_v24 = vpop.f32.mrf.mxu2 }
 0x16d   : > { %v1166_v35 = vpop.f32.mrf.mxu1 }
 0x16e   : > { %v1167_v53 = vadd.f32 %v1166_v35, %v1118_v50 }
 0x170   : > { %4398 = vmatmul.msk.bf16.gmra.mxu2 %vm637_vm6, %v574_v15  ;;  %v6142_v55 = vadd.f32 %v1215_v38, %v1167_v53  ;;  %v6151_v15 = vpop.f32.mrf.mxu3  ;;  %v1127_v33 = vpop.f32.mrf.mxu0 }
 0x171   : > { %v1128_v5 = vadd.f32 %v1127_v33, %v6123_v6 }
 0x173   : > { %v1233_v58 = vpop.f32.mrf.mxu2 }
 0x175   : > { %v1169_v1 = vpop.f32.mrf.mxu1 }
 0x176   : > { %v1170_v29 = vadd.f32 %v1169_v1, %v1121_v16 }
 0x178   : > { %1413 = vmatmul.bf16.gmra.mxu1 %v5905_v54  ;;  %v6148_v62 = vadd.f32 %v1218_v28, %v1170_v29  ;;  %v6161_v43 = vpop.f32.mrf.mxu3 }
 0x17b   : > { %v1235_v21 = vpop.f32.mrf.mxu2 }
 0x17d   : > { %v1171_v17 = vpop.f32.mrf.mxu1 }
 0x17e   : > { %v1172_v18 = vadd.f32 %v1171_v17, %v1123_v19 }
 0x180   : > { %4399 = vmatmul.msk.bf16.gmra.mxu2 %vm637_vm6, %v5592_v63  ;;  %v6155_v38 = vadd.f32 %v1220_v31, %v1172_v18  ;;  %v6168_v46 = vpop.f32.mrf.mxu3 }
 0x183   : > { %v1238_v30 = vpop.f32.mrf.mxu2 }
 0x185   : > { %v1174_v41 = vpop.f32.mrf.mxu1 }
 0x186   : > { %v1175_v54 = vadd.f32 %v1174_v41, %v1126_v44  ;;  %v1355_v41 = vpop.f32.mrf.mxu0 }
 0x188   : > { %v6158_v28 = vadd.f32 %v1223_v27, %v1175_v54  ;;  %1418 = vmatmul.bf16.gmra.mxu1 %v5947_v9  ;;  %v1131_v27 = vadd.f32 %v6043_v36, %v6123_v6  ;;  %v6179_v52 = vpop.f32.mrf.mxu3 }
 0x18b   : > { %v1240_v42 = vpop.f32.mrf.mxu2 }
 0x18d   : > { %v1176_v39 = vpop.f32.mrf.mxu1 }
 0x18e   : > { %v1177_v63 = vadd.f32 %v1176_v39, %v1128_v5 }
 0x190   : > { %v6164_v31 = vadd.f32 %v1225_v40, %v1177_v63  ;;  %4400 = vmatmul.msk.bf16.gmra.mxu2 %vm637_vm6, %v5679_v61  ;;  %v1133_v40 = vadd.f32 %v6056_v49, %v6123_v6  ;;  %v6187_v1 = vpop.f32.mrf.mxu3  ;;  %v1357_v63 = vpop.f32.mrf.mxu0 }
 0x193   : > { %v1243_v20 = vpop.f32.mrf.mxu2 }
 0x195   : > { %v1179_v9 = vpop.f32.mrf.mxu1 }
 0x196   : > { %v1180_v11 = vadd.f32 %v1179_v9, %v1131_v27  ;;  %v6223_v9 = vperm.slane %v6118_v10, 1 }
 0x198   : > { %v6172_v51 = vadd.f32 %v1228_v47, %v1180_v11  ;;  %1423 = vmatmul.bf16.gmra.mxu1 %v5974_v48  ;;  %v1136_v47 = vadd.f32 %v6068_v3, %v6123_v6  ;;  %v1360_v11 = vpop.f32.mrf.mxu0 }
 0x19b   : > { %v6175_v50 = vpop.f32.mrf.mxu2 }
 0x19d   : > { %v1181_v61 = vpop.f32.mrf.mxu1 }
 0x19e   : > { %v1182_v35 = vadd.f32 %v1181_v61, %v1133_v40 }
 0x1a0   : > { %v6181_v53 = vadd.f32 %v1230_v24, %v1182_v35  ;;  %4401 = vmatmul.msk.bf16.gmra.mxu2 %vm637_vm6, %v5699_v12  ;;  %v1138_v24 = vadd.f32 %v6095_v14, %v6123_v6  ;;  %v6198_v12 = vpop.f32.mrf.mxu3  ;;  %v1362_v10 = vpop.f32.mrf.mxu0 }
 0x1a3   : > { %v1257_v36 = vpop.f32.mrf.mxu2 }
 0x1a5   : > { %v1184_v16 = vpop.f32.mrf.mxu1 }
 0x1a6   : > { %v1185_v48 = vadd.f32 %v1184_v16, %v1136_v47  ;;  %v6227_v47 = vadd.f32 %v1257_v36, %v6128_v32 }
 0x1a8   : > { %v6189_v29 = vadd.f32 %v1233_v58, %v1185_v48  ;;  %1428 = vmatmul.bf16.gmra.mxu1 %v5991_v57  ;;  %v1141_v58 = vadd.f32 %v6099_v8, %v6123_v6  ;;  %v1306_v14 = vpop.f32.mrf.mxu3 }
 0x1a9   : > { %v1307_v40 = vadd.f32 %v1306_v14, %v6223_v9 }
 0x1ab   : > { %v1259_v49 = vpop.f32.mrf.mxu2  ;;  %v1356_v61 = vadd.f32 %v1355_v41, %v1307_v40 }
 0x1ac   : > { %v6234_v14 = vadd.f32 %v1259_v49, %v6132_v4 }
 0x1ad   : > { %v1186_v60 = vpop.f32.mrf.mxu1 }
 0x1ae   : > { %v1187_v19 = vadd.f32 %v1186_v60, %v1138_v24  ;;  %v1493_v24 = vmax.f32 %v6227_v47, 0.0  ;;  %v1495_v41 = vmax.f32 %v6234_v14, 0.0 }
 0x1b0   : > { %v6194_v17 = vadd.f32 %v1235_v21, %v1187_v19  ;;  %4402 = vmatmul.msk.bf16.gmra.mxu2 %vm637_vm6, %v5720_v7  ;;  %v1143_v21 = vadd.f32 %v6104_v45, %v6123_v6  ;;  %v1308_v5 = vpop.f32.mrf.mxu3 }
 0x1b1   : > { %v1309_v48 = vadd.f32 %v1308_v5, %v6223_v9 }
 0x1b3   : > { %v1262_v3 = vpop.f32.mrf.mxu2 }
 0x1b4   : > { %v6242_v4 = vadd.f32 %v1262_v3, %v6136_v0 }
 0x1b5   : > { %v1189_v18 = vpop.f32.mrf.mxu1 }
 0x1b6   : > { %v1190_v22 = vadd.f32 %v1189_v18, %v1141_v58  ;;  %v1358_v58 = vadd.f32 %v1357_v63, %v1309_v48 }
 0x1b8   : > { %v6202_v57 = vadd.f32 %v1238_v30, %v1190_v22  ;;  %1433 = vmatmul.bf16.gmra.mxu1 %v6007_v34  ;;  %v1146_v30 = vadd.f32 %v6110_v26, %v6123_v6 }
 0x1bb   : > { %v1264_v44 = vpop.f32.mrf.mxu2 }
 0x1bd   : > { %v1191_v54 = vpop.f32.mrf.mxu1 }
 0x1be   : > { %v1192_v7 = vadd.f32 %v1191_v54, %v1143_v21 }
 0x1c0   : > { %v6207_v33 = vadd.f32 %v1240_v42, %v1192_v7  ;;  %4403 = vmatmul.msk.bf16.gmra.mxu2 %vm637_vm6, %v5780_v23  ;;  %v1311_v23 = vpop.f32.mrf.mxu3  ;;  %vm3251_vm6 = vcmask 916480  }
 0x1c1   : > { %v1312_v21 = vadd.f32 %v1311_v23, %v6223_v9 }
 0x1c3   : > { %v6211_v8 = vpop.f32.mrf.mxu2  ;;  %v1361_v5 = vadd.f32 %v1360_v11, %v1312_v21 }
 0x1c5   : > { %v1194_v34 = vpop.f32.mrf.mxu1 }
 0x1c6   : > { %v1195_v39 = vadd.f32 %v1194_v34, %v1146_v30 }
 0x1c8   : > { %v6215_v27 = vadd.f32 %v1243_v20, %v1195_v39  ;;  %1438 = vmatmul.bf16.gmra.mxu1 %v6034_v25  ;;  %v1313_v25 = vpop.f32.mrf.mxu3  ;;  %v1365_v39 = vpop.f32.mrf.mxu0 }
 0x1c9   : > { %v1314_v23 = vadd.f32 %v1313_v25, %v6223_v9 }
 0x1cb   : > { %v6218_v45 = vpop.f32.mrf.mxu2 }
 0x1cd   : > { %v6220_v42 = vpop.f32.mrf.mxu1 }
 0x1d0   : > { %v1316_v7 = vpop.f32.mrf.mxu3  ;;  %v1367_v3 = vpop.f32.mrf.mxu0 }
 0x1d1   : > { %v1317_v25 = vadd.f32 %v1316_v7, %v6223_v9 }
 0x1d3   : > { %v1453_v26 = vpop.f32.mrf.mxu2 }
 0x1d5   : > { %v1404_v35 = vpop.f32.mrf.mxu1 }
 0x1d6   : > { %v1405_v20 = vadd.f32 %v1404_v35, %v1356_v61 }
 0x1d8   : > { %v1454_v16 = vadd.f32 %v1453_v26, %v1405_v20  ;;  %v1497_v26 = vmax.f32 %v6242_v4, 0.0  ;;  %v1363_v20 = vadd.f32 %v1362_v10, %v1314_v23  ;;  %v1366_v10 = vadd.f32 %v1365_v39, %v1317_v25 }
 0x1da   : > { %v1494_v60 = vmax.f32 %v1454_v16, 0.0  ;;  %v1318_v16 = vpop.f32.mrf.mxu3 }
 0x1db   : > { %v1455_v19 = vpop.f32.mrf.mxu2  ;;  %v1319_v7 = vadd.f32 %v1318_v16, %v6223_v9 }
 0x1dc   : > { %v5025_v18 = vpack.i.bf16 %v1494_v60, %v1493_v24  ;;  %v6250_v60 = vadd.f32 %v1264_v44, %v6142_v55  ;;  %v6259_v55 = vadd.f32 %v6211_v8, %v6148_v62  ;;  %v6268_v62 = vadd.f32 %v6218_v45, %v6155_v38 }
 0x1dd   : > { %v1406_v22 = vpop.f32.mrf.mxu1  ;;  %v6277_v38 = vadd.f32 %v6065_v13, %v6158_v28  ;;  %v6286_v13 = vadd.f32 %v6085_v56, %v6164_v31  ;;  %v6295_v56 = vadd.f32 %v6138_v2, %v6172_v51  ;;  %v6304_v2 = vadd.f32 %v6145_v59, %v6181_v53 }
 0x1de   : > { %v1407_v32 = vadd.f32 %v1406_v22, %v1358_v58  ;;  %5026 = vrot.lane.b32.xlu0 %v5025_v18, %s7839_s15  ;;  %v1499_v58 = vmax.f32 %v6250_v60, 0.0  ;;  %v6313_v59 = vadd.f32 %v6151_v15, %v6189_v29 }
 0x1e0   : > { %v1456_v36 = vadd.f32 %v1455_v19, %v1407_v32 }
 0x1e2   : > { %v1496_v54 = vmax.f32 %v1456_v36, 0.0  ;;  %v1321_v21 = vpop.f32.mrf.mxu3 }
 0x1e3   : > { %v1458_v30 = vpop.f32.mrf.mxu2 }
 0x1e4   : > { %v5030_v34 = vpack.i.bf16 %v1496_v54, %v1495_v41 }
 0x1e5   : > { %v1409_v63 = vpop.f32.mrf.mxu1 }
 0x1e6   : > { %v1410_v49 = vadd.f32 %v1409_v63, %v1361_v5  ;;  %5031 = vrot.lane.b32.xlu1 %v5030_v34, %s7839_s15  ;;  %v1501_v5 = vmax.f32 %v6259_v55, 0.0  ;;  %v1368_v63 = vadd.f32 %v1367_v3, %v1319_v7 }
 0x1e8   : > { %v1459_v40 = vadd.f32 %v1458_v30, %v1410_v49  ;;  %v1370_v30 = vpop.f32.mrf.mxu0 }
 0x1ea   : > { %v1498_v61 = vmax.f32 %v1459_v40, 0.0 }
 0x1eb   : > { %v1460_v35 = vpop.f32.mrf.mxu2 }
 0x1ec   : > { %v5035_v11 = vpack.i.bf16 %v1498_v61, %v1497_v26  ;;  %v1323_v61 = vpop.f32.mrf.mxu3 }
 0x1ed   : > { %v1411_v48 = vpop.f32.mrf.mxu1 }
 0x1ee   : > { %v1412_v0 = vadd.f32 %v1411_v48, %v1363_v20  ;;  %5036 = vrot.lane.b32.xlu2 %v5035_v11, %s7839_s15  ;;  %v1503_v20 = vmax.f32 %v6268_v62, 0.0 }
 0x1f0   : > { %v1461_v19 = vadd.f32 %v1460_v35, %v1412_v0  ;;  %v1322_v35 = vadd.f32 %v1321_v21, %v6223_v9  ;;  %v1372_v16 = vpop.f32.mrf.mxu0 }
 0x1f2   : > { %v1500_v18 = vmax.f32 %v1461_v19, 0.0  ;;  %v1371_v0 = vadd.f32 %v1370_v30, %v1322_v35 }
 0x1f3   : > { %v1463_v22 = vpop.f32.mrf.mxu2 }
 0x1f4   : > { %v5040_v32 = vpack.i.bf16 %v1500_v18, %v1499_v58  ;;  %v1324_v18 = vadd.f32 %v1323_v61, %v6223_v9 }
 0x1f5   : > { %v1414_v36 = vpop.f32.mrf.mxu1 }
 0x1f6   : > { %v1415_v44 = vadd.f32 %v1414_v36, %v1366_v10  ;;  %5041 = vrot.lane.b32.xlu0 %v5040_v32, %s7839_s15  ;;  %v1326_v32 = vpop.f32.mrf.mxu3 }
 0x1f8   : > { %v1464_v54 = vadd.f32 %v1463_v22, %v1415_v44  ;;  %v1505_v22 = vmax.f32 %v6277_v38, 0.0  ;;  %v1373_v44 = vadd.f32 %v1372_v16, %v1324_v18 }
 0x1fa   : > { %v1502_v34 = vmax.f32 %v1464_v54, 0.0  ;;  %v1375_v54 = vpop.f32.mrf.mxu0 }
 0x1fb   : > { %v1465_v39 = vpop.f32.mrf.mxu2 }
 0x1fc   : > { %v5045_v49 = vpack.i.bf16 %v1502_v34, %v1501_v5  ;;  %v1327_v34 = vadd.f32 %v1326_v32, %v6223_v9 }
 0x1fd   : > { %v1416_v40 = vpop.f32.mrf.mxu1 }
 0x1fe   : > { %v1417_v8 = vadd.f32 %v1416_v40, %v1368_v63  ;;  %5046 = vrot.lane.b32.xlu1 %v5045_v49, %s7839_s15  ;;  %v1507_v63 = vmax.f32 %v6286_v13, 0.0  ;;  %v1376_v40 = vadd.f32 %v1375_v54, %v1327_v34 }
 0x200   : > { %v1466_v23 = vadd.f32 %v1465_v39, %v1417_v8 }
 0x202   : > { %v1504_v11 = vmax.f32 %v1466_v23, 0.0  ;;  %v1328_v23 = vpop.f32.mrf.mxu3  ;;  %v1377_v35 = vpop.f32.mrf.mxu0 }
 0x203   : > { %v1468_v48 = vpop.f32.mrf.mxu2  ;;  %v1329_v16 = vadd.f32 %v1328_v23, %v6223_v9 }
 0x204   : > { %v5050_v3 = vpack.i.bf16 %v1504_v11, %v1503_v20 }
 0x205   : > { %v1419_v19 = vpop.f32.mrf.mxu1 }
 0x206   : > { %v1420_v45 = vadd.f32 %v1419_v19, %v1371_v0  ;;  %5051 = vrot.lane.b32.xlu2 %v5050_v3, %s7839_s15  ;;  %v1378_v19 = vadd.f32 %v1377_v35, %v1329_v16 }
 0x208   : > { %v1469_v25 = vadd.f32 %v1468_v48, %v1420_v45  ;;  %v1509_v48 = vmax.f32 %v6295_v56, 0.0 }
 0x20a   : > { %v1506_v10 = vmax.f32 %v1469_v25, 0.0  ;;  %v1331_v18 = vpop.f32.mrf.mxu3  ;;  %v1380_v32 = vpop.f32.mrf.mxu0 }
 0x20b   : > { %v1470_v36 = vpop.f32.mrf.mxu2 }
 0x20c   : > { %v5055_v21 = vpack.i.bf16 %v1506_v10, %v1505_v22 }
 0x20d   : > { %v1421_v30 = vpop.f32.mrf.mxu1 }
 0x20e   : > { %v1422_v28 = vadd.f32 %v1421_v30, %v1373_v44  ;;  %5056 = vrot.lane.b32.xlu0 %v5055_v21, %s7839_s15  ;;  %v1511_v21 = vmax.f32 %v6304_v2, 0.0  ;;  %v4454_v2 = vld [vmem:[%s7820_s3 + $0x60] sm:$0xf] }
 0x210   : > { %v1471_v7 = vadd.f32 %v1470_v36, %v1422_v28  ;;  %v1332_v36 = vadd.f32 %v1331_v18, %v6223_v9 }
 0x212   : > { %v1508_v39 = vmax.f32 %v1471_v7, 0.0  ;;  %v1381_v54 = vadd.f32 %v1380_v32, %v1332_v36  ;;  %v1333_v36 = vpop.f32.mrf.mxu3 }
 0x213   : > { %v1473_v49 = vpop.f32.mrf.mxu2 }
 0x214   : > { %v5060_v8 = vpack.i.bf16 %v1508_v39, %v1507_v63  ;;  %v1513_v39 = vmax.f32 %v6313_v59, 0.0  ;;  %v4518_v59 = vld [vmem:[%s7820_s3 + $0xe0] sm:$0xf] }
 0x215   : > { %v1424_v61 = vpop.f32.mrf.mxu1 }
 0x216   : > { %v1425_v31 = vadd.f32 %v1424_v61, %v1376_v40  ;;  %5061 = vrot.lane.b32.xlu1 %v5060_v8, %s7839_s15 }
 0x218   : > { %v1474_v11 = vadd.f32 %v1473_v49, %v1425_v31 }
 0x21a   : > { %v1510_v0 = vmax.f32 %v1474_v11, 0.0  ;;  %v1336_v60 = vpop.f32.mrf.mxu3 }
 0x21b   : > { %v1475_v3 = vpop.f32.mrf.mxu2 }
 0x21c   : > { %v5065_v45 = vpack.i.bf16 %v1510_v0, %v1509_v48 }
 0x21d   : > { %v1426_v25 = vpop.f32.mrf.mxu1 }
 0x21e   : > { %v1427_v51 = vadd.f32 %v1426_v25, %v1378_v19  ;;  %5066 = vrot.lane.b32.xlu2 %v5065_v45, %s7839_s15 }
 0x220   : > { %v1476_v10 = vadd.f32 %v1475_v3, %v1427_v51 }
 0x222   : > { %v1512_v44 = vmax.f32 %v1476_v10, 0.0 }
 0x223   : > { %v1478_v7 = vpop.f32.mrf.mxu2 }
 0x224   : > { %v5070_v30 = vpack.i.bf16 %v1512_v44, %v1511_v21 }
 0x225   : > { %v1429_v28 = vpop.f32.mrf.mxu1 }
 0x226   : > { %v1430_v53 = vadd.f32 %v1429_v28, %v1381_v54  ;;  %5071 = vrot.lane.b32.xlu0 %v5070_v30, %s7839_s15  ;;  %v1382_v28 = vpop.f32.mrf.mxu0 }
 0x228   : > { %v1479_v34 = vadd.f32 %v1478_v7, %v1430_v53 }
 0x22a   : > { %v1514_v49 = vmax.f32 %v1479_v34, 0.0 }
 0x22c   : > { %v5075_v40 = vpack.i.bf16 %v1514_v49, %v1513_v39 }
 0x22e   : > { %5076 = vrot.lane.b32.xlu1 %v5075_v40, %s7839_s15 }
 0x248   : > { %v5037_v23 = vpop.permute.xlu2 %5036 }
 0x249   : > { %v5039_v35 = vunpack.i.h.bf16 %v5037_v23  ;;  %v5038_v11 = vunpack.i.l.bf16 %v5037_v23 }
 0x24b   : > { %v1624_v3 = vsel %vm1621_vm10, %v5038_v11, %v5039_v35 }
 0x24c   : > { %v1656_v45 = vmax.f32 %v1497_v26, %v1624_v3  ;;  %v1431_v26 = vpop.f32.mrf.mxu1 }
 0x24e   : > { %v1689_v10 = vrot.slane %v1656_v45, 1 }
 0x250   : > { %v5027_v15 = vpop.permute.xlu0 %5026 }
 0x251   : > { %v5029_v16 = vunpack.i.h.bf16 %v5027_v15  ;;  %v5028_v0 = vunpack.i.l.bf16 %v5027_v15 }
 0x253   : > { %v1622_v25 = vsel %vm1621_vm10, %v5028_v0, %v5029_v16 }
 0x254   : > { %v1654_v18 = vmax.f32 %v1493_v24, %v1622_v25 }
 0x256   : > { %v1686_v7 = vrot.slane %v1654_v18, 1 }
 0x258   : > { %v5032_v8 = vpop.permute.xlu1 %5031 }
 0x259   : > { %v5034_v61 = vunpack.i.h.bf16 %v5032_v8  ;;  %v5033_v31 = vunpack.i.l.bf16 %v5032_v8 }
 0x25b   : > { %v1623_v29 = vsel %vm1621_vm10, %v5033_v31, %v5034_v61  ;;  %v1480_v61 = vpop.f32.mrf.mxu2 }
 0x25c   : > { %v1655_v19 = vmax.f32 %v1495_v41, %v1623_v29 }
 0x25e   : > { %v1687_v51 = vrot.slane %v1655_v19, 1 }
 0x260   : > { %v1690_v30 = vsel %vm512_vm2, %v1687_v51, %v1689_v10  ;;  %v5052_v14 = vpop.permute.xlu2 %5051  ;;  %v1688_v53 = vsel %vm512_vm2, %v1686_v7, %v1687_v51 }
 0x261   : > { %v1735_v47 = vmax.f32 %v1655_v19, %v1690_v30  ;;  %v5054_v24 = vunpack.i.h.bf16 %v5052_v14  ;;  %v5053_v34 = vunpack.i.l.bf16 %v5052_v14  ;;  %v1734_v23 = vmax.f32 %v1654_v18, %v1688_v53  ;;  %v1385_v19 = vpop.f32.mrf.mxu0 }
 0x263   : > { %v1751_v15 = vpack.c.bf16 %v1735_v47, %v1735_v47  ;;  %v1627_v29 = vsel %vm1621_vm10, %v5053_v34, %v5054_v24  ;;  %v1750_v3 = vpack.c.bf16 %v1734_v23, %v1734_v23  ;;  %v1338_v34 = vpop.f32.mrf.mxu3 }
 0x264   : > { %v6341_v25 = vmax.f32 %v1503_v20, %v1627_v29 }
 0x265   : > { %v1783_v51 = vunpack.c.l.b16 %v1751_v15  ;;  %v1782_v7 = vunpack.c.l.b16 %v1750_v3 }
 0x267   : > { %v6349_v24 = vpack.c.b16 %v1783_v51, %v1782_v7 }
 0x268   : > { %v5042_v32 = vpop.permute.xlu0 %5041 }
 0x269   : > { %v5044_v44 = vunpack.i.h.bf16 %v5042_v32  ;;  %v5043_v54 = vunpack.i.l.bf16 %v5042_v32  ;;  %v1434_v32 = vpop.f32.mrf.mxu1 }
 0x26b   : > { %v1625_v41 = vsel %vm1621_vm10, %v5043_v54, %v5044_v44  ;;  %v1337_v54 = vadd.f32 %v1336_v60, %v6223_v9 }
 0x26c   : > { %v1657_v4 = vmax.f32 %v1499_v58, %v1625_v41  ;;  %v1483_v41 = vpop.f32.mrf.mxu2 }
 0x26d   : > { %v1386_v62 = vadd.f32 %v1385_v19, %v1337_v54 }
 0x26e   : > { %v1691_v49 = vrot.slane %v1657_v4, 1 }
 0x26f   : > { %v1435_v47 = vadd.f32 %v1434_v32, %v1386_v62  ;;  %v6368_v32 = vadd.f32 %v6161_v43, %v6194_v17  ;;  %v1339_v62 = vadd.f32 %v1338_v34, %v6223_v9 }
 0x270   : > { %v5047_v40 = vpop.permute.xlu1 %5046  ;;  %v1692_v8 = vsel %vm512_vm2, %v1689_v10, %v1691_v49 }
 0x271   : > { %v5049_v31 = vunpack.i.h.bf16 %v5047_v40  ;;  %v5048_v35 = vunpack.i.l.bf16 %v5047_v40  ;;  %v1736_v11 = vmax.f32 %v1656_v45, %v1692_v8  ;;  %v1334_v45 = vadd.f32 %v1333_v36, %v6223_v9  ;;  %v1387_v8 = vpop.f32.mrf.mxu0  ;;  %v1436_v15 = vpop.f32.mrf.mxu1 }
 0x273   : > { %v1626_v58 = vsel %vm1621_vm10, %v5048_v35, %v5049_v31  ;;  %v1752_v16 = vpack.c.bf16 %v1736_v11, %v1736_v11  ;;  %v1383_v55 = vadd.f32 %v1382_v28, %v1334_v45  ;;  %v1806_v11 = vrot.slane %v6349_v24, 1 }
 0x274   : > { %v1658_v0 = vmax.f32 %v1501_v5, %v1626_v58  ;;  %v1695_v5 = vrot.slane %v6341_v25, 1  ;;  %v1485_v7 = vpop.f32.mrf.mxu2 }
 0x275   : > { %v1784_v18 = vunpack.c.l.b16 %v1752_v16  ;;  %v1432_v20 = vadd.f32 %v1431_v26, %v1383_v55  ;;  %v1841_v26 = vrot.slane %v6349_v24, 3 }
 0x276   : > { %v1693_v10 = vrot.slane %v1658_v0, 1 }
 0x277   : > { %v1859_v44 = vpack.c.b16 %v1784_v18, %v1783_v51  ;;  %v1481_v28 = vadd.f32 %v1480_v61, %v1432_v20  ;;  %v1823_v61 = vrot.slane %v6349_v24, 2 }
 0x278   : > { %v1694_v30 = vsel %vm512_vm2, %v1691_v49, %v1693_v10  ;;  %v1696_v36 = vsel %vm512_vm2, %v1693_v10, %v1695_v5  ;;  %v5067_v23 = vpop.permute.xlu2 %5066 }
 0x279   : > { %v1737_v14 = vmax.f32 %v1657_v4, %v1694_v30  ;;  %1922 = vrot.lane.b32.xlu1 %v1859_v44, %s7837_s12  ;;  %v1738_v49 = vmax.f32 %v1658_v0, %v1696_v36  ;;  %v1484_v4 = vadd.f32 %v1483_v41, %v1435_v47  ;;  %v5069_v0 = vunpack.i.h.bf16 %v5067_v23 }
 0x27a   : > { %v5068_v51 = vunpack.i.l.bf16 %v5067_v23  ;;  %v6379_v30 = vadd.f32 %v6168_v46, %v6202_v57  ;;  %v1516_v43 = vmax.f32 %v1481_v28, 0.0  ;;  %v1515_v41 = vmax.f32 %v6368_v32, 0.0  ;;  %v1390_v46 = vpop.f32.mrf.mxu0 }
 0x27b   : > { %v1753_v53 = vpack.c.bf16 %v1737_v14, %v1737_v14  ;;  %v1754_v19 = vpack.c.bf16 %v1738_v49, %v1738_v49  ;;  %v1518_v55 = vmax.f32 %v1484_v4, 0.0 }
 0x27c   : > { %v1630_v14 = vsel %vm1621_vm10, %v5068_v51, %v5069_v0  ;;  %v1517_v57 = vmax.f32 %v6379_v30, 0.0  ;;  %v5080_v34 = vpack.i.bf16 %v1516_v43, %v1515_v41 }
 0x27d   : > { %v1785_v40 = vunpack.c.l.b16 %v1753_v53  ;;  %v1786_v38 = vunpack.c.l.b16 %v1754_v19  ;;  %v6391_v23 = vmax.f32 %v1509_v48, %v1630_v14  ;;  %v1488_v19 = vpop.f32.mrf.mxu2 }
 0x27f   : > { %v6351_v31 = vpack.c.b16 %v1785_v40, %v1784_v18  ;;  %v1860_v4 = vpack.c.b16 %v1786_v38, %v1785_v40  ;;  %v1701_v0 = vrot.slane %v6391_v23, 1 }
 0x280   : > { %v5057_v35 = vpop.permute.xlu0 %5056 }
 0x281   : > { %v5059_v29 = vunpack.i.h.bf16 %v5057_v35  ;;  %v5058_v60 = vunpack.i.l.bf16 %v5057_v35  ;;  %v1807_v58 = vrot.slane %v6351_v31, 1  ;;  %v1842_v16 = vrot.slane %v6351_v31, 3  ;;  %v1439_v35 = vpop.f32.mrf.mxu1 }
 0x282   : > { %v1824_v3 = vrot.slane %v6351_v31, 2 }
 0x283   : > { %v1628_v18 = vsel %vm1621_vm10, %v5058_v60, %v5059_v29  ;;  %v1808_v10 = vsel %vm512_vm2, %v1806_v11, %v1807_v58  ;;  %v1843_v45 = vsel %vm1840_vm11, %v1841_v26, %v1842_v16  ;;  %v1388_v29 = vadd.f32 %v1387_v8, %v1339_v62 }
 0x284   : > { %v1660_v44 = vmax.f32 %v1505_v22, %v1628_v18  ;;  %1871 = vrot.lane.b32.xlu2 %v1808_v10, %s7840_s13  ;;  %1905 = vrot.lane.b32.xlu1 %v1843_v45, %s7833_s26  ;;  %v1825_v54 = vsel %vm567_vm5, %v1823_v61, %v1824_v3  ;;  %v1341_v22 = vpop.f32.mrf.mxu3 }
 0x285   : > { %1888 = vrot.lane.b32.xlu0 %v1825_v54, %s7835_s24  ;;  %v1342_v28 = vadd.f32 %v1341_v22, %v6223_v9  ;;  %v1437_v48 = vadd.f32 %v1436_v15, %v1388_v29 }
 0x286   : > { %v1697_v17 = vrot.slane %v1660_v44, 1 }
 0x287   : > { %v1391_v60 = vadd.f32 %v1390_v46, %v1342_v28  ;;  %v1486_v45 = vadd.f32 %v1485_v7, %v1437_v48  ;;  %v6480_v48 = vld [vmem:[%s7820_s3 + $0x1a0] sm:$0x33] }
 0x288   : > { %v5062_v20 = vpop.permute.xlu1 %5061  ;;  %v1698_v53 = vsel %vm512_vm2, %v1695_v5, %v1697_v17  ;;  %v5085_v5 = vpack.i.bf16 %v1518_v55, %v1517_v57  ;;  %v6436_v55 = vadd.f32 %v6187_v1, %v6215_v27  ;;  %v1148_v1 = vadd.f32 %v6120_v37, %v6123_v6  ;;  %v4462_v37 = vld [vmem:[%s7820_s3 + $0x70] sm:$0xf]  ;;  %v4887_v6 = vld [vmem:[%s7820_s3 + $0x74] sm:$0xf0] }
 0x289   : > { %v5064_v36 = vunpack.i.h.bf16 %v5062_v20  ;;  %v5063_v47 = vunpack.i.l.bf16 %v5062_v20  ;;  %v1739_v49 = vmax.f32 %v6341_v25, %v1698_v53  ;;  %v1440_v40 = vadd.f32 %v1439_v35, %v1391_v60  ;;  %v1392_v53 = vpop.f32.mrf.mxu0  ;;  %v1441_v27 = vpop.f32.mrf.mxu1 }
 0x28a   : > { %v1520_v14 = vmax.f32 %v1486_v45, 0.0 }
 0x28b   : > { %v1629_v11 = vsel %vm1621_vm10, %v5063_v47, %v5064_v36  ;;  %v1755_v26 = vpack.c.bf16 %v1739_v49, %v1739_v49  ;;  %v1489_v54 = vadd.f32 %v1488_v19, %v1440_v40  ;;  %v1521_v36 = vmax.f32 %v6436_v55, 0.0  ;;  %v1490_v40 = vpop.f32.mrf.mxu2  ;;  %v4446_v19 = vld [vmem:[%s7820_s3 + $0x50] sm:$0xf] }
 0x28c   : > { %v1661_v25 = vmax.f32 %v1507_v63, %v1629_v11  ;;  %5081 = vrot.lane.b32.xlu2 %v5080_v34, %s7839_s15  ;;  %1924 = vrot.lane.b32.xlu1 %v1860_v4, %s7837_s12  ;;  %v1197_v11 = vadd.f32 %v6220_v42, %v1148_v1  ;;  %v4463_v42 = vor.u32 %v4887_v6, %v4462_v37  ;;  %v4430_v6 = vld [vmem:[%s7820_s3 + $0x30] sm:$0xf] }
 0x28d   : > { %v1787_v56 = vunpack.c.l.b16 %v1755_v26  ;;  %5086 = vrot.lane.b32.xlu0 %v5085_v5, %s7839_s15 }
 0x28e   : > { %v1699_v61 = vrot.slane %v1661_v25, 1  ;;  %2386 = vmatpush.bf16.msra.mxu3 %v4463_v42  ;;  %v1246_v45 = vadd.f32 %v6175_v50, %v1197_v11 }
 0x28f   : > { %v6404_v51 = vpack.c.b16 %v1787_v56, %v1786_v38 }
 0x290   : > { %v1702_v13 = vsel %vm512_vm2, %v1699_v61, %v1701_v0  ;;  %v1700_v63 = vsel %vm512_vm2, %v1697_v17, %v1699_v61 }
 0x291   : > { %v1741_v8 = vmax.f32 %v1661_v25, %v1702_v13  ;;  %v1844_v18 = vrot.slane %v6404_v51, 3  ;;  %v1826_v10 = vrot.slane %v6404_v51, 2  ;;  %v1809_v15 = vrot.slane %v6404_v51, 1  ;;  %v4883_v13 = vld [vmem:[%s7820_s3 + $0x54] sm:$0xf0] }
 0x292   : > { %v1740_v43 = vmax.f32 %v1660_v44, %v1700_v63  ;;  %v6430_v44 = vadd.f32 %v6179_v52, %v6207_v33  ;;  %v2254_v63 = vunpack.c.l.b16 %v6480_v48 }
 0x293   : > { %v1757_v22 = vpack.c.bf16 %v1741_v8, %v1741_v8  ;;  %v1845_v38 = vsel %vm1840_vm11, %v1842_v16, %v1844_v18  ;;  %v1827_v17 = vsel %vm567_vm5, %v1824_v3, %v1826_v10  ;;  %v1810_v7 = vsel %vm512_vm2, %v1807_v58, %v1809_v15  ;;  %v1343_v3 = vpop.f32.mrf.mxu3  ;;  %v4526_v8 = vld [vmem:[%s7820_s3 + $0xf0] sm:$0xf] }
 0x294   : > { %1907 = vrot.lane.b32.xlu1 %v1845_v38, %s7833_s26  ;;  %1873 = vrot.lane.b32.xlu2 %v1810_v7, %s7840_s13  ;;  %v1756_v16 = vpack.c.bf16 %v1740_v43, %v1740_v43  ;;  %v1522_v58 = vmax.f32 %v1489_v54, 0.0  ;;  %v1519_v33 = vmax.f32 %v6430_v44, 0.0  ;;  %v1344_v46 = vadd.f32 %v1343_v3, %v6223_v9  ;;  %v4903_v43 = vld [vmem:[%s7820_s3 + $0xf4] sm:$0xf0] }
 0x295   : > { %1890 = vrot.lane.b32.xlu0 %v1827_v17, %s7835_s24  ;;  %v6439_v20 = vunpack.c.l.b16 %v1757_v22  ;;  %v4590_v22 = vld [vmem:[%s7820_s3 + $0x170] sm:$0xf]  ;;  %v4919_v38 = vld [vmem:[%s7820_s3 + $0x174] sm:$0xf0]  ;;  %s7858_s24 = smov 40  }
 0x296   : > { %v1788_v62 = vunpack.c.l.b16 %v1756_v16  ;;  %v5090_v4 = vpack.i.bf16 %v1520_v14, %v1519_v33  ;;  %v1393_v5 = vadd.f32 %v1392_v53, %v1344_v46  ;;  %v5095_v35 = vpack.i.bf16 %v1522_v58, %v1521_v36 }
 0x297   : > { %v2308_v16 = vpack.c.b16 %v2254_v63, %v2254_v63  ;;  %v4527_v14 = vor.u32 %v4903_v43, %v4526_v8 }
 0x298   : > { %v5072_v52 = vpop.permute.xlu0 %5071  ;;  %v6447_v28 = vpack.c.b16 %v6439_v20, %v1788_v62  ;;  %v1861_v34 = vpack.c.b16 %v1788_v62, %v1787_v56  ;;  %v1442_v29 = vadd.f32 %v1441_v27, %v1393_v5  ;;  %v4591_v62 = vor.u32 %v4919_v38, %v4590_v22  ;;  %v4582_v27 = vld [vmem:[%s7820_s3 + $0x160] sm:$0xf] }
 0x299   : > { %v5074_v47 = vunpack.i.h.bf16 %v5072_v52  ;;  %v5073_v49 = vunpack.i.l.bf16 %v5072_v52  ;;  %v4447_v52 = vor.u32 %v4883_v13, %v4446_v19  ;;  %v2381_v46 = vsel %vm2379_vm12, %v2308_v16, 0  ;;  %2435 = vmatpush.bf16.msra.mxu0 %v4527_v14  ;;  %v4422_v19 = vld [vmem:[%s7820_s3 + $0x20] sm:$0xf]  ;;  %v4574_v14 = vld [vmem:[%s7820_s3 + $0x150] sm:$0xf] }
 0x29a   : > { %v1828_v25 = vrot.slane %v6447_v28, 2  ;;  %v1811_v56 = vrot.slane %v6447_v28, 1  ;;  %v1491_v3 = vadd.f32 %v1490_v40, %v1442_v29  ;;  %2538 = vmatpush.bf16.msrb.mxu2 %v2381_v46  ;;  %2484 = vmatpush.bf16.msrb.mxu1 %v4591_v62  ;;  %v4879_v29 = vld [vmem:[%s7820_s3 + $0x34] sm:$0xf0]  ;;  %v4566_v46 = vld [vmem:[%s7820_s3 + $0x140] sm:$0xf] }
 0x29b   : > { %v1631_v9 = vsel %vm1621_vm10, %v5073_v49, %v5074_v47  ;;  %v4438_v47 = vld [vmem:[%s7820_s3 + $0x40] sm:$0xf]  ;;  %v6519_v49 = vadd.f32 %v6198_v12, %v1246_v45  ;;  %v4917_v12 = vld [vmem:[%s7820_s3 + $0x164] sm:$0xf0]  ;;  %v4431_v40 = vor.u32 %v4879_v29, %v4430_v6  ;;  %v4414_v45 = vld [vmem:[%s7820_s3 + $0x10] sm:$0xf] }
 0x29c   : > { %v6457_v26 = vmax.f32 %v1511_v21, %v1631_v9  ;;  %1926 = vrot.lane.b32.xlu1 %v1861_v34, %s7837_s12  ;;  %5091 = vrot.lane.b32.xlu2 %v5090_v4, %s7839_s15  ;;  %v4885_v21 = vld [vmem:[%s7820_s3 + $0x64] sm:$0xf0]  ;;  %v1812_v53 = vsel %vm512_vm2, %v1809_v15, %v1811_v56  ;;  %v1829_v15 = vsel %vm567_vm5, %v1826_v10, %v1828_v25  ;;  %v1524_v34 = vmax.f32 %v1491_v3, 0.0  ;;  %s7859_s12 = smov 44   ;;  %v4406_v3 = vld [vmem:[%s7820_s3] sm:$0xf] }
 0x29d   : > { %5096 = vrot.lane.b32.xlu0 %v5095_v35, %s7839_s15  ;;  %v4455_v61 = vor.u32 %v4885_v21, %v4454_v2  ;;  %v4901_v10 = vld [vmem:[%s7820_s3 + $0xe4] sm:$0xf0]  ;;  %v4583_v5 = vor.u32 %v4917_v12, %v4582_v27  ;;  %v1523_v37 = vmax.f32 %v6519_v49, 0.0  ;;  %v4915_v62 = vld [vmem:[%s7820_s3 + $0x154] sm:$0xf0]  ;;  %s7862_s15 = smov 84  }
 0x29e   : > { %v1703_v60 = vrot.slane %v6457_v26, 1  ;;  %v4519_v35 = vor.u32 %v4901_v10, %v4518_v59  ;;  %v4923_v27 = vld [vmem:[%s7820_s3 + $0x194] sm:$0xf0]  ;;  %v4502_v12 = vld [vmem:[%s7820_s3 + $0xc0] sm:$0xf] }
 0x29f   : > { %2387 = vmatpush.bf16.msra.mxu3 %v4455_v61  ;;  %v5100_v21 = vpack.i.bf16 %v1524_v34, %v1523_v37  ;;  %2485 = vmatpush.bf16.msrb.mxu1 %v4583_v5  ;;  %v4897_v10 = vld [vmem:[%s7820_s3 + $0xc4] sm:$0xf0]  ;;  %v4558_v5 = vld [vmem:[%s7820_s3 + $0x130] sm:$0xf]  ;;  %v4895_v29 = vld [vmem:[%s7820_s3 + $0xb4] sm:$0xf0] }
 0x2a0   : > { %v5077_v54 = vpop.permute.xlu1 %5076  ;;  %v1704_v50 = vsel %vm512_vm2, %v1701_v0, %v1703_v60  ;;  %v4881_v0 = vld [vmem:[%s7820_s3 + $0x44] sm:$0xf0]  ;;  %2436 = vmatpush.bf16.msra.mxu0 %v4519_v35  ;;  %v4503_v34 = vor.u32 %v4897_v10, %v4502_v12  ;;  %v4911_v35 = vld [vmem:[%s7820_s3 + $0x134] sm:$0xf0]  ;;  %v4494_v6 = vld [vmem:[%s7820_s3 + $0xb0] sm:$0xf] }
 0x2a1   : > { %v5079_v17 = vunpack.i.h.bf16 %v5077_v54  ;;  %v5078_v7 = vunpack.i.l.bf16 %v5077_v54  ;;  %v4439_v9 = vor.u32 %v4881_v0, %v4438_v47  ;;  %v4875_v54 = vld [vmem:[%s7820_s3 + $0x14] sm:$0xf0]  ;;  %v4913_v47 = vld [vmem:[%s7820_s3 + $0x144] sm:$0xf0] }
 0x2a2   : > { %v4415_v16 = vor.u32 %v4875_v54, %v4414_v45  ;;  %v4567_v59 = vor.u32 %v4913_v47, %v4566_v46  ;;  %v4478_v45 = vld [vmem:[%s7820_s3 + $0x90] sm:$0xf] }
 0x2a3   : > { %v1632_v58 = vsel %vm1621_vm10, %v5078_v7, %v5079_v17  ;;  %2388 = vmatpush.bf16.msra.mxu3 %v4447_v52  ;;  %v4899_v52 = vld [vmem:[%s7820_s3 + $0xd4] sm:$0xf0] }
 0x2a4   : > { %v6523_v1 = vmax.f32 %v1513_v39, %v1632_v58  ;;  %1875 = vrot.lane.b32.xlu2 %v1812_v53, %s7840_s13  ;;  %v1742_v39 = vmax.f32 %v6391_v23, %v1704_v50  ;;  %v1846_v23 = vrot.slane %v6447_v28, 3  ;;  %v4510_v58 = vld [vmem:[%s7820_s3 + $0xd0] sm:$0xf]  ;;  %v4575_v53 = vor.u32 %v4915_v62, %v4574_v14 }
 0x2a5   : > { %1892 = vrot.lane.b32.xlu0 %v1829_v15, %s7858_s24  ;;  %v4511_v0 = vor.u32 %v4899_v52, %v4510_v58  ;;  %v4606_v15 = vld [vmem:[%s7820_s3 + $0x190] sm:$0xf] }
 0x2a6   : > { %v1705_v4 = vrot.slane %v6523_v1, 1  ;;  %v1758_v42 = vpack.c.bf16 %v1742_v39, %v1742_v39  ;;  %v1847_v61 = vsel %vm1840_vm11, %v1844_v18, %v1846_v23  ;;  %2486 = vmatpush.bf16.msrb.mxu1 %v4575_v53  ;;  %v4607_v39 = vor.u32 %v4923_v27, %v4606_v15 }
 0x2a7   : > { %2389 = vmatpush.bf16.msra.mxu3 %v4439_v9  ;;  %2437 = vmatpush.bf16.msra.mxu0 %v4511_v0  ;;  %v4598_v9 = vld [vmem:[%s7820_s3 + $0x180] sm:$0xf] }
 0x2a8   : > { %v1706_v11 = vsel %vm512_vm2, %v1703_v60, %v1705_v4  ;;  %v1790_v13 = vunpack.c.l.b16 %v1758_v42  ;;  %2539 = vmatpush.bf16.msrb.mxu2 %v4607_v39 }
 0x2a9   : > { %v1743_v2 = vmax.f32 %v6457_v26, %v1706_v11  ;;  %v4877_v26 = vld [vmem:[%s7820_s3 + $0x24] sm:$0xf0]  ;;  %v4559_v11 = vor.u32 %v4911_v35, %v4558_v5 }
 0x2aa   : > { %v4423_v18 = vor.u32 %v4877_v26, %v4422_v19  ;;  %v1862_v17 = vpack.c.b16 %v1790_v13, %v6439_v20  ;;  %v4873_v20 = vld [vmem:[%s7820_s3 + $0x4] sm:$0xf0]  ;;  %2487 = vmatpush.bf16.msrb.mxu1 %v4567_v59 }
 0x2ab   : > { %v1759_v60 = vpack.c.bf16 %v1743_v2, %v1743_v2  ;;  %2390 = vmatpush.bf16.msra.mxu3 %v4431_v40  ;;  %2438 = vmatpush.bf16.msra.mxu0 %v4503_v34  ;;  %v4495_v2 = vor.u32 %v4895_v29, %v4494_v6  ;;  %v4893_v19 = vld [vmem:[%s7820_s3 + $0xa4] sm:$0xf0] }
 0x2ac   : > { %5101 = vrot.lane.b32.xlu2 %v5100_v21, %s7859_s12  ;;  %v4550_v21 = vld [vmem:[%s7820_s3 + $0x120] sm:$0xf]  ;;  %s5208_s12 = scalar_lea.hbm %s7828_s11, 8 }
 0x2ad   : > { %v6570_v63 = vunpack.c.l.b16 %v1759_v60  ;;  %1909 = vrot.lane.b32.xlu0 %v1847_v61, %s7860_s25  ;;  %v4909_v60 = vld [vmem:[%s7820_s3 + $0x124] sm:$0xf0]  ;;  %v4486_v61 = vld [vmem:[%s7820_s3 + $0xa0] sm:$0xf] }
 0x2ae   : > { %2488 = vmatpush.bf16.msrb.mxu1 %v4559_v11  ;;  %v4551_v40 = vor.u32 %v4909_v60, %v4550_v21  ;;  %v4487_v26 = vor.u32 %v4893_v19, %v4486_v61 }
 0x2af   : > { %v6574_v8 = vpack.c.b16 %v6570_v63, %v1790_v13  ;;  %2391 = vmatpush.bf16.msra.mxu3 %v4423_v18  ;;  %2439 = vmatpush.bf16.msra.mxu0 %v4495_v2  ;;  %v4542_v13 = vld [vmem:[%s7820_s3 + $0x110] sm:$0xf]  ;;  %v4907_v18 = vld [vmem:[%s7820_s3 + $0x114] sm:$0xf0] }
 0x2b0   : > { %v4543_v54 = vor.u32 %v4907_v18, %v4542_v13 }
 0x2b1   : > { %v1813_v43 = vrot.slane %v6574_v8, 1  ;;  %v1830_v22 = vrot.slane %v6574_v8, 2 }
 0x2b2   : > { %2489 = vmatpush.bf16.msrb.mxu1 %v4551_v40 }
 0x2b3   : > { %v1814_v38 = vsel %vm512_vm2, %v1811_v56, %v1813_v43  ;;  %v1831_v7 = vsel %vm567_vm5, %v1828_v25, %v1830_v22  ;;  %v1848_v56 = vrot.slane %v6574_v8, 3  ;;  %2392 = vmatpush.bf16.msra.mxu3 %v4415_v16  ;;  %v4407_v25 = vor.u32 %v4873_v20, %v4406_v3  ;;  %2440 = vmatpush.bf16.msra.mxu0 %v4487_v26  ;;  %v4470_v3 = vld [vmem:[%s7820_s3 + $0x80] sm:$0xf]  ;;  %v4889_v20 = vld [vmem:[%s7820_s3 + $0x84] sm:$0xf0] }
 0x2b4   : > { %1877 = vrot.lane.b32.xlu1 %v1814_v38, %s7840_s13  ;;  %1894 = vrot.lane.b32.xlu2 %v1831_v7, %s7858_s24  ;;  %v4891_v38 = vld [vmem:[%s7820_s3 + $0x94] sm:$0xf0]  ;;  %v4905_v7 = vld [vmem:[%s7820_s3 + $0x104] sm:$0xf0]  ;;  %s5261_s13 = smov 112  }
 0x2b5   : > { %1928 = vrot.lane.b32.xlu0 %v1862_v17, %s7861_s29  ;;  %v1849_v50 = vsel %vm1840_vm11, %v1846_v23, %v1848_v56  ;;  %v4921_v23 = vld [vmem:[%s7820_s3 + $0x184] sm:$0xf0]  ;;  %v4534_v17 = vld [vmem:[%s7820_s3 + $0x100] sm:$0xf]  ;;  %v4479_v16 = vor.u32 %v4891_v38, %v4478_v45 }
 0x2b6   : > { %v4599_v42 = vor.u32 %v4921_v23, %v4598_v9  ;;  %2490 = vmatpush.bf16.msrb.mxu1 %v4543_v54 }
 0x2b7   : > { %2393 = vmatpush.bf16.msra.mxu3 %v4407_v25  ;;  %v4535_v25 = vor.u32 %v4905_v7, %v4534_v17  ;;  %2441 = vmatpush.bf16.msra.mxu0 %v4479_v16 }
 0x2b8   : > { %2540 = vmatpush.bf16.msrb.mxu2 %v4599_v42 }
 0x2ba   : > { %2491 = vmatpush.bf16.msrb.mxu1 %v4535_v25 }
 0x2bc   : > { %1911 = vrot.lane.b32.xlu1 %v1849_v50, %s7860_s25  ;;  %v4471_v50 = vor.u32 %v4889_v20, %v4470_v3 }
 0x2be   : > { %2442 = vmatpush.bf16.msra.mxu0 %v4471_v50 }
 0x2de   : > { %v1872_v14 = vpop.permute.xlu2 %1871 }
 0x2df   : > { %v6695_v62 = vsel %vm1938_vm13, %v6349_v24, %v1872_v14 }
 0x2e0   : > { %2394 = vmatmul.bf16.vlgmr.msra.gmra.mxu3 %v6695_v62 }
 0x2e6   : > { %v5082_v58 = vpop.permute.xlu2 %5081 }
 0x2e7   : > { %v5084_v53 = vunpack.i.h.bf16 %v5082_v58  ;;  %v5083_v52 = vunpack.i.l.bf16 %v5082_v58 }
 0x2e9   : > { %v1633_v46 = vsel %vm1621_vm10, %v5083_v52, %v5084_v53 }
 0x2ea   : > { %v1665_v47 = vmax.f32 %v1515_v41, %v1633_v46 }
 0x2eb   : > { %v6701_v0 = vpop.permute.xlu1 %1922 }
 0x2ec   : > { %v1707_v15 = vrot.slane %v1665_v47, 1  ;;  %4612 = vmatmul.msk.bf16.vlgmr.msrb.gmra.mxu2 %vm2362_vm14, %v6701_v0 }
 0x2ee   : > { %v1874_v27 = vpop.permute.xlu2 %1873  ;;  %v1708_v24 = vsel %vm512_vm2, %v1705_v4, %v1707_v15 }
 0x2ef   : > { %v6710_v12 = vsel %vm1938_vm13, %v6351_v31, %v1874_v27  ;;  %v1744_v59 = vmax.f32 %v6523_v1, %v1708_v24 }
 0x2f0   : > { %2399 = vmatmul.bf16.gmra.mxu3 %v6710_v12 }
 0x2f1   : > { %v1760_v32 = vpack.c.bf16 %v1744_v59, %v1744_v59 }
 0x2f3   : > { %v1792_v41 = vunpack.c.l.b16 %v1760_v32 }
 0x2f5   : > { %v1863_v39 = vpack.c.b16 %v1792_v41, %v6570_v63 }
 0x2f6   : > { %v1906_v10 = vpop.permute.xlu1 %1905  ;;  %v5092_v34 = vpop.permute.xlu2 %5091 }
 0x2f7   : > { %v6717_v4 = vsel %vm2013_vm15, %v1906_v10, %v6701_v0  ;;  %v1889_v5 = vpop.permute.xlu0 %1888  ;;  %1930 = vrot.lane.b32.xlu1 %v1863_v39, %s7861_s29  ;;  %v5094_v2 = vunpack.i.h.bf16 %v5092_v34  ;;  %v5093_v21 = vunpack.i.l.bf16 %v5092_v34 }
 0x2f8   : > { %v1973_v31 = vsel %vm1971_vm0, %v1872_v14, %v1889_v5  ;;  %2492 = vmatmul.bf16.vlgmr.msrb.gmra.mxu1 %v6717_v4 }
 0x2f9   : > { %v6723_v1 = vsel %vm1988_vm1, %v1973_v31, %v1906_v10  ;;  %v1635_v45 = vsel %vm1621_vm10, %v5093_v21, %v5094_v2  ;;  %v2255_v2 = vunpack.c.h.b16 %v6480_v48 }
 0x2fa   : > { %2443 = vmatmul.bf16.vlgmr.msra.gmra.mxu0 %v6723_v1  ;;  %v1667_v7 = vmax.f32 %v1519_v33, %v1635_v45 }
 0x2fc   : > { %v1711_v50 = vrot.slane %v1667_v7, 1 }
 0x2fe   : > { %v6726_v63 = vpop.permute.xlu1 %1924  ;;  %v6728_v35 = vpop.permute.xlu2 %1875 }
 0x2ff   : > { %v5087_v9 = vpop.permute.xlu0 %5086  ;;  %4613 = vmatmul.msk.bf16.gmra.mxu2 %vm2362_vm14, %v6726_v63  ;;  %v6735_v11 = vsel %vm1938_vm13, %v6404_v51, %v6728_v35 }
 0x300   : > { %v5089_v23 = vunpack.i.h.bf16 %v5087_v9  ;;  %v5088_v6 = vunpack.i.l.bf16 %v5087_v9  ;;  %2404 = vmatmul.bf16.gmra.mxu3 %v6735_v11 }
 0x302   : > { %v1634_v29 = vsel %vm1621_vm10, %v5088_v6, %v5089_v23 }
 0x303   : > { %v1666_v42 = vmax.f32 %v1517_v57, %v1634_v29  ;;  %v4886_v29 = vld [vmem:[%s7820_s3 + $0x74] sm:$0xf] }
 0x305   : > { %v1709_v60 = vrot.slane %v1666_v42, 1 }
 0x306   : > { %v1908_v40 = vpop.permute.xlu1 %1907  ;;  %v5102_v61 = vpop.permute.xlu2 %5101 }
 0x307   : > { %v1710_v19 = vsel %vm512_vm2, %v1707_v15, %v1709_v60  ;;  %v1891_v26 = vpop.permute.xlu0 %1890  ;;  %v5104_v13 = vunpack.i.h.bf16 %v5102_v61  ;;  %v5103_v51 = vunpack.i.l.bf16 %v5102_v61  ;;  %v6744_v18 = vsel %vm2013_vm15, %v1908_v40, %v6726_v63  ;;  %v4918_v61 = vld [vmem:[%s7820_s3 + $0x174] sm:$0xf] }
 0x308   : > { %v1745_v54 = vmax.f32 %v1665_v47, %v1710_v19  ;;  %v1975_v30 = vsel %vm1971_vm0, %v1874_v27, %v1891_v26  ;;  %2497 = vmatmul.bf16.gmra.mxu1 %v6744_v18  ;;  %v1712_v49 = vsel %vm512_vm2, %v1709_v60, %v1711_v50  ;;  %v4592_v19 = vld [vmem:[%s7820_s3 + $0x178] sm:$0xf0]  ;;  %v2309_v26 = vpack.c.b16 %v2255_v2, %v2255_v2 }
 0x309   : > { %v1637_v57 = vsel %vm1621_vm10, %v5103_v51, %v5104_v13  ;;  %v6751_v38 = vsel %vm1988_vm1, %v1975_v30, %v1908_v40  ;;  %v1746_v24 = vmax.f32 %v1666_v42, %v1712_v49  ;;  %v4464_v42 = vld [vmem:[%s7820_s3 + $0x78] sm:$0xf0]  ;;  %v4884_v13 = vld [vmem:[%s7820_s3 + $0x64] sm:$0xf]  ;;  %v4456_v51 = vld [vmem:[%s7820_s3 + $0x68] sm:$0xf0] }
 0x30a   : > { %v1761_v17 = vpack.c.bf16 %v1745_v54, %v1745_v54  ;;  %2448 = vmatmul.bf16.gmra.mxu0 %v6751_v38  ;;  %v1669_v16 = vmax.f32 %v1523_v37, %v1637_v57  ;;  %v4467_v60 = vor.u32 %v4886_v29, %v4464_v42  ;;  %v4528_v40 = vld [vmem:[%s7820_s3 + $0xf8] sm:$0xf0]  ;;  %v4459_v49 = vor.u32 %v4884_v13, %v4456_v51 }
 0x30b   : > { %v1762_v55 = vpack.c.bf16 %v1746_v24, %v1746_v24  ;;  %v4576_v51 = vld [vmem:[%s7820_s3 + $0x158] sm:$0xf0] }
 0x30c   : > { %v6758_v3 = vunpack.c.l.b16 %v1761_v17  ;;  %v1715_v14 = vrot.slane %v1669_v16, 1  ;;  %2582 = vmatpush.bf16.msrb.mxu3 %v4467_v60  ;;  %v4595_v17 = vor.u32 %v4918_v61, %v4592_v19  ;;  %v4448_v60 = vld [vmem:[%s7820_s3 + $0x58] sm:$0xf0]  ;;  %v4898_v61 = vld [vmem:[%s7820_s3 + $0xd4] sm:$0xf] }
 0x30d   : > { %v1794_v23 = vunpack.c.l.b16 %v1762_v55  ;;  %v4512_v19 = vld [vmem:[%s7820_s3 + $0xd8] sm:$0xf0] }
 0x30e   : > { %v6760_v20 = vpop.permute.xlu1 %1926  ;;  %v6763_v25 = vpack.c.b16 %v6758_v3, %v1792_v41  ;;  %v1733_v27 = vsel %vm512_vm2, %v1715_v14, 0.0  ;;  %2680 = vmatpush.bf16.msra.mxu1 %v4595_v17  ;;  %v4515_v13 = vor.u32 %v4898_v61, %v4512_v19 }
 0x30f   : > { %v5097_v58 = vpop.permute.xlu0 %5096  ;;  %4614 = vmatmul.msk.bf16.gmra.mxu2 %vm2362_vm14, %v6760_v20  ;;  %v1749_v41 = vmax.f32 %v1669_v16, %v1733_v27  ;;  %v4520_v16 = vld [vmem:[%s7820_s3 + $0xe8] sm:$0xf0]  ;;  %v2384_v27 = vsel %vm2379_vm12, %v2309_v26, 0  ;;  %v4914_v26 = vld [vmem:[%s7820_s3 + $0x154] sm:$0xf] }
 0x310   : > { %v5099_v53 = vunpack.i.h.bf16 %v5097_v58  ;;  %v5098_v52 = vunpack.i.l.bf16 %v5097_v58  ;;  %v1832_v44 = vrot.slane %v6763_v25, 2  ;;  %v1815_v33 = vrot.slane %v6763_v25, 1  ;;  %2734 = vmatpush.bf16.msra.mxu2 %v2384_v27  ;;  %2583 = vmatpush.bf16.msrb.mxu3 %v4459_v49 }
 0x311   : > { %v1850_v32 = vrot.slane %v6763_v25, 3  ;;  %v1765_v9 = vpack.c.bf16 %v1749_v41, %v1749_v41 }
 0x312   : > { %v1636_v37 = vsel %vm1621_vm10, %v5098_v52, %v5099_v53  ;;  %v1833_v46 = vsel %vm567_vm5, %v1830_v22, %v1832_v44  ;;  %v1816_v47 = vsel %vm512_vm2, %v1813_v43, %v1815_v33  ;;  %v1864_v52 = vpack.c.b16 %v1794_v23, %v6758_v3 }
 0x313   : > { %v1668_v15 = vmax.f32 %v1521_v36, %v1636_v37  ;;  %1896 = vrot.lane.b32.xlu0 %v1833_v46, %s7858_s24  ;;  %1879 = vrot.lane.b32.xlu2 %v1816_v47, %s7862_s15  ;;  %v1851_v5 = vsel %vm1840_vm11, %v1848_v56, %v1850_v32  ;;  %v4902_v56 = vld [vmem:[%s7820_s3 + $0xf4] sm:$0xf]  ;;  %v6823_v45 = vunpack.c.l.b16 %v1765_v9  ;;  %v4916_v37 = vld [vmem:[%s7820_s3 + $0x164] sm:$0xf] }
 0x314   : > { %v4531_v57 = vor.u32 %v4902_v56, %v4528_v40  ;;  %v4584_v46 = vld [vmem:[%s7820_s3 + $0x168] sm:$0xf0] }
 0x315   : > { %v1713_v59 = vrot.slane %v1668_v15, 1  ;;  %v4587_v3 = vor.u32 %v4916_v37, %v4584_v46  ;;  %v1866_v42 = vpack.c.b16 %v6823_v45, %v6823_v45  ;;  %v4568_v37 = vld [vmem:[%s7820_s3 + $0x148] sm:$0xf0] }
 0x316   : > { %2631 = vmatpush.bf16.msrb.mxu0 %v4531_v57  ;;  %v4922_v57 = vld [vmem:[%s7820_s3 + $0x194] sm:$0xf] }
 0x317   : > { %v1716_v22 = vsel %vm512_vm2, %v1713_v59, %v1715_v14  ;;  %v1893_v39 = vpop.permute.xlu0 %1892  ;;  %v1714_v10 = vsel %vm512_vm2, %v1711_v50, %v1713_v59  ;;  %2681 = vmatpush.bf16.msra.mxu1 %v4587_v3  ;;  %v1869_v56 = vsel %vm1867_vm3, %v1866_v42, 0  ;;  %v4432_v3 = vld [vmem:[%s7820_s3 + $0x38] sm:$0xf0] }
 0x318   : > { %v1748_v43 = vmax.f32 %v1668_v15, %v1716_v22  ;;  %v1747_v34 = vmax.f32 %v1667_v7, %v1714_v10  ;;  %v1977_v54 = vsel %vm1971_vm0, %v6728_v35, %v1893_v39  ;;  %v4900_v7 = vld [vmem:[%s7820_s3 + $0xe4] sm:$0xf] }
 0x319   : > { %v4523_v24 = vor.u32 %v4900_v7, %v4520_v16  ;;  %v4608_v7 = vld [vmem:[%s7820_s3 + $0x198] sm:$0xf0] }
 0x31a   : > { %v1764_v36 = vpack.c.bf16 %v1748_v43, %v1748_v43  ;;  %v1763_v31 = vpack.c.bf16 %v1747_v34, %v1747_v34  ;;  %v1895_v34 = vpop.permute.xlu2 %1894  ;;  %v4611_v16 = vor.u32 %v4922_v57, %v4608_v7  ;;  %v4488_v57 = vld [vmem:[%s7820_s3 + $0xa8] sm:$0xf0] }
 0x31b   : > { %1913 = vrot.lane.b32.xlu2 %v1851_v5, %s7860_s25  ;;  %2632 = vmatpush.bf16.msrb.mxu0 %v4523_v24  ;;  %v4878_v24 = vld [vmem:[%s7820_s3 + $0x34] sm:$0xf] }
 0x31c   : > { %v6791_v6 = vunpack.c.l.b16 %v1763_v31  ;;  %v6803_v21 = vunpack.c.l.b16 %v1764_v36  ;;  %2735 = vmatpush.bf16.msra.mxu2 %v4611_v16 }
 0x31e   : > { %v6815_v48 = vpack.c.b16 %v6791_v6, %v1794_v23  ;;  %v6844_v53 = vpack.c.b16 %v6823_v45, %v6803_v21  ;;  %v1865_v29 = vpack.c.b16 %v6803_v21, %v6791_v6  ;;  %v4882_v21 = vld [vmem:[%s7820_s3 + $0x54] sm:$0xf]  ;;  %v4579_v45 = vor.u32 %v4914_v26, %v4576_v51 }
 0x31f   : > { %v1910_v30 = vpop.permute.xlu0 %1909  ;;  %v4451_v40 = vor.u32 %v4882_v21, %v4448_v60  ;;  %2633 = vmatpush.bf16.msrb.mxu0 %v4515_v13 }
 0x320   : > { %v6834_v50 = vsel %vm1988_vm1, %v1977_v54, %v1910_v30  ;;  %v6838_v14 = vsel %vm2013_vm15, %v1910_v30, %v6760_v20  ;;  %v1834_v35 = vrot.slane %v6815_v48, 2  ;;  %v1817_v58 = vrot.slane %v6815_v48, 1  ;;  %2682 = vmatpush.bf16.msra.mxu1 %v4579_v45  ;;  %v4880_v54 = vld [vmem:[%s7820_s3 + $0x44] sm:$0xf]  ;;  %v4440_v30 = vld [vmem:[%s7820_s3 + $0x48] sm:$0xf0] }
 0x321   : > { %2453 = vmatmul.bf16.gmra.mxu0 %v6834_v50  ;;  %2502 = vmatmul.bf16.gmra.mxu1 %v6838_v14  ;;  %v1836_v41 = vrot.slane %v6844_v53, 2  ;;  %v1852_v39 = vrot.slane %v6815_v48, 3  ;;  %v1854_v5 = vrot.slane %v6844_v53, 3  ;;  %v4443_v17 = vor.u32 %v4880_v54, %v4440_v30  ;;  %v4892_v30 = vld [vmem:[%s7820_s3 + $0xa4] sm:$0xf] }
 0x322   : > { %v1835_v47 = vsel %vm567_vm5, %v1832_v44, %v1834_v35  ;;  %v1818_v15 = vsel %vm512_vm2, %v1815_v33, %v1817_v58  ;;  %v1819_v44 = vrot.slane %v6844_v53, 1  ;;  %2584 = vmatpush.bf16.msrb.mxu3 %v4451_v40 }
 0x323   : > { %1932 = vrot.lane.b32.xlu2 %v1864_v52, %s7861_s29  ;;  %1898 = vrot.lane.b32.xlu1 %v1835_v47, %s7858_s24  ;;  %v1837_v10 = vsel %vm567_vm5, %v1834_v35, %v1836_v41  ;;  %v1855_v23 = vsel %vm1840_vm11, %v1852_v39, %v1854_v5  ;;  %v1858_v2 = vsel %vm1840_vm11, %v1854_v5, 0  ;;  %v1839_v6 = vsel %vm567_vm5, %v1836_v41, 0  ;;  %v4896_v35 = vld [vmem:[%s7820_s3 + $0xc4] sm:$0xf] }
 0x324   : > { %1881 = vrot.lane.b32.xlu0 %v1818_v15, %s7862_s15  ;;  %v1820_v43 = vsel %vm512_vm2, %v1817_v58, %v1819_v44  ;;  %v4504_v58 = vld [vmem:[%s7820_s3 + $0xc8] sm:$0xf0]  ;;  %v4912_v52 = vld [vmem:[%s7820_s3 + $0x144] sm:$0xf] }
 0x325   : > { %v4507_v49 = vor.u32 %v4896_v35, %v4504_v58  ;;  %v4571_v46 = vor.u32 %v4912_v52, %v4568_v37  ;;  %v4491_v35 = vor.u32 %v4892_v30, %v4488_v57  ;;  %v4552_v58 = vld [vmem:[%s7820_s3 + $0x128] sm:$0xf0]  ;;  %v4920_v52 = vld [vmem:[%s7820_s3 + $0x184] sm:$0xf] }
 0x326   : > { %v1878_v59 = vpop.permute.xlu1 %1877  ;;  %2585 = vmatpush.bf16.msrb.mxu3 %v4443_v17  ;;  %v4908_v17 = vld [vmem:[%s7820_s3 + $0x124] sm:$0xf] }
 0x327   : > { %v6863_v33 = vpop.permute.xlu0 %1928  ;;  %v6867_v22 = vsel %vm1938_vm13, %v6447_v28, %v1878_v59  ;;  %v1853_v28 = vsel %vm1840_vm11, %v1850_v32, %v1852_v39  ;;  %v1979_v55 = vsel %vm1971_vm0, %v1878_v59, %v1895_v34  ;;  %v1822_v32 = vsel %vm512_vm2, %v1819_v44, 0  ;;  %2634 = vmatpush.bf16.msrb.mxu0 %v4507_v49  ;;  %2683 = vmatpush.bf16.msra.mxu1 %v4571_v46  ;;  %v6966_v59 = vld [vmem:[%s7821_s4] sm:$0x3]  ;;  %v4894_v39 = vld [vmem:[%s7820_s3 + $0xb4] sm:$0xf] }
 0x328   : > { %4615 = vmatmul.msk.bf16.gmra.mxu2 %vm2362_vm14, %v6863_v33  ;;  %2409 = vmatmul.bf16.gmra.mxu3 %v6867_v22  ;;  %v4435_v44 = vor.u32 %v4878_v24, %v4432_v3  ;;  %v4600_v49 = vld [vmem:[%s7820_s3 + $0x188] sm:$0xf0]  ;;  %v4555_v24 = vor.u32 %v4908_v17, %v4552_v58  ;;  %v4872_v17 = vld [vmem:[%s7820_s3 + $0x4] sm:$0xf]  ;;  %vm2906_vm2 = vcmask 392192  }
 0x329   : > { %v4603_v3 = vor.u32 %v4920_v52, %v4600_v49 }
 0x32a   : > { %2586 = vmatpush.bf16.msrb.mxu3 %v4435_v44 }
 0x32b   : > { %1900 = vrot.lane.b32.xlu2 %v1837_v10, %s7858_s24  ;;  %1883 = vrot.lane.b32.xlu1 %v1820_v43, %s7862_s15  ;;  %v4496_v10 = vld [vmem:[%s7820_s3 + $0xb8] sm:$0xf0]  ;;  %v4910_v43 = vld [vmem:[%s7820_s3 + $0x134] sm:$0xf] }
 0x32c   : > { %1915 = vrot.lane.b32.xlu0 %v1853_v28, %s7860_s25  ;;  %2736 = vmatpush.bf16.msra.mxu2 %v4603_v3 }
 0x32e   : > { %v1912_v36 = vpop.permute.xlu1 %1911 }
 0x32f   : > { %v6884_v31 = vsel %vm1988_vm1, %v1979_v55, %v1912_v36  ;;  %v6888_v9 = vsel %vm2013_vm15, %v1912_v36, %v6863_v33  ;;  %v4499_v55 = vor.u32 %v4894_v39, %v4496_v10  ;;  %v4560_v36 = vld [vmem:[%s7820_s3 + $0x138] sm:$0xf0] }
 0x331   : > { %2458 = vmatmul.bf16.gmra.mxu0 %v6884_v31  ;;  %2507 = vmatmul.bf16.gmra.mxu1 %v6888_v9 }
 0x332   : > { %2635 = vmatpush.bf16.msrb.mxu0 %v4499_v55 }
 0x333   : > { %1885 = vrot.lane.b32.xlu2 %v1822_v32, %s7862_s15  ;;  %1917 = vrot.lane.b32.xlu1 %v1855_v23, %s7860_s25  ;;  %v4563_v23 = vor.u32 %v4910_v43, %v4560_v36  ;;  %v4874_v43 = vld [vmem:[%s7820_s3 + $0x14] sm:$0xf] }
 0x334   : > { %1934 = vrot.lane.b32.xlu0 %v1865_v29, %s7861_s29 }
 0x335   : > { %2684 = vmatpush.bf16.msra.mxu1 %v4563_v23  ;;  %v4480_v23 = vld [vmem:[%s7820_s3 + $0x98] sm:$0xf0] }
 0x336   : > { %2636 = vmatpush.bf16.msrb.mxu0 %v4491_v35 }
 0x339   : > { %2685 = vmatpush.bf16.msra.mxu1 %v4555_v24 }
 0x33b   : > { %1919 = vrot.lane.b32.xlu2 %v1858_v2, %s7860_s25  ;;  %1936 = vrot.lane.b32.xlu1 %v1869_v56, %s7861_s29  ;;  %v4876_v2 = vld [vmem:[%s7820_s3 + $0x24] sm:$0xf]  ;;  %v4424_v56 = vld [vmem:[%s7820_s3 + $0x28] sm:$0xf0] }
 0x33c   : > { %1902 = vrot.lane.b32.xlu0 %v1839_v6, %s7858_s24  ;;  %v4427_v60 = vor.u32 %v4876_v2, %v4424_v56 }
 0x33e   : > { %2587 = vmatpush.bf16.msrb.mxu3 %v4427_v60 }
 0x363   : > { %v2395_v41 = vpop.f32.mrf.mxu3 }
 0x369   : > { %v6949_v47 = vpop.permute.xlu1 %1930 }
 0x36a   : > { %4616 = vmatmul.msk.bf16.gmra.mxu2 %vm2362_vm14, %v6949_v47 }
 0x36b   : > { %v6996_v6 = vpop.f32.mrf.mxu3 }
 0x36d   : > { %v1880_v15 = vpop.permute.xlu2 %1879 }
 0x36e   : > { %v6955_v27 = vsel %vm1938_vm13, %v6574_v8, %v1880_v15  ;;  %v6970_v8 = vperm.slane %v6966_v59, 0 }
 0x36f   : > { %2414 = vmatmul.bf16.gmra.mxu3 %v6955_v27  ;;  %v2542_v21 = vpop.f32.mrf.mxu2 }
 0x370   : > { %v2396_v5 = vadd.f32 %v2395_v41, %v6970_v8 }
 0x373   : > { %v2400_v51 = vpop.f32.mrf.mxu3 }
 0x374   : > { %v2401_v7 = vadd.f32 %v2400_v51, %v6970_v8 }
 0x375   : > { %v1914_v28 = vpop.permute.xlu2 %1913  ;;  %v2493_v34 = vpop.f32.mrf.mxu1 }
 0x376   : > { %v6987_v32 = vsel %vm2013_vm15, %v1914_v28, %v6949_v47 }
 0x377   : > { %v2444_v29 = vpop.f32.mrf.mxu0  ;;  %2512 = vmatmul.bf16.gmra.mxu1 %v6987_v32  ;;  %v7008_v45 = vpop.f32.mrf.mxu2 }
 0x378   : > { %v2445_v42 = vadd.f32 %v2444_v29, %v2396_v5  ;;  %v4890_v5 = vld [vmem:[%s7820_s3 + $0x94] sm:$0xf] }
 0x379   : > { %v4906_v29 = vld [vmem:[%s7820_s3 + $0x114] sm:$0xf]  ;;  %v4483_v56 = vor.u32 %v4890_v5, %v4480_v23 }
 0x37a   : > { %v2494_v40 = vadd.f32 %v2493_v34, %v2445_v42 }
 0x37b   : > { %v7042_v55 = vpop.f32.mrf.mxu3  ;;  %2637 = vmatpush.bf16.msrb.mxu0 %v4483_v56 }
 0x37c   : > { %v6998_v61 = vadd.f32 %v2542_v21, %v2494_v40  ;;  %v4544_v21 = vld [vmem:[%s7820_s3 + $0x118] sm:$0xf0] }
 0x37d   : > { %v7000_v19 = vpop.permute.xlu2 %1932  ;;  %v7004_v26 = vpop.f32.mrf.mxu1  ;;  %v4547_v51 = vor.u32 %v4906_v29, %v4544_v21 }
 0x37e   : > { %4617 = vmatmul.msk.bf16.gmra.mxu2 %vm2362_vm14, %v7000_v19 }
 0x37f   : > { %v7006_v13 = vpop.f32.mrf.mxu0  ;;  %2686 = vmatpush.bf16.msra.mxu1 %v4547_v51 }
 0x382   : > { %v2547_v39 = vpop.f32.mrf.mxu2 }
 0x383   : > { %v2405_v30 = vpop.f32.mrf.mxu3 }
 0x384   : > { %v2406_v57 = vadd.f32 %v2405_v30, %v6970_v8 }
 0x385   : > { %v1897_v54 = vpop.permute.xlu0 %1896  ;;  %v2498_v41 = vpop.f32.mrf.mxu1 }
 0x386   : > { %v1981_v16 = vsel %vm1971_vm0, %v1880_v15, %v1897_v54 }
 0x387   : > { %v2449_v37 = vpop.f32.mrf.mxu0  ;;  %v7031_v46 = vsel %vm1988_vm1, %v1981_v16, %v1914_v28  ;;  %v4416_v28 = vld [vmem:[%s7820_s3 + $0x18] sm:$0xf0] }
 0x388   : > { %v2450_v15 = vadd.f32 %v2449_v37, %v2401_v7  ;;  %2463 = vmatmul.bf16.gmra.mxu0 %v7031_v46  ;;  %v4419_v34 = vor.u32 %v4874_v43, %v4416_v28  ;;  %v4408_v7 = vld [vmem:[%s7820_s3 + $0x8] sm:$0xf0] }
 0x389   : > { %v4411_v58 = vor.u32 %v4872_v17, %v4408_v7  ;;  %v4536_v28 = vld [vmem:[%s7820_s3 + $0x108] sm:$0xf0] }
 0x38a   : > { %v2499_v44 = vadd.f32 %v2498_v41, %v2450_v15  ;;  %2588 = vmatpush.bf16.msrb.mxu3 %v4419_v34  ;;  %v7044_v36 = vpop.f32.mrf.mxu2  ;;  %v4888_v15 = vld [vmem:[%s7820_s3 + $0x84] sm:$0xf]  ;;  %v4472_v41 = vld [vmem:[%s7820_s3 + $0x88] sm:$0xf0] }
 0x38b   : > { %v4475_v43 = vor.u32 %v4888_v15, %v4472_v41  ;;  %v7096_v23 = vpop.f32.mrf.mxu3 }
 0x38c   : > { %v7034_v10 = vadd.f32 %v2547_v39, %v2499_v44  ;;  %v4904_v44 = vld [vmem:[%s7820_s3 + $0x104] sm:$0xf] }
 0x38d   : > { %v7060_v60 = vpop.f32.mrf.mxu1  ;;  %v4539_v5 = vor.u32 %v4904_v44, %v4536_v28  ;;  %2638 = vmatpush.bf16.msrb.mxu0 %v4475_v43 }
 0x38e   : > { %2589 = vmatpush.bf16.msrb.mxu3 %v4411_v58 }
 0x38f   : > { %v7055_v42 = vpop.f32.mrf.mxu0  ;;  %2687 = vmatpush.bf16.msra.mxu1 %v4539_v5 }
 0x392   : > { %v2552_v3 = vpop.f32.mrf.mxu2 }
 0x395   : > { %v1899_v54 = vpop.permute.xlu1 %1898 }
 0x396   : > { %v1882_v2 = vpop.permute.xlu0 %1881 }
 0x397   : > { %v7064_v40 = vsel %vm1938_vm13, %v6763_v25, %v1882_v2  ;;  %v1983_v25 = vsel %vm1971_vm0, %v1882_v2, %v1899_v54  ;;  %v1901_v54 = vpop.permute.xlu2 %1900 }
 0x398   : > { %2419 = vmatmul.bf16.gmra.mxu3 %v7064_v40 }
 0x39a   : > { %v7113_v30 = vpop.f32.mrf.mxu2 }
 0x39d   : > { %v1884_v34 = vpop.permute.xlu1 %1883 }
 0x39e   : > { %v1916_v16 = vpop.permute.xlu0 %1915  ;;  %v2454_v35 = vpop.f32.mrf.mxu0  ;;  %v7110_v51 = vsel %vm1938_vm13, %v6815_v48, %v1884_v34 }
 0x39f   : > { %v2455_v52 = vadd.f32 %v2454_v35, %v2406_v57  ;;  %v2503_v49 = vpop.f32.mrf.mxu1  ;;  %v7076_v37 = vsel %vm1988_vm1, %v1983_v25, %v1916_v16  ;;  %v7080_v24 = vsel %vm2013_vm15, %v1916_v16, %v7000_v19  ;;  %v1985_v25 = vsel %vm1971_vm0, %v1884_v34, %v1901_v54  ;;  %v1886_v41 = vpop.permute.xlu2 %1885 }
 0x3a0   : > { %2468 = vmatmul.bf16.gmra.mxu0 %v7076_v37  ;;  %2517 = vmatmul.bf16.gmra.mxu1 %v7080_v24 }
 0x3a1   : > { %v2504_v39 = vadd.f32 %v2503_v49, %v2455_v52 }
 0x3a3   : > { %v7098_v29 = vadd.f32 %v2552_v3, %v2504_v39  ;;  %v7134_v39 = vsel %vm1938_vm13, %v6844_v53, %v1886_v41 }
 0x3a5   : > { %v1918_v17 = vpop.permute.xlu1 %1917 }
 0x3a6   : > { %v7100_v2 = vpop.permute.xlu0 %1934  ;;  %v7102_v56 = vpop.f32.mrf.mxu0  ;;  %v7118_v58 = vsel %vm1988_vm1, %v1985_v25, %v1918_v17 }
 0x3a7   : > { %v7104_v21 = vpop.f32.mrf.mxu1  ;;  %4618 = vmatmul.msk.bf16.gmra.mxu2 %vm2362_vm14, %v7100_v2  ;;  %v7122_v48 = vsel %vm2013_vm15, %v1918_v17, %v7100_v2  ;;  %v1920_v34 = vpop.permute.xlu2 %1919 }
 0x3a8   : > { %2424 = vmatmul.bf16.gmra.mxu3 %v7110_v51 }
 0x3ab   : > { %v2410_v57 = vpop.f32.mrf.mxu3  ;;  %v2557_v3 = vpop.f32.mrf.mxu2 }
 0x3ac   : > { %v2411_v7 = vadd.f32 %v2410_v57, %v6970_v8 }
 0x3ad   : > { %v7128_v44 = vpop.permute.xlu1 %1936 }
 0x3ae   : > { %v2459_v16 = vpop.f32.mrf.mxu0  ;;  %v1903_v43 = vpop.permute.xlu0 %1902  ;;  %v7143_v54 = vsel %vm2013_vm15, %v1920_v34, %v7128_v44 }
 0x3af   : > { %v2460_v35 = vadd.f32 %v2459_v16, %v2411_v7  ;;  %v2508_v52 = vpop.f32.mrf.mxu1  ;;  %v1987_v28 = vsel %vm1971_vm0, %v1886_v41, %v1903_v43 }
 0x3b0   : > { %2473 = vmatmul.bf16.gmra.mxu0 %v7118_v58  ;;  %2522 = vmatmul.bf16.gmra.mxu1 %v7122_v48  ;;  %v7139_v5 = vsel %vm1988_vm1, %v1987_v28, %v1920_v34 }
 0x3b1   : > { %v2509_v49 = vadd.f32 %v2508_v52, %v2460_v35 }
 0x3b3   : > { %v7126_v15 = vadd.f32 %v2557_v3, %v2509_v49 }
 0x3b7   : > { %4619 = vmatmul.msk.bf16.gmra.mxu2 %vm2362_vm14, %v7128_v44 }
 0x3b8   : > { %2429 = vmatmul.bf16.gmra.mxu3 %v7134_v39 }
 0x3c0   : > { %2478 = vmatmul.bf16.gmra.mxu0 %v7139_v5  ;;  %2527 = vmatmul.bf16.gmra.mxu1 %v7143_v54 }
 0x3c7   : > { %4620 = vmatmul.msk.bf16.vlgmr.msra.gmra.mxu2 %vm2362_vm14, %v6701_v0  ;;  %v7167_v0 = vpop.f32.mrf.mxu0 }
 0x3c8   : > { %2590 = vmatmul.bf16.vlgmr.msrb.gmra.mxu3 %v6695_v62  ;;  %v7165_v62 = vpop.f32.mrf.mxu3 }
 0x3d0   : > { %2639 = vmatmul.bf16.vlgmr.msrb.gmra.mxu0 %v6723_v1  ;;  %2688 = vmatmul.bf16.vlgmr.msra.gmra.mxu1 %v6717_v4  ;;  %v7171_v4 = vpop.f32.mrf.mxu1 }
 0x3d7   : > { %4621 = vmatmul.msk.bf16.gmra.mxu2 %vm2362_vm14, %v6726_v63 }
 0x3d8   : > { %2595 = vmatmul.bf16.gmra.mxu3 %v6710_v12  ;;  %v7169_v12 = vpop.f32.mrf.mxu2 }
 0x3e0   : > { %2644 = vmatmul.bf16.gmra.mxu0 %v6751_v38  ;;  %2693 = vmatmul.bf16.gmra.mxu1 %v6744_v18 }
 0x3e7   : > { %4622 = vmatmul.msk.bf16.gmra.mxu2 %vm2362_vm14, %v6760_v20 }
 0x3e8   : > { %2600 = vmatmul.bf16.gmra.mxu3 %v6735_v11 }
 0x3ed   : > { %v2562_v18 = vpop.f32.mrf.mxu2 }
 0x3f0   : > { %2649 = vmatmul.bf16.gmra.mxu0 %v6834_v50  ;;  %2698 = vmatmul.bf16.gmra.mxu1 %v6838_v14 }
 0x3f2   : > { %v2415_v1 = vpop.f32.mrf.mxu3 }
 0x3f3   : > { %v2416_v63 = vadd.f32 %v2415_v1, %v6970_v8 }
 0x3f4   : > { %v2513_v20 = vpop.f32.mrf.mxu1 }
 0x3f5   : > { %v7181_v53 = vpop.f32.mrf.mxu2 }
 0x3f7   : > { %4623 = vmatmul.msk.bf16.gmra.mxu2 %vm2362_vm14, %v6863_v33 }
 0x3f8   : > { %2605 = vmatmul.bf16.gmra.mxu3 %v6867_v22 }
 0x3fa   : > { %v7185_v33 = vpop.f32.mrf.mxu3 }
 0x3fc   : > { %v7187_v22 = vpop.f32.mrf.mxu1 }
 0x400   : > { %2654 = vmatmul.bf16.gmra.mxu0 %v6884_v31  ;;  %2703 = vmatmul.bf16.gmra.mxu1 %v6888_v9 }
 0x401   : > { %v2567_v9 = vpop.f32.mrf.mxu2 }
 0x405   : > { %v2464_v11 = vpop.f32.mrf.mxu0 }
 0x406   : > { %v2465_v38 = vadd.f32 %v2464_v11, %v2416_v63 }
 0x407   : > { %4624 = vmatmul.msk.bf16.gmra.mxu2 %vm2362_vm14, %v6949_v47 }
 0x408   : > { %v2514_v50 = vadd.f32 %v2513_v20, %v2465_v38  ;;  %2610 = vmatmul.bf16.gmra.mxu3 %v6955_v27 }
 0x40a   : > { %v7179_v14 = vadd.f32 %v2562_v18, %v2514_v50 }
 0x40d   : > { %v7189_v31 = vpop.f32.mrf.mxu0 }
 0x410   : > { %2659 = vmatmul.bf16.gmra.mxu0 %v7031_v46  ;;  %2708 = vmatmul.bf16.gmra.mxu1 %v6987_v32  ;;  %v7197_v32 = vpop.f32.mrf.mxu2 }
 0x417   : > { %4625 = vmatmul.msk.bf16.gmra.mxu2 %vm2362_vm14, %v7000_v19 }
 0x418   : > { %2615 = vmatmul.bf16.gmra.mxu3 %v7064_v40 }
 0x41b   : > { %v2420_v47 = vpop.f32.mrf.mxu3 }
 0x41c   : > { %v2421_v27 = vadd.f32 %v2420_v47, %v6970_v8  ;;  %v7240_v47 = vperm.slane %v6966_v59, 1 }
 0x41d   : > { %v2469_v57 = vpop.f32.mrf.mxu0  ;;  %v2518_v17 = vpop.f32.mrf.mxu1 }
 0x41e   : > { %v2470_v46 = vadd.f32 %v2469_v57, %v2421_v27 }
 0x420   : > { %v2519_v7 = vadd.f32 %v2518_v17, %v2470_v46  ;;  %2664 = vmatmul.bf16.gmra.mxu0 %v7076_v37  ;;  %2713 = vmatmul.bf16.gmra.mxu1 %v7080_v24 }
 0x422   : > { %v7199_v25 = vadd.f32 %v2567_v9, %v2519_v7 }
 0x423   : > { %v7201_v16 = vpop.f32.mrf.mxu3 }
 0x425   : > { %v7203_v19 = vpop.f32.mrf.mxu0  ;;  %v7205_v40 = vpop.f32.mrf.mxu1 }
 0x427   : > { %4626 = vmatmul.msk.bf16.gmra.mxu2 %vm2362_vm14, %v7100_v2 }
 0x428   : > { %2620 = vmatmul.bf16.gmra.mxu3 %v7110_v51 }
 0x42a   : > { %v2572_v35 = vpop.f32.mrf.mxu2 }
 0x42b   : > { %v2425_v52 = vpop.f32.mrf.mxu3 }
 0x42c   : > { %v2426_v37 = vadd.f32 %v2425_v52, %v6970_v8 }
 0x42d   : > { %v2474_v24 = vpop.f32.mrf.mxu0  ;;  %v2523_v49 = vpop.f32.mrf.mxu1 }
 0x42e   : > { %v2475_v3 = vadd.f32 %v2474_v24, %v2426_v37 }
 0x430   : > { %v2524_v41 = vadd.f32 %v2523_v49, %v2475_v3  ;;  %2669 = vmatmul.bf16.gmra.mxu0 %v7118_v58  ;;  %2718 = vmatmul.bf16.gmra.mxu1 %v7122_v48  ;;  %v2778_v3 = vmax.f32 %v6998_v61, 0.0 }
 0x432   : > { %v7213_v43 = vadd.f32 %v2572_v35, %v2524_v41  ;;  %v7215_v28 = vpop.f32.mrf.mxu2 }
 0x433   : > { %v7217_v34 = vpop.f32.mrf.mxu3 }
 0x435   : > { %v7219_v2 = vpop.f32.mrf.mxu0  ;;  %v7221_v51 = vpop.f32.mrf.mxu1 }
 0x437   : > { %4627 = vmatmul.msk.bf16.gmra.mxu2 %vm2362_vm14, %v7128_v44 }
 0x438   : > { %2625 = vmatmul.bf16.gmra.mxu3 %v7134_v39 }
 0x43a   : > { %v2577_v1 = vpop.f32.mrf.mxu2 }
 0x43b   : > { %v2430_v63 = vpop.f32.mrf.mxu3 }
 0x43c   : > { %v2431_v58 = vadd.f32 %v2430_v63, %v6970_v8 }
 0x43d   : > { %v2479_v48 = vpop.f32.mrf.mxu0  ;;  %v2528_v11 = vpop.f32.mrf.mxu1 }
 0x43e   : > { %v2480_v18 = vadd.f32 %v2479_v48, %v2431_v58 }
 0x440   : > { %v2529_v38 = vadd.f32 %v2528_v11, %v2480_v18  ;;  %2674 = vmatmul.bf16.gmra.mxu0 %v7139_v5  ;;  %2723 = vmatmul.bf16.gmra.mxu1 %v7143_v54  ;;  %v2398_v54 = vadd.f32 %v6996_v6, %v6970_v8 }
 0x442   : > { %v7229_v20 = vadd.f32 %v2577_v1, %v2529_v38  ;;  %v7231_v50 = vpop.f32.mrf.mxu2  ;;  %v2447_v35 = vadd.f32 %v7006_v13, %v2398_v54  ;;  %v2403_v54 = vadd.f32 %v7042_v55, %v6970_v8 }
 0x443   : > { %v7233_v9 = vpop.f32.mrf.mxu3 }
 0x444   : > { %v2496_v59 = vadd.f32 %v7004_v26, %v2447_v35  ;;  %v2452_v35 = vadd.f32 %v7055_v42, %v2403_v54  ;;  %v2408_v54 = vadd.f32 %v7096_v23, %v6970_v8 }
 0x445   : > { %v7235_v44 = vpop.f32.mrf.mxu0  ;;  %v7237_v39 = vpop.f32.mrf.mxu1 }
 0x446   : > { %v7252_v11 = vadd.f32 %v7008_v45, %v2496_v59  ;;  %v2782_v59 = vmax.f32 %v7034_v10, 0.0 }
 0x44a   : > { %v2738_v27 = vpop.f32.mrf.mxu2 }
 0x44b   : > { %v2591_v57 = vpop.f32.mrf.mxu3 }
 0x44c   : > { %v2592_v17 = vadd.f32 %v2591_v57, %v7240_v47 }
 0x44d   : > { %v2640_v5 = vpop.f32.mrf.mxu0  ;;  %v2689_v46 = vpop.f32.mrf.mxu1 }
 0x44e   : > { %v2641_v7 = vadd.f32 %v2640_v5, %v2592_v17  ;;  %v2780_v17 = vmax.f32 %v7252_v11, 0.0 }
 0x450   : > { %v2690_v52 = vadd.f32 %v2689_v46, %v2641_v7 }
 0x452   : > { %v2739_v37 = vadd.f32 %v2738_v27, %v2690_v52  ;;  %v2740_v24 = vpop.f32.mrf.mxu2 }
 0x453   : > { %v2593_v49 = vpop.f32.mrf.mxu3 }
 0x454   : > { %v2779_v41 = vmax.f32 %v2739_v37, 0.0  ;;  %v2594_v1 = vadd.f32 %v2593_v49, %v7240_v47 }
 0x455   : > { %v2642_v63 = vpop.f32.mrf.mxu0  ;;  %v2691_v58 = vpop.f32.mrf.mxu1 }
 0x456   : > { %v2643_v48 = vadd.f32 %v2642_v63, %v2594_v1  ;;  %v5105_v6 = vpack.i.bf16 %v2779_v41, %v2778_v3  ;;  %v2501_v41 = vadd.f32 %v7060_v60, %v2452_v35 }
 0x458   : > { %v2692_v13 = vadd.f32 %v2691_v58, %v2643_v48  ;;  %5106 = vrot.lane.b32.xlu0 %v5105_v6, %s5260_s23  ;;  %v7269_v42 = vadd.f32 %v7044_v36, %v2501_v41 }
 0x45a   : > { %v2741_v18 = vadd.f32 %v2740_v24, %v2692_v13  ;;  %v2743_v38 = vpop.f32.mrf.mxu2 }
 0x45b   : > { %v2596_v27 = vpop.f32.mrf.mxu3 }
 0x45c   : > { %v2781_v26 = vmax.f32 %v2741_v18, 0.0  ;;  %v2597_v57 = vadd.f32 %v2596_v27, %v7240_v47 }
 0x45d   : > { %v2645_v5 = vpop.f32.mrf.mxu0  ;;  %v2694_v46 = vpop.f32.mrf.mxu1 }
 0x45e   : > { %v2646_v7 = vadd.f32 %v2645_v5, %v2597_v57  ;;  %v5110_v45 = vpack.i.bf16 %v2781_v26, %v2780_v17  ;;  %v2784_v57 = vmax.f32 %v7269_v42, 0.0 }
 0x460   : > { %v2695_v52 = vadd.f32 %v2694_v46, %v2646_v7  ;;  %5111 = vrot.lane.b32.xlu1 %v5110_v45, %s5260_s23  ;;  %v2457_v45 = vadd.f32 %v7102_v56, %v2408_v54 }
 0x462   : > { %v2744_v37 = vadd.f32 %v2743_v38, %v2695_v52  ;;  %v2745_v24 = vpop.f32.mrf.mxu2  ;;  %v2506_v41 = vadd.f32 %v7104_v21, %v2457_v45 }
 0x463   : > { %v2598_v49 = vpop.f32.mrf.mxu3 }
 0x464   : > { %v2783_v1 = vmax.f32 %v2744_v37, 0.0  ;;  %v2599_v63 = vadd.f32 %v2598_v49, %v7240_v47  ;;  %v2786_v49 = vmax.f32 %v7098_v29, 0.0  ;;  %v7286_v56 = vadd.f32 %v7113_v30, %v2506_v41 }
 0x465   : > { %v2647_v55 = vpop.f32.mrf.mxu0  ;;  %v2696_v58 = vpop.f32.mrf.mxu1 }
 0x466   : > { %v2648_v48 = vadd.f32 %v2647_v55, %v2599_v63  ;;  %v5115_v6 = vpack.i.bf16 %v2783_v1, %v2782_v59  ;;  %v2788_v21 = vmax.f32 %v7286_v56, 0.0 }
 0x468   : > { %v2697_v13 = vadd.f32 %v2696_v58, %v2648_v48  ;;  %5116 = vrot.lane.b32.xlu2 %v5115_v6, %s5260_s23 }
 0x46a   : > { %v2746_v18 = vadd.f32 %v2745_v24, %v2697_v13  ;;  %v2748_v38 = vpop.f32.mrf.mxu2 }
 0x46b   : > { %v2601_v27 = vpop.f32.mrf.mxu3 }
 0x46c   : > { %v2785_v26 = vmax.f32 %v2746_v18, 0.0  ;;  %v2602_v60 = vadd.f32 %v2601_v27, %v7240_v47  ;;  %v2413_v27 = vadd.f32 %v7165_v62, %v6970_v8 }
 0x46d   : > { %v2650_v5 = vpop.f32.mrf.mxu0  ;;  %v2699_v46 = vpop.f32.mrf.mxu1 }
 0x46e   : > { %v2651_v7 = vadd.f32 %v2650_v5, %v2602_v60  ;;  %v5120_v36 = vpack.i.bf16 %v2785_v26, %v2784_v57 }
 0x470   : > { %v2700_v35 = vadd.f32 %v2699_v46, %v2651_v7  ;;  %5121 = vrot.lane.b32.xlu0 %v5120_v36, %s5260_s23  ;;  %v2462_v7 = vadd.f32 %v7167_v0, %v2413_v27 }
 0x472   : > { %v2749_v52 = vadd.f32 %v2748_v38, %v2700_v35  ;;  %v2750_v37 = vpop.f32.mrf.mxu2  ;;  %v2511_v62 = vadd.f32 %v7171_v4, %v2462_v7 }
 0x473   : > { %v2603_v24 = vpop.f32.mrf.mxu3 }
 0x474   : > { %v2787_v1 = vmax.f32 %v2749_v52, 0.0  ;;  %v2604_v63 = vadd.f32 %v2603_v24, %v7240_v47  ;;  %v7303_v0 = vadd.f32 %v7169_v12, %v2511_v62 }
 0x475   : > { %v2652_v23 = vpop.f32.mrf.mxu0  ;;  %v2701_v55 = vpop.f32.mrf.mxu1 }
 0x476   : > { %v2653_v58 = vadd.f32 %v2652_v23, %v2604_v63  ;;  %v5125_v48 = vpack.i.bf16 %v2787_v1, %v2786_v49  ;;  %v2792_v4 = vmax.f32 %v7303_v0, 0.0 }
 0x478   : > { %v2702_v6 = vadd.f32 %v2701_v55, %v2653_v58  ;;  %5126 = vrot.lane.b32.xlu1 %v5125_v48, %s5260_s23 }
 0x47a   : > { %v2751_v13 = vadd.f32 %v2750_v37, %v2702_v6  ;;  %v2753_v18 = vpop.f32.mrf.mxu2  ;;  %v2790_v37 = vmax.f32 %v7126_v15, 0.0 }
 0x47b   : > { %v2606_v38 = vpop.f32.mrf.mxu3 }
 0x47c   : > { %v2789_v26 = vmax.f32 %v2751_v13, 0.0  ;;  %v2607_v60 = vadd.f32 %v2606_v38, %v7240_v47 }
 0x47d   : > { %v2655_v5 = vpop.f32.mrf.mxu0  ;;  %v2704_v46 = vpop.f32.mrf.mxu1 }
 0x47e   : > { %v2656_v54 = vadd.f32 %v2655_v5, %v2607_v60  ;;  %v5130_v30 = vpack.i.bf16 %v2789_v26, %v2788_v21  ;;  %v2418_v60 = vadd.f32 %v7185_v33, %v6970_v8 }
 0x480   : > { %v2705_v36 = vadd.f32 %v2704_v46, %v2656_v54  ;;  %5131 = vrot.lane.b32.xlu2 %v5130_v30, %s5260_s23  ;;  %v2467_v46 = vadd.f32 %v7189_v31, %v2418_v60 }
 0x482   : > { %v2754_v45 = vadd.f32 %v2753_v18, %v2705_v36  ;;  %v2755_v35 = vpop.f32.mrf.mxu2  ;;  %v2794_v36 = vmax.f32 %v7179_v14, 0.0 }
 0x483   : > { %v2608_v52 = vpop.f32.mrf.mxu3 }
 0x484   : > { %v2791_v24 = vmax.f32 %v2754_v45, 0.0  ;;  %v2609_v41 = vadd.f32 %v2608_v52, %v7240_v47  ;;  %v2516_v45 = vadd.f32 %v7187_v22, %v2467_v46  ;;  %v2423_v22 = vadd.f32 %v7201_v16, %v6970_v8 }
 0x485   : > { %v2657_v1 = vpop.f32.mrf.mxu0  ;;  %v2706_v63 = vpop.f32.mrf.mxu1  ;;  %v2798_v16 = vmax.f32 %v7199_v25, 0.0 }
 0x486   : > { %v2658_v23 = vadd.f32 %v2657_v1, %v2609_v41  ;;  %v5135_v55 = vpack.i.bf16 %v2791_v24, %v2790_v37  ;;  %v7320_v31 = vadd.f32 %v7181_v53, %v2516_v45 }
 0x488   : > { %v2707_v58 = vadd.f32 %v2706_v63, %v2658_v23  ;;  %5136 = vrot.lane.b32.xlu0 %v5135_v55, %s5260_s23 }
 0x48a   : > { %v2756_v48 = vadd.f32 %v2755_v35, %v2707_v58  ;;  %v2758_v6 = vpop.f32.mrf.mxu2 }
 0x48b   : > { %v2611_v13 = vpop.f32.mrf.mxu3 }
 0x48c   : > { %v2793_v18 = vmax.f32 %v2756_v48, 0.0  ;;  %v2612_v38 = vadd.f32 %v2611_v13, %v7240_v47 }
 0x48d   : > { %v2660_v27 = vpop.f32.mrf.mxu0  ;;  %v2709_v26 = vpop.f32.mrf.mxu1 }
 0x48e   : > { %v2661_v5 = vadd.f32 %v2660_v27, %v2612_v38  ;;  %v5140_v12 = vpack.i.bf16 %v2793_v18, %v2792_v4 }
 0x490   : > { %v2710_v54 = vadd.f32 %v2709_v26, %v2661_v5  ;;  %5141 = vrot.lane.b32.xlu1 %v5140_v12, %s5260_s23  ;;  %v2472_v26 = vadd.f32 %v7203_v19, %v2423_v22 }
 0x492   : > { %v2759_v30 = vadd.f32 %v2758_v6, %v2710_v54  ;;  %v2760_v52 = vpop.f32.mrf.mxu2  ;;  %v2796_v6 = vmax.f32 %v7320_v31, 0.0  ;;  %v2521_v46 = vadd.f32 %v7205_v40, %v2472_v26 }
 0x493   : > { %v2613_v7 = vpop.f32.mrf.mxu3 }
 0x494   : > { %v2795_v35 = vmax.f32 %v2759_v30, 0.0  ;;  %v2614_v62 = vadd.f32 %v2613_v7, %v7240_v47  ;;  %v7337_v19 = vadd.f32 %v7197_v32, %v2521_v46 }
 0x495   : > { %v2662_v33 = vpop.f32.mrf.mxu0  ;;  %v2711_v24 = vpop.f32.mrf.mxu1 }
 0x496   : > { %v2663_v41 = vadd.f32 %v2662_v33, %v2614_v62  ;;  %v5145_v1 = vpack.i.bf16 %v2795_v35, %v2794_v36 }
 0x498   : > { %v2712_v63 = vadd.f32 %v2711_v24, %v2663_v41  ;;  %5146 = vrot.lane.b32.xlu2 %v5145_v1, %s5260_s23  ;;  %v2800_v41 = vmax.f32 %v7337_v19, 0.0 }
 0x49a   : > { %v2761_v23 = vadd.f32 %v2760_v52, %v2712_v63  ;;  %v2763_v27 = vpop.f32.mrf.mxu2 }
 0x49b   : > { %v2616_v55 = vpop.f32.mrf.mxu3 }
 0x49c   : > { %v2797_v58 = vmax.f32 %v2761_v23, 0.0  ;;  %v2617_v48 = vadd.f32 %v2616_v55, %v7240_v47 }
 0x49d   : > { %v2665_v13 = vpop.f32.mrf.mxu0  ;;  %v2714_v18 = vpop.f32.mrf.mxu1 }
 0x49e   : > { %v2666_v38 = vadd.f32 %v2665_v13, %v2617_v48  ;;  %v5150_v53 = vpack.i.bf16 %v2797_v58, %v2796_v6 }
 0x4a0   : > { %v2715_v60 = vadd.f32 %v2714_v18, %v2666_v38  ;;  %5151 = vrot.lane.b32.xlu0 %v5150_v53, %s5260_s23 }
 0x4a2   : > { %v2764_v5 = vadd.f32 %v2763_v27, %v2715_v60  ;;  %v2765_v33 = vpop.f32.mrf.mxu2 }
 0x4a3   : > { %v2618_v12 = vpop.f32.mrf.mxu3 }
 0x4a4   : > { %v2799_v54 = vmax.f32 %v2764_v5, 0.0  ;;  %v2619_v30 = vadd.f32 %v2618_v12, %v7240_v47 }
 0x4a5   : > { %v2667_v7 = vpop.f32.mrf.mxu0  ;;  %v2716_v52 = vpop.f32.mrf.mxu1 }
 0x4a6   : > { %v2668_v45 = vadd.f32 %v2667_v7, %v2619_v30  ;;  %v5155_v35 = vpack.i.bf16 %v2799_v54, %v2798_v16 }
 0x4a8   : > { %v2717_v62 = vadd.f32 %v2716_v52, %v2668_v45  ;;  %5156 = vrot.lane.b32.xlu1 %v5155_v35, %s5260_s23 }
 0x4aa   : > { %v2766_v24 = vadd.f32 %v2765_v33, %v2717_v62 }
 0x4ab   : > { %v2621_v26 = vpop.f32.mrf.mxu3 }
 0x4ac   : > { %v2801_v40 = vmax.f32 %v2766_v24, 0.0 }
 0x4ad   : > { %v2670_v46 = vpop.f32.mrf.mxu0 }
 0x4ae   : > { %v5160_v1 = vpack.i.bf16 %v2801_v40, %v2800_v41 }
 0x4b0   : > { %5161 = vrot.lane.b32.xlu2 %v5160_v1, %s5260_s23 }
 0x4b3   : > { %v2623_v24 = vpop.f32.mrf.mxu3 }
 0x4c2   : > { %v5117_v23 = vpop.permute.xlu2 %5116 }
 0x4c3   : > { %v5119_v58 = vunpack.i.h.bf16 %v5117_v23  ;;  %v5118_v32 = vunpack.i.l.bf16 %v5117_v23 }
 0x4c5   : > { %v2909_v18 = vsel %vm2906_vm2, %v5118_v32, %v5119_v58  ;;  %v2672_v58 = vpop.f32.mrf.mxu0 }
 0x4c6   : > { %v2941_v60 = vmax.f32 %v2782_v59, %v2909_v18  ;;  %v2719_v59 = vpop.f32.mrf.mxu1 }
 0x4c8   : > { %v2974_v54 = vrot.slane %v2941_v60, 2 }
 0x4ca   : > { %v5107_v48 = vpop.permute.xlu0 %5106 }
 0x4cb   : > { %v5109_v38 = vunpack.i.h.bf16 %v5107_v48  ;;  %v5108_v53 = vunpack.i.l.bf16 %v5107_v48 }
 0x4cd   : > { %v2907_v5 = vsel %vm2906_vm2, %v5108_v53, %v5109_v38  ;;  %v2624_v38 = vadd.f32 %v2623_v24, %v7240_v47 }
 0x4ce   : > { %v2939_v45 = vmax.f32 %v2778_v3, %v2907_v5 }
 0x4d0   : > { %v2971_v40 = vrot.slane %v2939_v45, 2 }
 0x4d2   : > { %v5112_v63 = vpop.permute.xlu1 %5111 }
 0x4d3   : > { %v5114_v55 = vunpack.i.h.bf16 %v5112_v63  ;;  %v5113_v22 = vunpack.i.l.bf16 %v5112_v63 }
 0x4d5   : > { %v2908_v13 = vsel %vm2906_vm2, %v5113_v22, %v5114_v55  ;;  %v2768_v22 = vpop.f32.mrf.mxu2 }
 0x4d6   : > { %v2940_v27 = vmax.f32 %v2780_v17, %v2908_v13 }
 0x4d8   : > { %v2972_v12 = vrot.slane %v2940_v27, 2 }
 0x4da   : > { %v5132_v30 = vpop.permute.xlu2 %5131  ;;  %v2975_v62 = vsel %vm567_vm5, %v2972_v12, %v2974_v54  ;;  %v2973_v61 = vsel %vm567_vm5, %v2971_v40, %v2972_v12  ;;  %v2428_v12 = vadd.f32 %v7217_v34, %v6970_v8 }
 0x4db   : > { %v5134_v11 = vunpack.i.h.bf16 %v5132_v30  ;;  %v5133_v17 = vunpack.i.l.bf16 %v5132_v30  ;;  %v3020_v1 = vmax.f32 %v2940_v27, %v2975_v62 }
 0x4dc   : > { %v2477_v34 = vadd.f32 %v7219_v2, %v2428_v12 }
 0x4dd   : > { %v2912_v23 = vsel %vm2906_vm2, %v5133_v17, %v5134_v11  ;;  %v3036_v18 = vpack.c.bf16 %v3020_v1, %v3020_v1  ;;  %v2770_v24 = vpop.f32.mrf.mxu2  ;;  %v2675_v1 = vpop.f32.mrf.mxu0 }
 0x4de   : > { %v7362_v42 = vmax.f32 %v2788_v21, %v2912_v23 }
 0x4e0   : > { %v2980_v56 = vrot.slane %v7362_v42, 2 }
 0x4e2   : > { %v5122_v7 = vpop.permute.xlu0 %5121 }
 0x4e3   : > { %v5124_v35 = vunpack.i.h.bf16 %v5122_v7  ;;  %v5123_v52 = vunpack.i.l.bf16 %v5122_v7 }
 0x4e5   : > { %v2910_v33 = vsel %vm2906_vm2, %v5123_v52, %v5124_v35  ;;  %v2721_v35 = vpop.f32.mrf.mxu1  ;;  %v2626_v52 = vpop.f32.mrf.mxu3 }
 0x4e6   : > { %v2942_v10 = vmax.f32 %v2784_v57, %v2910_v33  ;;  %v3019_v57 = vmax.f32 %v2939_v45, %v2973_v61  ;;  %v2673_v45 = vadd.f32 %v2672_v58, %v2624_v38  ;;  %v2627_v15 = vadd.f32 %v2626_v52, %v7240_v47 }
 0x4e8   : > { %v2976_v63 = vrot.slane %v2942_v10, 2  ;;  %v3035_v7 = vpack.c.bf16 %v3019_v57, %v3019_v57  ;;  %v2722_v40 = vadd.f32 %v2721_v35, %v2673_v45 }
 0x4ea   : > { %v5127_v3 = vpop.permute.xlu1 %5126  ;;  %v2977_v55 = vsel %vm567_vm5, %v2974_v54, %v2976_v63  ;;  %v2622_v54 = vadd.f32 %v2621_v26, %v7240_v47  ;;  %v3067_v17 = vunpack.c.l.b16 %v3035_v7  ;;  %v2771_v2 = vadd.f32 %v2770_v24, %v2722_v40 }
 0x4eb   : > { %v5129_v32 = vunpack.i.h.bf16 %v5127_v3  ;;  %v5128_v48 = vunpack.i.l.bf16 %v5127_v3  ;;  %v3021_v13 = vmax.f32 %v2941_v60, %v2977_v55  ;;  %v3068_v60 = vunpack.c.l.b16 %v3036_v18 }
 0x4ec   : > { %v2671_v11 = vadd.f32 %v2670_v46, %v2622_v54  ;;  %v2526_v3 = vadd.f32 %v7221_v51, %v2477_v34  ;;  %v2433_v34 = vadd.f32 %v7233_v9, %v6970_v8 }
 0x4ed   : > { %v2911_v53 = vsel %vm2906_vm2, %v5128_v48, %v5129_v32  ;;  %v3037_v27 = vpack.c.bf16 %v3021_v13, %v3021_v13  ;;  %v7381_v32 = vpack.c.b16 %v3068_v60, %v3067_v17  ;;  %v2724_v38 = vpop.f32.mrf.mxu1  ;;  %v2628_v51 = vpop.f32.mrf.mxu3 }
 0x4ee   : > { %v2943_v5 = vmax.f32 %v2786_v49, %v2911_v53  ;;  %v2720_v55 = vadd.f32 %v2719_v59, %v2671_v11  ;;  %v7389_v18 = vadd.f32 %v7215_v28, %v2526_v3  ;;  %v2482_v9 = vadd.f32 %v7235_v44, %v2433_v34 }
 0x4ef   : > { %v3069_v30 = vunpack.c.l.b16 %v3037_v27  ;;  %v3091_v12 = vrot.slane %v7381_v32, 2 }
 0x4f0   : > { %v2978_v21 = vrot.slane %v2943_v5, 2  ;;  %v2769_v57 = vadd.f32 %v2768_v22, %v2720_v55  ;;  %v2629_v22 = vadd.f32 %v2628_v51, %v7240_v47  ;;  %v2676_v47 = vadd.f32 %v2675_v1, %v2627_v15 }
 0x4f1   : > { %v3108_v62 = vpack.c.b16 %v3069_v30, %v3068_v60  ;;  %v2805_v60 = vmax.f32 %v2771_v2, 0.0  ;;  %v2531_v44 = vadd.f32 %v7237_v39, %v2482_v9  ;;  %v4930_v9 = vld [vmem:[%s7822_s5 + $0x30] sm:$0xff] }
 0x4f2   : > { %v2981_v29 = vsel %vm567_vm5, %v2978_v21, %v2980_v56  ;;  %v2979_v49 = vsel %vm567_vm5, %v2976_v63, %v2978_v21  ;;  %v5147_v46 = vpop.permute.xlu2 %5146  ;;  %v2803_v11 = vmax.f32 %v2769_v57, 0.0 }
 0x4f3   : > { %v3023_v26 = vmax.f32 %v2943_v5, %v2981_v29  ;;  %3153 = vrot.lane.b32.xlu1 %v3108_v62, %s7856_s14  ;;  %v3022_v33 = vmax.f32 %v2942_v10, %v2979_v49  ;;  %v3118_v27 = vrot.slane %v3108_v62, 2  ;;  %v5148_v21 = vunpack.i.l.bf16 %v5147_v46  ;;  %v2773_v62 = vpop.f32.mrf.mxu2  ;;  %v2677_v29 = vpop.f32.mrf.mxu0 }
 0x4f4   : > { %v2804_v49 = vmax.f32 %v7389_v18, 0.0  ;;  %v2678_v17 = vadd.f32 %v2677_v29, %v2629_v22 }
 0x4f5   : > { %v3039_v23 = vpack.c.bf16 %v3023_v26, %v3023_v26  ;;  %v3038_v61 = vpack.c.bf16 %v3022_v33, %v3022_v33  ;;  %v2726_v55 = vpop.f32.mrf.mxu1 }
 0x4f6   : > { %v5170_v24 = vpack.i.bf16 %v2805_v60, %v2804_v49 }
 0x4f7   : > { %v7379_v58 = vunpack.c.l.b16 %v3039_v23  ;;  %v3070_v63 = vunpack.c.l.b16 %v3038_v61  ;;  %v2802_v23 = vmax.f32 %v7213_v43, 0.0 }
 0x4f9   : > { %v7383_v13 = vpack.c.b16 %v3070_v63, %v3069_v30  ;;  %v7386_v10 = vpack.c.b16 %v7379_v58, %v3070_v63  ;;  %v5149_v30 = vunpack.i.h.bf16 %v5147_v46  ;;  %v2727_v46 = vadd.f32 %v2726_v55, %v2678_v17 }
 0x4fa   : > { %v5137_v48 = vpop.permute.xlu0 %5136 }
 0x4fb   : > { %v5139_v59 = vunpack.i.h.bf16 %v5137_v48  ;;  %v5138_v53 = vunpack.i.l.bf16 %v5137_v48  ;;  %3187 = vrot.lane.b32.xlu2 %v7383_v13, %s7855_s16  ;;  %v3119_v5 = vrot.slane %v7386_v10, 2  ;;  %v3092_v54 = vrot.slane %v7383_v13, 2  ;;  %v2775_v57 = vpop.f32.mrf.mxu2 }
 0x4fc   : > { %v2915_v26 = vsel %vm2906_vm2, %v5148_v21, %v5149_v30 }
 0x4fd   : > { %v2913_v28 = vsel %vm2906_vm2, %v5138_v53, %v5139_v59  ;;  %v3120_v45 = vsel %vm567_vm5, %v3118_v27, %v3119_v5  ;;  %v3093_v35 = vsel %vm567_vm5, %v3091_v12, %v3092_v54  ;;  %v7421_v52 = vmax.f32 %v2794_v36, %v2915_v26 }
 0x4fe   : > { %v2945_v7 = vmax.f32 %v2790_v37, %v2913_v28  ;;  %3170 = vrot.lane.b32.xlu1 %v3120_v45, %s5261_s13  ;;  %3136 = vrot.lane.b32.xlu0 %v3093_v35, %s7861_s29  ;;  %v2725_v36 = vadd.f32 %v2724_v38, %v2676_v47  ;;  %v2776_v59 = vadd.f32 %v2775_v57, %v2727_v46 }
 0x4ff   : > { %v2986_v1 = vrot.slane %v7421_v52, 2  ;;  %v7441_v12 = vadd.f32 %v7231_v50, %v2531_v44  ;;  %v2806_v50 = vmax.f32 %v7229_v20, 0.0 }
 0x500   : > { %v2982_v37 = vrot.slane %v2945_v7, 2  ;;  %v2774_v39 = vadd.f32 %v2773_v62, %v2725_v36  ;;  %v2809_v30 = vmax.f32 %v2776_v59, 0.0 }
 0x501   : > { %v2808_v22 = vmax.f32 %v7441_v12, 0.0 }
 0x502   : > { %v5142_v33 = vpop.permute.xlu1 %5141  ;;  %v2983_v40 = vsel %vm567_vm5, %v2980_v56, %v2982_v37  ;;  %v5165_v56 = vpack.i.bf16 %v2803_v11, %v2802_v23 }
 0x503   : > { %v5144_v61 = vunpack.i.h.bf16 %v5142_v33  ;;  %v5143_v3 = vunpack.i.l.bf16 %v5142_v33  ;;  %v3024_v8 = vmax.f32 %v7362_v42, %v2983_v40  ;;  %5171 = vrot.lane.b32.xlu2 %v5170_v24, %s5260_s23  ;;  %v5180_v29 = vpack.i.bf16 %v2809_v30, %v2808_v22 }
 0x505   : > { %v2914_v63 = vsel %vm2906_vm2, %v5143_v3, %v5144_v61  ;;  %v3040_v2 = vpack.c.bf16 %v3024_v8, %v3024_v8  ;;  %v4931_v3 = vld [vmem:[%s7822_s5 + $0x38] sm:$0xff]  ;;  %v4948_v8 = vld [vmem:[%s7822_s5 + $0xc0] sm:$0xff] }
 0x506   : > { %v2946_v42 = vmax.f32 %v2792_v4, %v2914_v63  ;;  %3155 = vrot.lane.b32.xlu1 %v7386_v10, %s7856_s14  ;;  %5166 = vrot.lane.b32.xlu0 %v5165_v56, %s5260_s23  ;;  %v4939_v10 = vld [vmem:[%s7822_s5 + $0x78] sm:$0xff] }
 0x507   : > { %v3072_v14 = vunpack.c.l.b16 %v3040_v2  ;;  %3521 = vmatpush.bf16.msra.mxu3 %v4931_v3  ;;  %3675 = vmatpush.bf16.msrb.mxu2 %v4948_v8  ;;  %v4925_v3 = vld [vmem:[%s7822_s5 + $0x8] sm:$0xff] }
 0x508   : > { %v2984_v48 = vrot.slane %v2946_v42, 2  ;;  %3570 = vmatpush.bf16.msra.mxu0 %v4939_v10  ;;  %v4941_v8 = vld [vmem:[%s7822_s5 + $0x88] sm:$0xff] }
 0x509   : > { %v7435_v51 = vpack.c.b16 %v3072_v14, %v7379_v58  ;;  %v4933_v10 = vld [vmem:[%s7822_s5 + $0x48] sm:$0xff] }
 0x50a   : > { %v2985_v0 = vsel %vm567_vm5, %v2982_v37, %v2984_v48  ;;  %v2987_v4 = vsel %vm567_vm5, %v2984_v48, %v2986_v1  ;;  %v5162_v35 = vpop.permute.xlu2 %5161 }
 0x50b   : > { %v3025_v53 = vmax.f32 %v2945_v7, %v2985_v0  ;;  %v3094_v27 = vrot.slane %v7435_v51, 2  ;;  %3189 = vrot.lane.b32.xlu2 %v7435_v51, %s7855_s16  ;;  %v3026_v38 = vmax.f32 %v2946_v42, %v2987_v4  ;;  %v2807_v7 = vmax.f32 %v2774_v39, 0.0  ;;  %3522 = vmatpush.bf16.msra.mxu3 %v4930_v9 }
 0x50c   : > { %v5164_v26 = vunpack.i.h.bf16 %v5162_v35  ;;  %v5163_v17 = vunpack.i.l.bf16 %v5162_v35  ;;  %v4938_v35 = vld [vmem:[%s7822_s5 + $0x70] sm:$0xff] }
 0x50d   : > { %v3041_v60 = vpack.c.bf16 %v3025_v53, %v3025_v53  ;;  %v3095_v58 = vsel %vm567_vm5, %v3092_v54, %v3094_v27  ;;  %v3042_v21 = vpack.c.bf16 %v3026_v38, %v3026_v38  ;;  %v5175_v11 = vpack.i.bf16 %v2807_v7, %v2806_v50  ;;  %3571 = vmatpush.bf16.msra.mxu0 %v4938_v35 }
 0x50e   : > { %3138 = vrot.lane.b32.xlu0 %v3095_v58, %s7861_s29 }
 0x50f   : > { %v3073_v28 = vunpack.c.l.b16 %v3041_v60  ;;  %v3074_v34 = vunpack.c.l.b16 %v3042_v21 }
 0x511   : > { %v3110_v45 = vpack.c.b16 %v3073_v28, %v3072_v14  ;;  %v7461_v61 = vpack.c.b16 %v3074_v34, %v3073_v28 }
 0x512   : > { %v5152_v62 = vpop.permute.xlu0 %5151 }
 0x513   : > { %v5154_v15 = vunpack.i.h.bf16 %v5152_v62  ;;  %v5153_v37 = vunpack.i.l.bf16 %v5152_v62  ;;  %v3121_v54 = vrot.slane %v3110_v45, 2  ;;  %5181 = vrot.lane.b32.xlu2 %v5180_v29, %s5260_s23  ;;  %v3096_v55 = vrot.slane %v7461_v61, 2  ;;  %v4929_v62 = vld [vmem:[%s7822_s5 + $0x28] sm:$0xff] }
 0x514   : > { %v4945_v29 = vld [vmem:[%s7822_s5 + $0xa8] sm:$0xff]  ;;  %3523 = vmatpush.bf16.msra.mxu3 %v4929_v62 }
 0x515   : > { %v2916_v33 = vsel %vm2906_vm2, %v5153_v37, %v5154_v15  ;;  %v3122_v24 = vsel %vm567_vm5, %v3119_v5, %v3121_v54  ;;  %v2918_v5 = vsel %vm2906_vm2, %v5163_v17, %v5164_v26  ;;  %v4928_v15 = vld [vmem:[%s7822_s5 + $0x20] sm:$0xff]  ;;  %v4943_v26 = vld [vmem:[%s7822_s5 + $0x98] sm:$0xff] }
 0x516   : > { %v2948_v40 = vmax.f32 %v2796_v6, %v2916_v33  ;;  %3172 = vrot.lane.b32.xlu1 %v3122_v24, %s5261_s13  ;;  %5176 = vrot.lane.b32.xlu0 %v5175_v11, %s5260_s23  ;;  %v4947_v6 = vld [vmem:[%s7822_s5 + $0xb8] sm:$0xff]  ;;  %v7485_v42 = vmax.f32 %v2800_v41, %v2918_v5  ;;  %v4944_v37 = vld [vmem:[%s7822_s5 + $0xa0] sm:$0xff] }
 0x517   : > { %3619 = vmatpush.bf16.msrb.mxu1 %v4947_v6  ;;  %v4927_v11 = vld [vmem:[%s7822_s5 + $0x18] sm:$0xff]  ;;  %v4926_v33 = vld [vmem:[%s7822_s5 + $0x10] sm:$0xff]  ;;  %v4940_v6 = vld [vmem:[%s7822_s5 + $0x80] sm:$0xff] }
 0x518   : > { %v2988_v31 = vrot.slane %v2948_v40, 2  ;;  %v2992_v19 = vrot.slane %v7485_v42, 2  ;;  %3524 = vmatpush.bf16.msra.mxu3 %v4928_v15  ;;  %v4935_v17 = vld [vmem:[%s7822_s5 + $0x58] sm:$0xff]  ;;  %v4942_v24 = vld [vmem:[%s7822_s5 + $0x90] sm:$0xff]  ;;  %v4932_v5 = vld [vmem:[%s7822_s5 + $0x40] sm:$0xff] }
 0x51a   : > { %v5157_v47 = vpop.permute.xlu1 %5156  ;;  %v2989_v63 = vsel %vm567_vm5, %v2986_v1, %v2988_v31  ;;  %v3097_v1 = vsel %vm567_vm5, %v3094_v27, %v3096_v55 }
 0x51b   : > { %v5159_v56 = vunpack.i.h.bf16 %v5157_v47  ;;  %v5158_v2 = vunpack.i.l.bf16 %v5157_v47  ;;  %v3027_v46 = vmax.f32 %v7421_v52, %v2989_v63  ;;  %3191 = vrot.lane.b32.xlu2 %v7461_v61, %s7855_s16 }
 0x51c   : > { %3525 = vmatpush.bf16.msra.mxu3 %v4927_v11 }
 0x51d   : > { %v2917_v14 = vsel %vm2906_vm2, %v5158_v2, %v5159_v56  ;;  %v3043_v44 = vpack.c.bf16 %v3027_v46, %v3027_v46 }
 0x51e   : > { %v2949_v36 = vmax.f32 %v2798_v16, %v2917_v14  ;;  %3157 = vrot.lane.b32.xlu1 %v3110_v45, %s7856_s14  ;;  %3140 = vrot.lane.b32.xlu0 %v3097_v1, %s7861_s29  ;;  %v4946_v45 = vld [vmem:[%s7822_s5 + $0xb0] sm:$0xff] }
 0x51f   : > { %v3075_v52 = vunpack.c.l.b16 %v3043_v44  ;;  %3620 = vmatpush.bf16.msrb.mxu1 %v4946_v45 }
 0x520   : > { %v2990_v41 = vrot.slane %v2949_v36, 2  ;;  %3526 = vmatpush.bf16.msra.mxu3 %v4926_v33 }
 0x521   : > { %v3111_v48 = vpack.c.b16 %v3075_v52, %v3074_v34  ;;  %v4937_v34 = vld [vmem:[%s7822_s5 + $0x68] sm:$0xff] }
 0x522   : > { %v2993_v57 = vsel %vm567_vm5, %v2990_v41, %v2992_v19  ;;  %v2991_v59 = vsel %vm567_vm5, %v2988_v31, %v2990_v41  ;;  %3572 = vmatpush.bf16.msra.mxu0 %v4937_v34  ;;  %v4924_v31 = vld [vmem:[%s7822_s5] sm:$0xff] }
 0x523   : > { %v3029_v0 = vmax.f32 %v2949_v36, %v2993_v57  ;;  %v3028_v25 = vmax.f32 %v2948_v40, %v2991_v59  ;;  %v3123_v16 = vrot.slane %v3111_v48, 2  ;;  %3159 = vrot.lane.b32.xlu2 %v3111_v48, %s7856_s14  ;;  %3621 = vmatpush.bf16.msrb.mxu1 %v4945_v29  ;;  %v4934_v40 = vld [vmem:[%s7822_s5 + $0x50] sm:$0xff] }
 0x524   : > { %3527 = vmatpush.bf16.msra.mxu3 %v4925_v3 }
 0x525   : > { %v3045_v4 = vpack.c.bf16 %v3029_v0, %v3029_v0  ;;  %v3044_v53 = vpack.c.bf16 %v3028_v25, %v3028_v25  ;;  %v3124_v27 = vsel %vm567_vm5, %v3121_v54, %v3123_v16  ;;  %v4936_v54 = vld [vmem:[%s7822_s5 + $0x60] sm:$0xff] }
 0x526   : > { %3174 = vrot.lane.b32.xlu0 %v3124_v27, %s5261_s13  ;;  %3573 = vmatpush.bf16.msra.mxu0 %v4936_v54 }
 0x527   : > { %v3076_v39 = vunpack.c.l.b16 %v3044_v53  ;;  %v7505_v60 = vunpack.c.l.b16 %v3045_v4  ;;  %3622 = vmatpush.bf16.msrb.mxu1 %v4944_v37 }
 0x528   : > { %3528 = vmatpush.bf16.msra.mxu3 %v4924_v31 }
 0x529   : > { %v7503_v38 = vpack.c.b16 %v3076_v39, %v3075_v52  ;;  %v7512_v21 = vpack.c.b16 %v7505_v60, %v3076_v39 }
 0x52a   : > { %3574 = vmatpush.bf16.msra.mxu0 %v4935_v17 }
 0x52b   : > { %v3098_v58 = vrot.slane %v7503_v38, 2  ;;  %v3125_v28 = vrot.slane %v7512_v21, 2  ;;  %3623 = vmatpush.bf16.msrb.mxu1 %v4943_v26 }
 0x52d   : > { %v3099_v30 = vsel %vm567_vm5, %v3096_v55, %v3098_v58  ;;  %v3126_v7 = vsel %vm567_vm5, %v3123_v16, %v3125_v28 }
 0x52e   : > { %3142 = vrot.lane.b32.xlu1 %v3099_v30, %s7861_s29  ;;  %3193 = vrot.lane.b32.xlu0 %v7503_v38, %s7855_s16 }
 0x52f   : > { %3624 = vmatpush.bf16.msrb.mxu1 %v4942_v24  ;;  %3575 = vmatpush.bf16.msra.mxu0 %v4934_v40 }
 0x533   : > { %3625 = vmatpush.bf16.msrb.mxu1 %v4941_v8  ;;  %3576 = vmatpush.bf16.msra.mxu0 %v4933_v10 }
 0x536   : > { %3176 = vrot.lane.b32.xlu1 %v3126_v7, %s5261_s13  ;;  %3161 = vrot.lane.b32.xlu0 %v7512_v21, %s7856_s14 }
 0x537   : > { %3626 = vmatpush.bf16.msrb.mxu1 %v4940_v6  ;;  %3577 = vmatpush.bf16.msra.mxu0 %v4932_v5 }
 0x555   : > { %v3188_v9 = vpop.permute.xlu2 %3187 }
 0x556   : > { %4728 = vmatmul.msk.bf16.vlgmr.msrb.gmra.mxu2 %vm3504_vm4, %v3188_v9 }
 0x55d   : > { %v5172_v47 = vpop.permute.xlu2 %5171 }
 0x55e   : > { %v5174_v52 = vunpack.i.h.bf16 %v5172_v47  ;;  %v5173_v41 = vunpack.i.l.bf16 %v5172_v47 }
 0x560   : > { %v2920_v57 = vsel %vm2906_vm2, %v5173_v41, %v5174_v52  ;;  %v3755_v52 = vld [vmem:[%s7824_s7 + $0x38] sm:$0xf] }
 0x561   : > { %v3789_v41 = vunpack.c.l.b16 %v3755_v52 }
 0x565   : > { %v3190_v55 = vpop.permute.xlu2 %3189  ;;  %v3154_v63 = vpop.permute.xlu1 %3153 }
 0x566   : > { %4729 = vmatmul.msk.bf16.gmra.mxu2 %vm3504_vm4, %v3190_v55 }
 0x56d   : > { %v5182_v56 = vpop.permute.xlu2 %5181 }
 0x56e   : > { %v5184_v16 = vunpack.i.h.bf16 %v5182_v56  ;;  %v5183_v4 = vunpack.i.l.bf16 %v5182_v56 }
 0x570   : > { %v3171_v2 = vpop.permute.xlu1 %3170  ;;  %v3137_v46 = vpop.permute.xlu0 %3136  ;;  %v2922_v7 = vsel %vm2906_vm2, %v5183_v4, %v5184_v16 }
 0x571   : > { %v3277_v14 = vsel %vm662_vm9, %v3171_v2, %v3188_v9  ;;  %v3205_v44 = vsel %vm2013_vm15, %v7381_v32, %v3137_v46  ;;  %v3236_v36 = vsel %vm687_vm8, %v3137_v46, %v3154_v63  ;;  %v2952_v32 = vmax.f32 %v2804_v49, %v2920_v57 }
 0x572   : > { %v3253_v1 = vsel %vm3251_vm6, %v3236_v36, %v3171_v2  ;;  %3529 = vmatmul.bf16.vlgmr.msra.gmra.mxu3 %v3205_v44  ;;  %3627 = vmatmul.bf16.vlgmr.msrb.gmra.mxu1 %v3277_v14  ;;  %v2954_v43 = vmax.f32 %v2808_v22, %v2922_v7 }
 0x573   : > { %3578 = vmatmul.bf16.vlgmr.msra.gmra.mxu0 %v3253_v1  ;;  %v2996_v39 = vrot.slane %v2952_v32, 2 }
 0x574   : > { %v3000_v54 = vrot.slane %v2954_v43, 2 }
 0x575   : > { %v7591_v48 = vpop.permute.xlu2 %3191 }
 0x576   : > { %4730 = vmatmul.msk.bf16.gmra.mxu2 %vm3504_vm4, %v7591_v48  ;;  %v3018_v40 = vsel %vm567_vm5, %v3000_v54, 0.0 }
 0x577   : > { %v3034_v31 = vmax.f32 %v2954_v43, %v3018_v40 }
 0x578   : > { %v5167_v59 = vpop.permute.xlu0 %5166  ;;  %v3156_v45 = vpop.permute.xlu1 %3155 }
 0x579   : > { %v5169_v0 = vunpack.i.h.bf16 %v5167_v59  ;;  %v5168_v25 = vunpack.i.l.bf16 %v5167_v59  ;;  %v3050_v63 = vpack.c.bf16 %v3034_v31, %v3034_v31 }
 0x57b   : > { %v2919_v53 = vsel %vm2906_vm2, %v5168_v25, %v5169_v0  ;;  %v3082_v14 = vunpack.c.l.b16 %v3050_v63 }
 0x57c   : > { %v2951_v27 = vmax.f32 %v2802_v23, %v2919_v53 }
 0x57e   : > { %v2994_v30 = vrot.slane %v2951_v27, 2 }
 0x580   : > { %v3139_v35 = vpop.permute.xlu0 %3138  ;;  %v2995_v62 = vsel %vm567_vm5, %v2992_v19, %v2994_v30  ;;  %v2997_v18 = vsel %vm567_vm5, %v2994_v30, %v2996_v39 }
 0x581   : > { %v3209_v49 = vsel %vm2013_vm15, %v7383_v13, %v3139_v35  ;;  %v3030_v29 = vmax.f32 %v7485_v42, %v2995_v62  ;;  %v3031_v34 = vmax.f32 %v2951_v27, %v2997_v18  ;;  %v3238_v11 = vsel %vm687_vm8, %v3139_v35, %v3156_v45 }
 0x582   : > { %3534 = vmatmul.bf16.gmra.mxu3 %v3209_v49 }
 0x583   : > { %v3046_v23 = vpack.c.bf16 %v3030_v29, %v3030_v29  ;;  %v3047_v15 = vpack.c.bf16 %v3031_v34, %v3031_v34  ;;  %v3160_v29 = vpop.permute.xlu2 %3159 }
 0x585   : > { %v3078_v37 = vunpack.c.l.b16 %v3046_v23  ;;  %v3079_v17 = vunpack.c.l.b16 %v3047_v15 }
 0x587   : > { %v7613_v19 = vpack.c.b16 %v3078_v37, %v7505_v60  ;;  %v3113_v8 = vpack.c.b16 %v3079_v17, %v3078_v37  ;;  %v5262_v37 = vmov 0  }
 0x588   : > { %v3173_v26 = vpop.permute.xlu1 %3172  ;;  %v5177_v33 = vpop.permute.xlu0 %5176 }
 0x589   : > { %v3256_v13 = vsel %vm3251_vm6, %v3238_v11, %v3173_v26  ;;  %v3280_v42 = vsel %vm662_vm9, %v3173_v26, %v3190_v55  ;;  %v5179_v24 = vunpack.i.h.bf16 %v5177_v33  ;;  %v5178_v12 = vunpack.i.l.bf16 %v5177_v33  ;;  %3195 = vrot.lane.b32.xlu1 %v7613_v19, %s7855_s16  ;;  %v4955_v26 = vld [vmem:[%s7824_s7 + $0x30] sm:$0xff] }
 0x58a   : > { %3583 = vmatmul.bf16.gmra.mxu0 %v3256_v13  ;;  %v3100_v22 = vrot.slane %v7613_v19, 2  ;;  %3632 = vmatmul.bf16.gmra.mxu1 %v3280_v42  ;;  %v3127_v5 = vrot.slane %v3113_v8, 2 }
 0x58b   : > { %v2921_v60 = vsel %vm2906_vm2, %v5178_v12, %v5179_v24 }
 0x58c   : > { %v3101_v3 = vsel %vm567_vm5, %v3098_v58, %v3100_v22  ;;  %v2953_v10 = vmax.f32 %v2806_v50, %v2921_v60  ;;  %v3128_v50 = vsel %vm567_vm5, %v3125_v28, %v3127_v5  ;;  %v3797_v28 = vpack.c.b16 %v3789_v41, %v3789_v41 }
 0x58d   : > { %3144 = vrot.lane.b32.xlu2 %v3101_v3, %s7861_s29 }
 0x58e   : > { %v2998_v6 = vrot.slane %v2953_v10, 2  ;;  %v3831_v4 = vsel %vm1867_vm3, %v3797_v28, 0 }
 0x58f   : > { %3833 = vmatpush.bf16.msrb.mxu3 %v3831_v4 }
 0x590   : > { %v3001_v9 = vsel %vm567_vm5, %v2998_v6, %v3000_v54  ;;  %v3141_v47 = vpop.permute.xlu0 %3140  ;;  %v2999_v55 = vsel %vm567_vm5, %v2996_v39, %v2998_v6  ;;  %v3158_v36 = vpop.permute.xlu1 %3157 }
 0x591   : > { %v3033_v56 = vmax.f32 %v2953_v10, %v3001_v9  ;;  %3163 = vrot.lane.b32.xlu1 %v3113_v8, %s7856_s14  ;;  %v3213_v58 = vsel %vm2013_vm15, %v7435_v51, %v3141_v47  ;;  %v3032_v2 = vmax.f32 %v2952_v32, %v2999_v55  ;;  %v3240_v21 = vsel %vm687_vm8, %v3141_v47, %v3158_v36  ;;  %v4951_v10 = vld [vmem:[%s7824_s7 + $0x10] sm:$0xff] }
 0x592   : > { %3539 = vmatmul.bf16.gmra.mxu3 %v3213_v58 }
 0x593   : > { %v3049_v20 = vpack.c.bf16 %v3033_v56, %v3033_v56  ;;  %v3048_v46 = vpack.c.bf16 %v3032_v2, %v3032_v2  ;;  %3834 = vmatpush.bf16.msrb.mxu3 %v4955_v26  ;;  %v4950_v2 = vld [vmem:[%s7824_s7 + $0x8] sm:$0xff] }
 0x595   : > { %3178 = vrot.lane.b32.xlu2 %v3128_v50, %s5261_s13  ;;  %v3081_v44 = vunpack.c.l.b16 %v3049_v20  ;;  %v3080_v1 = vunpack.c.l.b16 %v3048_v46 }
 0x597   : > { %v7640_v51 = vpack.c.b16 %v3080_v1, %v3079_v17  ;;  %v7642_v57 = vpack.c.b16 %v3082_v14, %v3081_v44  ;;  %v3114_v39 = vpack.c.b16 %v3081_v44, %v3080_v1  ;;  %v4954_v17 = vld [vmem:[%s7824_s7 + $0x28] sm:$0xff] }
 0x598   : > { %v3175_v59 = vpop.permute.xlu0 %3174  ;;  %3835 = vmatpush.bf16.msrb.mxu3 %v4954_v17 }
 0x599   : > { %v3259_v0 = vsel %vm3251_vm6, %v3240_v21, %v3175_v59  ;;  %v3283_v25 = vsel %vm662_vm9, %v3175_v59, %v7591_v48  ;;  %v3102_v32 = vrot.slane %v7640_v51, 2  ;;  %v3104_v16 = vrot.slane %v7642_v57, 2 }
 0x59a   : > { %3588 = vmatmul.bf16.gmra.mxu0 %v3259_v0  ;;  %3637 = vmatmul.bf16.gmra.mxu1 %v3283_v25  ;;  %v3115_v48 = vpack.c.b16 %v3082_v14, %v3082_v14  ;;  %v3129_v7 = vrot.slane %v3114_v39, 2 }
 0x59b   : > { %v3105_v53 = vsel %vm567_vm5, %v3102_v32, %v3104_v16  ;;  %v3103_v27 = vsel %vm567_vm5, %v3100_v22, %v3102_v32  ;;  %v3107_v15 = vsel %vm567_vm5, %v3104_v16, 0  ;;  %v4953_v22 = vld [vmem:[%s7824_s7 + $0x20] sm:$0xff] }
 0x59c   : > { %3148 = vrot.lane.b32.xlu1 %v3105_v53, %s7861_s29  ;;  %3146 = vrot.lane.b32.xlu0 %v3103_v27, %s7861_s29  ;;  %v3131_v62 = vrot.slane %v3115_v48, 2  ;;  %v3130_v49 = vsel %vm567_vm5, %v3127_v5, %v3129_v7  ;;  %v3117_v11 = vsel %vm1867_vm3, %v3115_v48, 0  ;;  %v7719_v32 = vld [vmem:[%s7823_s6] ss:$0 sm:$0xff] }
 0x59d   : > { %3197 = vrot.lane.b32.xlu2 %v7640_v51, %s7855_s16  ;;  %3836 = vmatpush.bf16.msrb.mxu3 %v4953_v22 }
 0x59e   : > { %v3132_v18 = vsel %vm567_vm5, %v3129_v7, %v3131_v62  ;;  %v3134_v54 = vsel %vm2379_vm12, %v3131_v62, 0  ;;  %vm3805_vm5 = vcmask 982016  }
 0x5a0   : > { %v3143_v30 = vpop.permute.xlu1 %3142  ;;  %v3194_v45 = vpop.permute.xlu0 %3193 }
 0x5a1   : > { %v3217_v35 = vsel %vm2013_vm15, %v7461_v61, %v3143_v30  ;;  %4731 = vmatmul.msk.bf16.gmra.mxu2 %vm3504_vm4, %v3194_v45  ;;  %v3242_v34 = vsel %vm687_vm8, %v3143_v30, %v3160_v29 }
 0x5a2   : > { %3544 = vmatmul.bf16.gmra.mxu3 %v3217_v35 }
 0x5a4   : > { %3182 = vrot.lane.b32.xlu1 %v3132_v18, %s5261_s13  ;;  %3180 = vrot.lane.b32.xlu0 %v3130_v49, %s5261_s13 }
 0x5a5   : > { %3165 = vrot.lane.b32.xlu2 %v3114_v39, %s7856_s14 }
 0x5a8   : > { %v3177_v43 = vpop.permute.xlu1 %3176  ;;  %v3162_v42 = vpop.permute.xlu0 %3161 }
 0x5a9   : > { %v3262_v61 = vsel %vm3251_vm6, %v3242_v34, %v3177_v43  ;;  %v3286_v23 = vsel %vm662_vm9, %v3177_v43, %v3194_v45 }
 0x5aa   : > { %3593 = vmatmul.bf16.gmra.mxu0 %v3262_v61  ;;  %3642 = vmatmul.bf16.gmra.mxu1 %v3286_v23 }
 0x5ac   : > { %3201 = vrot.lane.b32.xlu1 %v5262_v37, %s7855_s16  ;;  %3199 = vrot.lane.b32.xlu0 %v7642_v57, %s7855_s16 }
 0x5ad   : > { %3150 = vrot.lane.b32.xlu2 %v3107_v15, %s7861_s29  ;;  %s4113_s29 = sshll.u32 %s378_s30, 2 }
 0x5b4   : > { %3167 = vrot.lane.b32.xlu0 %v3117_v11, %s7856_s14  ;;  %s4045_s14 = scalar_lea.hbm %s7828_s11, %s4801_s0 }
 0x5b5   : > { %3184 = vrot.lane.b32.xlu2 %v3134_v54, %s5261_s13  ;;  %s380_s13 = scalar_lea.vmem [#allocation2], %s4113_s29  ;;  %s4049_s1 = sshll.u32 %s4045_s14, 4  ;;  %s4050_s1 = int_to_ptr.hbm [resolvable:$true] %s4049_s1 }
 0x5b6   : > { %s4047_s15 = sshll.u32 %s380_s13, 4  ;;  %s5202_s2 = sshra.s32 %s4050_s1, 4  ;;  %s4048_s15 = int_to_ptr.vmem [resolvable:$true] %s4047_s15  ;;  %s5203_s2 = int_to_ptr.hbm [resolvable:$true] %s5202_s2 }
 0x5b7   : > { %s5204_s19 = scalar_lea.hbm %s5203_s2, 4  ;;  %p5209_p0 = scmp.lt.s32.totalorder %s5203_s2, %s7828_s11 }
 0x5b8   : > { %p5205_p11 = scmp.ne.s32.totalorder %s5203_s2, %s5204_s19  ;;  %p5210_p1 = scmp.lt.s32.totalorder %s5208_s12, %s5204_s19 }
 0x5ba   : > { %p5206_p12 = pnand %p5205_p11, %p5361_p5  ;;  %p5211_p2 = por %p5210_p1, %p5209_p0 }
 0x5bc   : > { %p5207_p13 = pneg %p5206_p12 }
 0x5be   : > { %p5212_p3 = pnand %p5211_p2, %p5207_p13 }
 0x5d9   : > { %v3677_v36 = vpop.f32.mrf.mxu2 }
 0x5e1   : > { %v3679_v4 = vpop.f32.mrf.mxu2 }
 0x5e7   : > { %v3145_v33 = vpop.permute.xlu2 %3144 }
 0x5e8   : > { %v3221_v13 = vsel %vm2013_vm15, %v7503_v38, %v3145_v33  ;;  %v3244_v24 = vsel %vm687_vm8, %v3145_v33, %v3162_v42  ;;  %v4952_v38 = vld [vmem:[%s7824_s7 + $0x18] sm:$0xff] }
 0x5e9   : > { %3549 = vmatmul.bf16.gmra.mxu3 %v3221_v13  ;;  %v3682_v43 = vpop.f32.mrf.mxu2 }
 0x5ea   : > { %3837 = vmatpush.bf16.msrb.mxu3 %v4952_v38 }
 0x5ee   : > { %3838 = vmatpush.bf16.msrb.mxu3 %v4951_v10 }
 0x5ef   : > { %v3179_v12 = vpop.permute.xlu2 %3178  ;;  %v3628_v46 = vpop.f32.mrf.mxu1 }
 0x5f0   : > { %v3265_v40 = vsel %vm3251_vm6, %v3244_v24, %v3179_v12  ;;  %v3579_v63 = vpop.f32.mrf.mxu0 }
 0x5f1   : > { %3598 = vmatmul.bf16.gmra.mxu0 %v3265_v40  ;;  %v3684_v22 = vpop.f32.mrf.mxu2 }
 0x5f2   : > { %3839 = vmatpush.bf16.msrb.mxu3 %v4950_v2 }
 0x5f5   : > { %v3530_v5 = vpop.f32.mrf.mxu3 }
 0x5f6   : > { %v3531_v53 = vadd.f32 %v7719_v32, %v3530_v5 }
 0x5f7   : > { %v3198_v8 = vpop.permute.xlu2 %3197  ;;  %v3630_v28 = vpop.f32.mrf.mxu1 }
 0x5f8   : > { %v3581_v1 = vpop.f32.mrf.mxu0  ;;  %v3580_v35 = vadd.f32 %v3579_v63, %v3531_v53 }
 0x5f9   : > { %v3687_v63 = vpop.f32.mrf.mxu2 }
 0x5fa   : > { %v3629_v29 = vadd.f32 %v3628_v46, %v3580_v35 }
 0x5fb   : > { %v3196_v60 = vpop.permute.xlu1 %3195 }
 0x5fc   : > { %4732 = vmatmul.msk.bf16.gmra.mxu2 %vm3504_vm4, %v3196_v60  ;;  %v3289_v3 = vsel %vm662_vm9, %v3179_v12, %v3196_v60  ;;  %v3678_v54 = vadd.f32 %v3677_v36, %v3629_v29  ;;  %v3916_v60 = vld [vmem:[%s7826_s9 + $0x28] sm:$0x3] }
 0x5fd   : > { %3647 = vmatmul.bf16.gmra.mxu1 %v3289_v3  ;;  %v3532_v50 = vpop.f32.mrf.mxu3  ;;  %v3942_v3 = vunpack.c.l.b16 %v3916_v60 }
 0x5fe   : > { %v3533_v16 = vadd.f32 %v7719_v32, %v3532_v50  ;;  %v3717_v33 = vmax.f32 %v3678_v54, 0.0 }
 0x5ff   : > { %v3166_v52 = vpop.permute.xlu2 %3165 }
 0x600   : > { %v3582_v39 = vadd.f32 %v3581_v1, %v3533_v16 }
 0x602   : > { %v3631_v18 = vadd.f32 %v3630_v28, %v3582_v39 }
 0x603   : > { %v3164_v9 = vpop.permute.xlu1 %3163 }
 0x604   : > { %v3680_v61 = vadd.f32 %v3679_v4, %v3631_v18 }
 0x605   : > { %v3535_v21 = vpop.f32.mrf.mxu3 }
 0x606   : > { %v3718_v26 = vmax.f32 %v3680_v61, 0.0  ;;  %v3536_v13 = vadd.f32 %v7719_v32, %v3535_v21 }
 0x607   : > { %v3151_v27 = vpop.permute.xlu2 %3150  ;;  %v3633_v30 = vpop.f32.mrf.mxu1 }
 0x608   : > { %v3233_v45 = vsel %vm2013_vm15, %v7642_v57, %v3151_v27  ;;  %v3733_v24 = vpack.c.bf16 %v3718_v26, %v3717_v33 }
 0x60c   : > { %4733 = vmatmul.msk.bf16.gmra.mxu2 %vm3504_vm4, %v3198_v8 }
 0x60d   : > { %v3537_v7 = vpop.f32.mrf.mxu3 }
 0x60e   : > { %v3147_v31 = vpop.permute.xlu0 %3146  ;;  %v3149_v20 = vpop.permute.xlu1 %3148  ;;  %v3538_v17 = vadd.f32 %v7719_v32, %v3537_v7 }
 0x60f   : > { %v3225_v6 = vsel %vm2013_vm15, %v7613_v19, %v3147_v31  ;;  %v3246_v47 = vsel %vm687_vm8, %v3147_v31, %v3164_v9  ;;  %v4949_v19 = vld [vmem:[%s7824_s7] sm:$0xff]  ;;  %v3229_v44 = vsel %vm2013_vm15, %v7640_v51, %v3149_v20  ;;  %v3248_v59 = vsel %vm687_vm8, %v3149_v20, %v3166_v52  ;;  %v3584_v51 = vpop.f32.mrf.mxu0  ;;  %v3185_v23 = vpop.permute.xlu2 %3184 }
 0x610   : > { %3554 = vmatmul.bf16.gmra.mxu3 %v3225_v6  ;;  %v3635_v11 = vpop.f32.mrf.mxu1  ;;  %v3585_v40 = vadd.f32 %v3584_v51, %v3536_v13  ;;  %v3948_v31 = vpack.c.b16 %v3942_v3, %v3942_v3  ;;  %v3689_v52 = vpop.f32.mrf.mxu2 }
 0x611   : > { %3840 = vmatpush.bf16.msrb.mxu3 %v4949_v19 }
 0x612   : > { %v3634_v6 = vadd.f32 %v3633_v30, %v3585_v40  ;;  %v3979_v5 = vsel %vm2379_vm12, %v3948_v31, 0  ;;  %v4958_v31 = vld [vmem:[%s7826_s9 + $0x10] sm:$0xff] }
 0x613   : > { %3983 = vmatpush.bf16.msrb.mxu0 %v3979_v5 }
 0x615   : > { %v3540_v57 = vpop.f32.mrf.mxu3 }
 0x616   : > { %v3181_v55 = vpop.permute.xlu0 %3180  ;;  %v3183_v41 = vpop.permute.xlu1 %3182  ;;  %v3541_v19 = vadd.f32 %v7719_v32, %v3540_v57 }
 0x617   : > { %v3268_v56 = vsel %vm3251_vm6, %v3246_v47, %v3181_v55  ;;  %v3292_v58 = vsel %vm662_vm9, %v3181_v55, %v3198_v8  ;;  %v3271_v0 = vsel %vm3251_vm6, %v3248_v59, %v3183_v41  ;;  %v3586_v49 = vpop.f32.mrf.mxu0  ;;  %v3683_v55 = vadd.f32 %v3682_v43, %v3634_v6 }
 0x618   : > { %3603 = vmatmul.bf16.gmra.mxu0 %v3268_v56  ;;  %3652 = vmatmul.bf16.gmra.mxu1 %v3292_v58  ;;  %v3587_v12 = vadd.f32 %v3586_v49, %v3538_v17  ;;  %v3638_v8 = vpop.f32.mrf.mxu1 }
 0x619   : > { %v3719_v2 = vmax.f32 %v3683_v55, 0.0 }
 0x61a   : > { %v3636_v38 = vadd.f32 %v3635_v11, %v3587_v12  ;;  %v4959_v11 = vld [vmem:[%s7826_s9 + $0x18] sm:$0xff] }
 0x61c   : > { %v3685_v9 = vadd.f32 %v3684_v22, %v3636_v38 }
 0x61d   : > { %v3542_v10 = vpop.f32.mrf.mxu3 }
 0x61e   : > { %v3200_v14 = vpop.permute.xlu0 %3199  ;;  %v3202_v48 = vpop.permute.xlu1 %3201  ;;  %v3720_v56 = vmax.f32 %v3685_v9, 0.0  ;;  %v3543_v58 = vadd.f32 %v7719_v32, %v3542_v10 }
 0x61f   : > { %4734 = vmatmul.msk.bf16.gmra.mxu2 %vm3504_vm4, %v3200_v14  ;;  %v3295_v25 = vsel %vm662_vm9, %v3183_v41, %v3200_v14  ;;  %v3298_v37 = vsel %vm662_vm9, %v3185_v23, %v3202_v48  ;;  %v3589_v42 = vpop.f32.mrf.mxu0  ;;  %vm4032_vm9 = vcmask 76800  }
 0x620   : > { %3559 = vmatmul.bf16.gmra.mxu3 %v3229_v44  ;;  %v3640_v20 = vpop.f32.mrf.mxu1  ;;  %v3734_v46 = vpack.c.bf16 %v3720_v56, %v3719_v2  ;;  %v3590_v44 = vadd.f32 %v3589_v42, %v3541_v19 }
 0x622   : > { %v3639_v41 = vadd.f32 %v3638_v8, %v3590_v44 }
 0x624   : > { %v3692_v16 = vpop.f32.mrf.mxu2 }
 0x625   : > { %v3545_v50 = vpop.f32.mrf.mxu3 }
 0x626   : > { %v3168_v62 = vpop.permute.xlu0 %3167 }
 0x627   : > { %v3250_v34 = vsel %vm687_vm8, %v3151_v27, %v3168_v62  ;;  %v3591_v47 = vpop.f32.mrf.mxu0  ;;  %v3546_v27 = vadd.f32 %v7719_v32, %v3545_v50  ;;  %vm4030_vm8 = vcmask 1042432  }
 0x628   : > { %3608 = vmatmul.bf16.gmra.mxu0 %v3271_v0  ;;  %3657 = vmatmul.bf16.gmra.mxu1 %v3295_v25  ;;  %v3274_v15 = vsel %vm3251_vm6, %v3250_v34, %v3185_v23  ;;  %v3592_v14 = vadd.f32 %v3591_v47, %v3543_v58  ;;  %v3643_v59 = vpop.f32.mrf.mxu1  ;;  %v3688_v0 = vadd.f32 %v3687_v63, %v3639_v41 }
 0x62a   : > { %v3641_v1 = vadd.f32 %v3640_v20, %v3592_v14  ;;  %v3721_v53 = vmax.f32 %v3688_v0, 0.0 }
 0x62c   : > { %v3690_v21 = vadd.f32 %v3689_v52, %v3641_v1  ;;  %v3694_v18 = vpop.f32.mrf.mxu2 }
 0x62d   : > { %v3547_v28 = vpop.f32.mrf.mxu3 }
 0x62e   : > { %v3722_v25 = vmax.f32 %v3690_v21, 0.0  ;;  %v3548_v51 = vadd.f32 %v7719_v32, %v3547_v28 }
 0x62f   : > { %4735 = vmatmul.msk.bf16.gmra.mxu2 %vm3504_vm4, %v3202_v48  ;;  %v3594_v36 = vpop.f32.mrf.mxu0 }
 0x630   : > { %3564 = vmatmul.bf16.gmra.mxu3 %v3233_v45  ;;  %v3735_v39 = vpack.c.bf16 %v3722_v25, %v3721_v53  ;;  %v3595_v30 = vadd.f32 %v3594_v36, %v3546_v27  ;;  %v3645_v7 = vpop.f32.mrf.mxu1  ;;  %v4960_v45 = vld [vmem:[%s7826_s9 + $0x20] sm:$0xff] }
 0x631   : > { %3984 = vmatpush.bf16.msrb.mxu0 %v4960_v45 }
 0x632   : > { %v3644_v62 = vadd.f32 %v3643_v59, %v3595_v30 }
 0x634   : > { %v3693_v29 = vadd.f32 %v3692_v16, %v3644_v62 }
 0x635   : > { %3985 = vmatpush.bf16.msrb.mxu0 %v4959_v11 }
 0x636   : > { %v3723_v43 = vmax.f32 %v3693_v29, 0.0 }
 0x637   : > { %v3596_v4 = vpop.f32.mrf.mxu0 }
 0x638   : > { %3613 = vmatmul.bf16.gmra.mxu0 %v3274_v15  ;;  %3662 = vmatmul.bf16.gmra.mxu1 %v3298_v37  ;;  %v3597_v48 = vadd.f32 %v3596_v4, %v3548_v51  ;;  %v4957_v51 = vld [vmem:[%s7826_s9 + $0x8] sm:$0xff] }
 0x639   : > { %3986 = vmatpush.bf16.msrb.mxu0 %v4958_v31 }
 0x63a   : > { %v3646_v35 = vadd.f32 %v3645_v7, %v3597_v48  ;;  %v4956_v7 = vld [vmem:[%s7826_s9] sm:$0xff] }
 0x63c   : > { %v3695_v49 = vadd.f32 %v3694_v18, %v3646_v35 }
 0x63d   : > { %3987 = vmatpush.bf16.msrb.mxu0 %v4957_v51 }
 0x63e   : > { %v3724_v34 = vmax.f32 %v3695_v49, 0.0 }
 0x640   : > { %4764 = vmatmul.msk.bf16.vlgmr.msrb.gmra.mxu3 %vm3805_vm5, %v3733_v24  ;;  %v3736_v61 = vpack.c.bf16 %v3724_v34, %v3723_v43 }
 0x641   : > { %3988 = vmatpush.bf16.msrb.mxu0 %v4956_v7 }
 0x650   : > { %4765 = vmatmul.msk.bf16.gmra.mxu3 %vm3805_vm5, %v3734_v46 }
 0x660   : > { %4766 = vmatmul.msk.bf16.gmra.mxu3 %vm3805_vm5, %v3735_v39 }
 0x66c   : > { %v3550_v23 = vpop.f32.mrf.mxu3 }
 0x66d   : > { %v3551_v57 = vadd.f32 %v7719_v32, %v3550_v23 }
 0x66e   : > { %v3599_v15 = vpop.f32.mrf.mxu0 }
 0x66f   : > { %v3600_v13 = vadd.f32 %v3599_v15, %v3551_v57 }
 0x670   : > { %4767 = vmatmul.msk.bf16.gmra.mxu3 %vm3805_vm5, %v3736_v61 }
 0x674   : > { %v3552_v54 = vpop.f32.mrf.mxu3 }
 0x675   : > { %v3553_v17 = vadd.f32 %v7719_v32, %v3552_v54 }
 0x676   : > { %v3601_v33 = vpop.f32.mrf.mxu0 }
 0x677   : > { %v3602_v24 = vadd.f32 %v3601_v33, %v3553_v17 }
 0x67a   : > { %v3648_v37 = vpop.f32.mrf.mxu1 }
 0x67b   : > { %v3649_v12 = vadd.f32 %v3648_v37, %v3600_v13 }
 0x67f   : > { %v3697_v26 = vpop.f32.mrf.mxu2 }
 0x680   : > { %v3698_v22 = vadd.f32 %v3697_v26, %v3649_v12 }
 0x682   : > { %v3650_v42 = vpop.f32.mrf.mxu1  ;;  %v3725_v38 = vmax.f32 %v3698_v22, 0.0 }
 0x683   : > { %v3651_v40 = vadd.f32 %v3650_v42, %v3602_v24 }
 0x687   : > { %v3699_v60 = vpop.f32.mrf.mxu2 }
 0x688   : > { %v3700_v3 = vadd.f32 %v3699_v60, %v3651_v40 }
 0x68a   : > { %v3726_v8 = vmax.f32 %v3700_v3, 0.0 }
 0x68c   : > { %v3737_v10 = vpack.c.bf16 %v3726_v8, %v3725_v38  ;;  %v5186_v8 = vld [vmem:[%s7825_s8] ss:$0 sm:$0xff] }
 0x68e   : > { %4768 = vmatmul.msk.bf16.gmra.mxu3 %vm3805_vm5, %v3737_v10 }
 0x68f   : > { %v3702_v6 = vpop.f32.mrf.mxu2 }
 0x693   : > { %v3555_v5 = vpop.f32.mrf.mxu3 }
 0x694   : > { %v3556_v9 = vadd.f32 %v7719_v32, %v3555_v5 }
 0x695   : > { %v3604_v47 = vpop.f32.mrf.mxu0  ;;  %v3653_v55 = vpop.f32.mrf.mxu1 }
 0x696   : > { %v3605_v63 = vadd.f32 %v3604_v47, %v3556_v9 }
 0x697   : > { %v3704_v56 = vpop.f32.mrf.mxu2 }
 0x698   : > { %v3654_v2 = vadd.f32 %v3653_v55, %v3605_v63 }
 0x69a   : > { %v3703_v14 = vadd.f32 %v3702_v6, %v3654_v2 }
 0x69b   : > { %v3557_v58 = vpop.f32.mrf.mxu3 }
 0x69c   : > { %v3558_v19 = vadd.f32 %v7719_v32, %v3557_v58  ;;  %v3727_v41 = vmax.f32 %v3703_v14, 0.0 }
 0x69d   : > { %v3606_v20 = vpop.f32.mrf.mxu0  ;;  %v3655_v50 = vpop.f32.mrf.mxu1 }
 0x69e   : > { %v3607_v46 = vadd.f32 %v3606_v20, %v3558_v19 }
 0x6a0   : > { %v3656_v44 = vadd.f32 %v3655_v50, %v3607_v46 }
 0x6a2   : > { %v3705_v36 = vadd.f32 %v3704_v56, %v3656_v44  ;;  %v3707_v1 = vpop.f32.mrf.mxu2 }
 0x6a3   : > { %v3560_v52 = vpop.f32.mrf.mxu3 }
 0x6a4   : > { %v3728_v21 = vmax.f32 %v3705_v36, 0.0  ;;  %v3561_v59 = vadd.f32 %v7719_v32, %v3560_v52 }
 0x6a5   : > { %v3609_v28 = vpop.f32.mrf.mxu0  ;;  %v3658_v0 = vpop.f32.mrf.mxu1 }
 0x6a6   : > { %v3738_v25 = vpack.c.bf16 %v3728_v21, %v3727_v41  ;;  %v3610_v16 = vadd.f32 %v3609_v28, %v3561_v59 }
 0x6a8   : > { %4769 = vmatmul.msk.bf16.gmra.mxu3 %vm3805_vm5, %v3738_v25  ;;  %v3659_v53 = vadd.f32 %v3658_v0, %v3610_v16 }
 0x6aa   : > { %v3709_v27 = vpop.f32.mrf.mxu2  ;;  %v3708_v35 = vadd.f32 %v3707_v1, %v3659_v53 }
 0x6ab   : > { %v3562_v4 = vpop.f32.mrf.mxu3 }
 0x6ac   : > { %v3563_v39 = vadd.f32 %v7719_v32, %v3562_v4  ;;  %v3729_v29 = vmax.f32 %v3708_v35, 0.0 }
 0x6ad   : > { %v3611_v48 = vpop.f32.mrf.mxu0  ;;  %v3660_v30 = vpop.f32.mrf.mxu1 }
 0x6ae   : > { %v3612_v45 = vadd.f32 %v3611_v48, %v3563_v39 }
 0x6b0   : > { %v3661_v62 = vadd.f32 %v3660_v30, %v3612_v45 }
 0x6b2   : > { %v3710_v18 = vadd.f32 %v3709_v27, %v3661_v62  ;;  %v3712_v37 = vpop.f32.mrf.mxu2 }
 0x6b3   : > { %v3565_v49 = vpop.f32.mrf.mxu3 }
 0x6b4   : > { %v3730_v34 = vmax.f32 %v3710_v18, 0.0  ;;  %v3566_v43 = vadd.f32 %v7719_v32, %v3565_v49 }
 0x6b5   : > { %v3614_v61 = vpop.f32.mrf.mxu0  ;;  %v3663_v23 = vpop.f32.mrf.mxu1 }
 0x6b6   : > { %v3739_v15 = vpack.c.bf16 %v3730_v34, %v3729_v29  ;;  %v3615_v54 = vadd.f32 %v3614_v61, %v3566_v43 }
 0x6b8   : > { %4770 = vmatmul.msk.bf16.gmra.mxu3 %vm3805_vm5, %v3739_v15  ;;  %v3664_v57 = vadd.f32 %v3663_v23, %v3615_v54 }
 0x6ba   : > { %v3713_v42 = vadd.f32 %v3712_v37, %v3664_v57  ;;  %v3714_v12 = vpop.f32.mrf.mxu2 }
 0x6bb   : > { %v3567_v11 = vpop.f32.mrf.mxu3 }
 0x6bc   : > { %v3568_v26 = vadd.f32 %v7719_v32, %v3567_v11  ;;  %v3731_v60 = vmax.f32 %v3713_v42, 0.0 }
 0x6bd   : > { %v3616_v17 = vpop.f32.mrf.mxu0  ;;  %v3665_v13 = vpop.f32.mrf.mxu1 }
 0x6be   : > { %v3617_v33 = vadd.f32 %v3616_v17, %v3568_v26 }
 0x6c0   : > { %v3666_v24 = vadd.f32 %v3665_v13, %v3617_v33 }
 0x6c2   : > { %v3715_v22 = vadd.f32 %v3714_v12, %v3666_v24 }
 0x6c3   : > { %v3842_v40 = vpop.f32.mrf.mxu3 }
 0x6c4   : > { %v3732_v3 = vmax.f32 %v3715_v22, 0.0  ;;  %v3843_v10 = vadd.f32 %v5186_v8, %v3842_v40  ;;  %v5187_v40 = vld [vmem:[%s7827_s10] ss:$0 sm:$0xff] }
 0x6c6   : > { %v3740_v38 = vpack.c.bf16 %v3732_v3, %v3731_v60  ;;  %v3882_v6 = vmax.f32 %v3843_v10, 0.0 }
 0x6c8   : > { %4771 = vmatmul.msk.bf16.gmra.mxu3 %vm3805_vm5, %v3740_v38 }
 0x6cb   : > { %v3844_v31 = vpop.f32.mrf.mxu3 }
 0x6cc   : > { %v3845_v32 = vadd.f32 %v5186_v8, %v3844_v31 }
 0x6ce   : > { %v3883_v5 = vmax.f32 %v3845_v32, 0.0 }
 0x6d0   : > { %v3898_v9 = vpack.c.bf16 %v3883_v5, %v3882_v6 }
 0x6d2   : > { %4792 = vmatmul.msk.bf16.vlgmr.msrb.gmra.mxu0 %vm1938_vm13, %v3898_v9 }
 0x6d3   : > { %v3847_v47 = vpop.f32.mrf.mxu3 }
 0x6d4   : > { %v3848_v55 = vadd.f32 %v5186_v8, %v3847_v47 }
 0x6d6   : > { %v3884_v58 = vmax.f32 %v3848_v55, 0.0 }
 0x6db   : > { %v3849_v63 = vpop.f32.mrf.mxu3 }
 0x6dc   : > { %v3850_v56 = vadd.f32 %v5186_v8, %v3849_v63 }
 0x6de   : > { %v3885_v2 = vmax.f32 %v3850_v56, 0.0 }
 0x6e0   : > { %v3899_v19 = vpack.c.bf16 %v3885_v2, %v3884_v58 }
 0x6e2   : > { %4793 = vmatmul.msk.bf16.gmra.mxu0 %vm1938_vm13, %v3899_v19 }
 0x6e3   : > { %v3852_v20 = vpop.f32.mrf.mxu3 }
 0x6e4   : > { %v3853_v50 = vadd.f32 %v5186_v8, %v3852_v20 }
 0x6e6   : > { %v3886_v44 = vmax.f32 %v3853_v50, 0.0 }
 0x6eb   : > { %v3854_v46 = vpop.f32.mrf.mxu3 }
 0x6ec   : > { %v3855_v14 = vadd.f32 %v5186_v8, %v3854_v46 }
 0x6ee   : > { %v3887_v36 = vmax.f32 %v3855_v14, 0.0 }
 0x6f0   : > { %v3900_v1 = vpack.c.bf16 %v3887_v36, %v3886_v44 }
 0x6f2   : > { %4794 = vmatmul.msk.bf16.gmra.mxu0 %vm1938_vm13, %v3900_v1 }
 0x6f3   : > { %v3857_v52 = vpop.f32.mrf.mxu3 }
 0x6f4   : > { %v3858_v41 = vadd.f32 %v5186_v8, %v3857_v52 }
 0x6f6   : > { %v3888_v28 = vmax.f32 %v3858_v41, 0.0 }
 0x6fb   : > { %v3859_v21 = vpop.f32.mrf.mxu3 }
 0x6fc   : > { %v3860_v59 = vadd.f32 %v5186_v8, %v3859_v21 }
 0x6fe   : > { %v3889_v0 = vmax.f32 %v3860_v59, 0.0 }
 0x700   : > { %v3901_v25 = vpack.c.bf16 %v3889_v0, %v3888_v28 }
 0x702   : > { %4795 = vmatmul.msk.bf16.gmra.mxu0 %vm1938_vm13, %v3901_v25 }
 0x711   : > { %v3862_v51 = vpop.f32.mrf.mxu3 }
 0x712   : > { %v3863_v16 = vadd.f32 %v5186_v8, %v3862_v51 }
 0x714   : > { %v3890_v27 = vmax.f32 %v3863_v16, 0.0 }
 0x719   : > { %v3864_v4 = vpop.f32.mrf.mxu3 }
 0x71a   : > { %v3865_v53 = vadd.f32 %v5186_v8, %v3864_v4 }
 0x71c   : > { %v3891_v39 = vmax.f32 %v3865_v53, 0.0 }
 0x71e   : > { %v3902_v48 = vpack.c.bf16 %v3891_v39, %v3890_v27 }
 0x720   : > { %4796 = vmatmul.msk.bf16.gmra.mxu0 %vm1938_vm13, %v3902_v48 }
 0x72b   : > { %v3867_v30 = vpop.f32.mrf.mxu3 }
 0x72c   : > { %v3868_v7 = vadd.f32 %v5186_v8, %v3867_v30 }
 0x72e   : > { %v3892_v62 = vmax.f32 %v3868_v7, 0.0 }
 0x733   : > { %v3869_v45 = vpop.f32.mrf.mxu3 }
 0x734   : > { %v3870_v35 = vadd.f32 %v5186_v8, %v3869_v45 }
 0x736   : > { %v3893_v18 = vmax.f32 %v3870_v35, 0.0 }
 0x738   : > { %v3903_v49 = vpack.c.bf16 %v3893_v18, %v3892_v62 }
 0x73a   : > { %4797 = vmatmul.msk.bf16.gmra.mxu0 %vm1938_vm13, %v3903_v49 }
 0x73b   : > { %v3872_v29 = vpop.f32.mrf.mxu3 }
 0x73c   : > { %v3873_v34 = vadd.f32 %v5186_v8, %v3872_v29 }
 0x73e   : > { %v3894_v23 = vmax.f32 %v3873_v34, 0.0 }
 0x743   : > { %v3874_v43 = vpop.f32.mrf.mxu3 }
 0x744   : > { %v3875_v61 = vadd.f32 %v5186_v8, %v3874_v43 }
 0x746   : > { %v3895_v15 = vmax.f32 %v3875_v61, 0.0 }
 0x748   : > { %v3904_v37 = vpack.c.bf16 %v3895_v15, %v3894_v23 }
 0x74a   : > { %4798 = vmatmul.msk.bf16.gmra.mxu0 %vm1938_vm13, %v3904_v37 }
 0x74b   : > { %v3877_v54 = vpop.f32.mrf.mxu3 }
 0x74c   : > { %v3878_v57 = vadd.f32 %v5186_v8, %v3877_v54 }
 0x74e   : > { %v3896_v33 = vmax.f32 %v3878_v57, 0.0 }
 0x74f   : > { %v3990_v11 = vpop.f32.mrf.mxu0 }
 0x750   : > { %v3991_v38 = vadd.f32 %v5187_v40, %v3990_v11 }
 0x753   : > { %v3879_v26 = vpop.f32.mrf.mxu3 }
 0x754   : > { %v3880_v17 = vadd.f32 %v5186_v8, %v3879_v26 }
 0x756   : > { %v3897_v13 = vmax.f32 %v3880_v17, 0.0 }
 0x757   : > { %v3992_v42 = vpop.f32.mrf.mxu0 }
 0x758   : > { %v3905_v24 = vpack.c.bf16 %v3897_v13, %v3896_v33 }
 0x75a   : > { %4799 = vmatmul.msk.bf16.gmra.mxu0 %vm1938_vm13, %v3905_v24 }
 0x75f   : > { %v3994_v12 = vpop.f32.mrf.mxu0 }
 0x767   : > { %v3995_v22 = vpop.f32.mrf.mxu0 }
 0x76f   : > { %v3997_v60 = vpop.f32.mrf.mxu0 }
 0x770   : > { %v3998_v3 = vadd.f32 %v5187_v40, %v3997_v60 }
 0x772   : > { %v4019_v10 = vrot.slane %v3998_v3, 7 }
 0x774   : > { %v4028_v8 = vsel %vm4027_vm7, %v3991_v38, %v4019_v10 }
 0x777   : > { %v3999_v31 = vpop.f32.mrf.mxu0 }
 0x77f   : > { %v4001_v32 = vpop.f32.mrf.mxu0 }
 0x787   : > { %v4002_v6 = vpop.f32.mrf.mxu0 }
 0x79d   : > { %v4004_v5 = vpop.f32.mrf.mxu0 }
 0x79e   : > { %v4005_v63 = vadd.f32 %v5187_v40, %v4004_v5 }
 0x7a0   : > { %v4022_v56 = vrot.slane %v4005_v63, 6 }
 0x7a2   : > { %v4029_v20 = vsel %vm2379_vm12, %v4028_v8, %v4022_v56 }
 0x7a5   : > { %v4006_v9 = vpop.f32.mrf.mxu0 }
 0x7b7   : > { %v4008_v47 = vpop.f32.mrf.mxu0 }
 0x7bf   : > { %v4009_v55 = vpop.f32.mrf.mxu0 }
 0x7c7   : > { %v4011_v58 = vpop.f32.mrf.mxu0 }
 0x7c8   : > { %v4012_v2 = vadd.f32 %v5187_v40, %v4011_v58 }
 0x7ca   : > { %v4025_v19 = vrot.slane %v4012_v2, 5 }
 0x7cc   : > { %v4031_v50 = vsel %vm4030_vm8, %v4029_v20, %v4025_v19 }
 0x7cd   : > { %4033 = vst.msk [vmem:[%s380_s13] sm:$0xf] %vm4032_vm9, %v4031_v50 }
 0x7ce   : > { %5215 = shalt.err (!%p5212_p3)
}
 0x7cf   : > { %4975 = dma.vmem_to_hbm [thread:$0]  (%p5361_p5), %s4048_s15, 64, %s4050_s1, %s4035_s21   ;;  %v4013_v46 = vpop.f32.mrf.mxu0 }
 0x7d7   : > { %v4015_v14 = vpop.f32.mrf.mxu0 }
 0x7df   : > { %v4016_v44 = vpop.f32.mrf.mxu0 }
 0x7e0 PF: > { %p4981_p4 = scmp.ge.s32.totalorder %s5250_s20, 2  ;;  %s4061_s30 = sand.u32 1, %s5238_s17  }
 0x7e1   : > { %s4062_s0 = scalar_lea.sflag [#allocation3], %s4061_s30 }
 0x7e2   : > { %p4978_p7 = pnand %p4981_p4, %p5365_p6 }
 0x7e4   : > { %p4979_p8 = pneg %p4978_p7 }
 0x7e6   : > { %5233 = dma.done.wait (%p4979_p8), %s4062_s0, 64  }
 0x7e7   : > { %5235 = vsyncadd (%p4979_p8), %s4062_s0, 4294967232  ;;  %s7863_s20 = sld [smem:[#allocation6_spill]]  ;;  %s7866_s17 = smov %s5242_s18 }
 0x7e8   : > { %s7864_s29 = sld [smem:[#allocation5_spill]] }
 0x7e9   : > { %s7865_s19 = sld [smem:[#allocation7_spill]] }
 0x7ed   : > { %p21_p5 = scmp.ge.s32.totalorder %s7863_s20, 4  }
 0x7ee   : > { %s7867_s18 = smov %s7864_s29 }
 0x7ef   :  { %23 = sbr.rel (!%p21_p5) target bundleno = 7 (0x7), region = 99 }
 0x7f4   :  { %4068 = vsyncpa [#allocation3], 1 }
 0x7f5   :  { %4070 = vsyncpa [#allocation3 + $0x1], 1 }

</bundles_post_ra>
